<compile_context>
chip_gen: v7x
topology: tpu7x:2x2x1
jax: 0.10.0
libtpu: 0.0.40
codegen_flags: <defaults>
</compile_context>

<pallas_src>
import functools

import jax
import jax.numpy as jnp
from jax.experimental import pallas as pl
from jax.experimental.pallas import tpu as pltpu


# ----------------------------------------------------------------------------
# Kernels
# ----------------------------------------------------------------------------
def _finalize(x, mask_ref, pred_ref, inv_ref, sums_ref):
    """Shared epilogue: store pred / inverse mask and lane-dense partial sums."""
    pred_ref[...] = x
    y = mask_ref[...]
    inv_ref[...] = 1.0 - y
    # Numerically stable BCE-with-logits per-element term (mean taken outside).
    bce = jnp.maximum(x, 0.0) - x * y + jnp.log1p(jnp.exp(-jnp.abs(x)))
    s_bce = jnp.sum(bce)
    s_x = jnp.sum(x)
    s_y = jnp.sum(y)
    # Lanes 0..2 = [sum(bce), sum(x - y), sum(x)]; rest zero.
    lane = jax.lax.broadcasted_iota(jnp.int32, (1, 1, 128), 2)
    sums_ref[...] = (jnp.where(lane == 0, s_bce, 0.0) +
                     jnp.where(lane == 1, s_x - s_y, 0.0) +
                     jnp.where(lane == 2, s_x, 0.0))


def _mxu_kernel(img_ref, mask_ref, convmat_ref, bias_ref,
                pred_ref, inv_ref, sums_ref):
    # Whole 3x3 conv (zero padding already folded into convmat) as one MXU
    # matmul: (Bt, C*Pp) @ (C*Pp, Pp) with f32 accumulation.
    x = jnp.dot(img_ref[...], convmat_ref[...],
                preferred_element_type=jnp.float32,
                precision=jax.lax.Precision.HIGHEST)
    x = x + bias_ref[0]
    _finalize(x, mask_ref, pred_ref, inv_ref, sums_ref)


def _roll_kernel(img_ref, mask_ref, wmask_ref, bias_ref,
                 pred_ref, inv_ref, sums_ref, *, W, C, Pp):
    # Fallback for large images (conv matrix would be O(P^2) and not fit VMEM):
    # 9 XLU rolls of the whole (Bt, C*Pp) slab, per-tap pre-masked weight rows
    # (stride-0 sublane broadcast), single running accumulator.
    CP = C * Pp
    Bt = img_ref.shape[0]
    shifts = [(-((kh - 1) * W + (kw - 1))) % CP
              for kh in range(3) for kw in range(3)]
    slab = img_ref[...]
    acc = jnp.zeros_like(slab)
    for t, s in enumerate(shifts):
        shifted = slab if s == 0 else pltpu.roll(slab, shift=s, axis=1)
        wrow = wmask_ref[pl.ds(t, Bt, stride=0), :]       # (Bt, C*Pp) broadcast
        acc = acc + shifted * wrow
    x = acc[:, :Pp]
    for c in range(1, C):
        x = x + acc[:, c * Pp:(c + 1) * Pp]
    x = x + bias_ref[0]
    _finalize(x, mask_ref, pred_ref, inv_ref, sums_ref)


# ----------------------------------------------------------------------------
# Tiling heuristics
# ----------------------------------------------------------------------------
def _pick_bt(Bp, Pp, C, resident_bytes):
    """Batch tile: multiple of 8, divisor of Bp, aiming for >=4 grid steps when
    the batch allows, with a generation-safe (~24 MiB) per-step block budget
    that accounts for double-buffered I/O, resident weights and live temps."""
    io_per_row = 2 * (C + 3) * Pp * 4       # img + mask + pred + inv, x2 buffers
    tmp_per_row = 6 * Pp * 4                # x, y, bce, inv + slack for fusion temps
    budget = max(1 << 20, (24 << 20) - 2 * resident_bytes)
    cap = max(8, (budget // (io_per_row + tmp_per_row)) // 8 * 8)
    target = max(8, (Bp // 4) // 8 * 8)     # prefer >= 4 grid steps for big batches
    bt = int(min(cap, target, Bp))
    bt = max(8, (bt // 8) * 8)
    while Bp % bt:                          # Bp is a multiple of 8, so terminates
        bt -= 8
    return bt


# ----------------------------------------------------------------------------
# Wrapper
# ----------------------------------------------------------------------------
def mymodel_forward(image, mask, label, weight, bias):
    """image: (B,3,H,W) f32, mask: (B,1,H,W) f32, label: (B,) (unused),
    weight: (1,3,3,3) f32 (PyTorch OIHW), bias: (1,) f32."""
    del label  # unused by the forward pass (as in the PyTorch module)
    B, C, H, W = image.shape
    P = H * W
    assert weight.shape == (1, C, 3, 3)

    Pp = ((P + 127) // 128) * 128           # lane-dense spatial length / channel
    Bp = ((B + 7) // 8) * 8                 # sublane-aligned batch

    # --- lane-dense input layouts (free reshapes; pads are no-ops when aligned)
    img = image.astype(jnp.float32).reshape(B, C, P)
    msk = mask.astype(jnp.float32).reshape(B, P)
    if Pp != P:
        img = jnp.pad(img, ((0, 0), (0, 0), (0, Pp - P)))
        msk = jnp.pad(msk, ((0, 0), (0, Pp - P)))
    img2d = img.reshape(B, C * Pp)
    msk2d = msk
    if Bp != B:
        img2d = jnp.pad(img2d, ((0, Bp - B), (0, 0)))
        msk2d = jnp.pad(msk2d, ((0, Bp - B), (0, 0)))

    bias_s = bias.reshape(-1).astype(jnp.float32)          # (1,) SMEM scalar
    w3 = weight.reshape(C, 3, 3).astype(jnp.float32)

    # --- conv-as-matmul weights (MXU path) or per-tap masked rows (fallback)
    out_idx = jnp.arange(Pp, dtype=jnp.int32)
    r = out_idx // W
    cc = out_idx % W

    conv_bytes = C * Pp * Pp * 4
    use_mxu = conv_bytes <= (8 << 20)       # matrix is O(P^2): MXU path for small P

    if use_mxu:
        in_idx = jnp.arange(Pp, dtype=jnp.int32)
        blocks = []
        for ch in range(C):
            m = jnp.zeros((Pp, Pp), jnp.float32)
            for kh in range(3):
                for kw in range(3):
                    dh, dw = kh - 1, kw - 1
                    valid = ((out_idx < P) & (r + dh >= 0) & (r + dh < H) &
                             (cc + dw >= 0) & (cc + dw < W))
                    src = (r + dh) * W + (cc + dw)
                    tap = (in_idx[:, None] == src[None, :]) & valid[None, :]
                    m = m + w3[ch, kh, kw] * tap.astype(jnp.float32)
            blocks.append(m)
        w_in = jnp.concatenate(blocks, axis=0)             # (C*Pp, Pp)
        w_spec = pl.BlockSpec((C * Pp, Pp), lambda i: (0, 0))
        kernel = _mxu_kernel
        resident = conv_bytes
    else:
        valid_rows = []
        for kh in range(3):
            for kw in range(3):
                dh, dw = kh - 1, kw - 1
                valid_rows.append(((out_idx < P) & (r + dh >= 0) & (r + dh < H) &
                                   (cc + dw >= 0) & (cc + dw < W)
                                   ).astype(jnp.float32))
        valid9 = jnp.stack(valid_rows)                     # (9, Pp)
        w9 = weight.reshape(C, 9).astype(jnp.float32).T    # (9, C)
        w_in = (w9[:, :, None] * valid9[:, None, :]).reshape(9, C * Pp)
        w_spec = pl.BlockSpec((9, C * Pp), lambda i: (0, 0))
        kernel = functools.partial(_roll_kernel, W=W, C=C, Pp=Pp)
        resident = 9 * C * Pp * 4

    Bt = _pick_bt(Bp, Pp, C, resident)
    nb = Bp // Bt

    flops = 2 * Bp * (C * Pp) * Pp + 12 * Bp * Pp
    transcendentals = 2 * Bp * Pp
    bytes_accessed = 4 * (Bp * (C + 3) * Pp + int(w_in.size)) + nb * 512

    pred2d, inv2d, partials = pl.pallas_call(
        kernel,
        grid=(nb,),
        in_specs=[
            pl.BlockSpec((Bt, C * Pp), lambda i: (i, 0)),      # image rows
            pl.BlockSpec((Bt, Pp), lambda i: (i, 0)),          # mask rows
            w_spec,                                            # conv weights
            pl.BlockSpec(memory_space=pltpu.MemorySpace.SMEM), # bias (1,)
        ],
        out_specs=[
            pl.BlockSpec((Bt, Pp), lambda i: (i, 0)),          # pred rows
            pl.BlockSpec((Bt, Pp), lambda i: (i, 0)),          # inverse-mask rows
            pl.BlockSpec((1, 1, 128), lambda i: (i, 0, 0)),    # per-block sums
        ],
        out_shape=[
            jax.ShapeDtypeStruct((Bp, Pp), jnp.float32),
            jax.ShapeDtypeStruct((Bp, Pp), jnp.float32),
            jax.ShapeDtypeStruct((nb, 1, 128), jnp.float32),
        ],
        compiler_params=pltpu.CompilerParams(
            dimension_semantics=("parallel",),   # no cross-step carried state
            vmem_limit_bytes=48 * 1024 * 1024),  # safe on v5e/v6e/v7x
        cost_estimate=pl.CostEstimate(
            flops=int(flops), transcendentals=int(transcendentals),
            bytes_accessed=int(bytes_accessed)),
    )(img2d, msk2d, w_in, bias_s)

    # --- scalar glue (means / abs), with exact removal of padding contributions
    sums = jnp.sum(partials[:, 0, :3], axis=0)   # [sum(bce), sum(x-y), sum(x)]
    total_elems = Bp * Pp
    valid_elems = B * P
    if total_elems != valid_elems:
        # Every padded element has image=0, mask=0 -> pred = bias exactly.
        b0 = bias_s[0]
        n_pad = jnp.float32(total_elems - valid_elems)
        bce_pad = jnp.maximum(b0, 0.0) + jnp.log1p(jnp.exp(-jnp.abs(b0)))
        s_bce = sums[0] - n_pad * bce_pad
        s_xy = sums[1] - n_pad * b0
        s_x = sums[2] - n_pad * b0
    else:
        s_bce, s_xy, s_x = sums[0], sums[1], sums[2]

    n = jnp.float32(valid_elems)
    loss_a = s_bce / n                      # BCEWithLogitsLoss (mean)
    loss_b = jnp.abs(s_xy / n)              # |mean(pred - mask)|
    combined_loss = loss_a + loss_b
    pred_label = s_x / n                    # mean(pred_mask)

    pred_mask = pred2d[:B, :P].reshape(B, 1, H, W)
    inverse_mask = inv2d[:B, :P].reshape(B, 1, H, W)

    return {
        'backward_loss': combined_loss,
        'pred_mask': pred_mask,
        'pred_label': pred_label,
        'visual_loss': {
            'predict_loss': combined_loss,
            'loss_a': loss_a,
            'I am loss_b :)': loss_b,
        },
        'visual_image': {
            'pred_mask': pred_mask,
            'reverse_mask': inverse_mask,
        },
    }


# ----------------------------------------------------------------------------
# Reference + self-test
# ----------------------------------------------------------------------------
def _reference_forward(image, mask, weight, bias):
    pred = jax.lax.conv_general_dilated(
        image, weight, window_strides=(1, 1), padding='SAME',
        dimension_numbers=('NCHW', 'OIHW', 'NCHW'),
        precision=jax.lax.Precision.HIGHEST) + bias.reshape(1, 1, 1, 1)
    x, y = pred, mask
    bce = jnp.maximum(x, 0.0) - x * y + jnp.log1p(jnp.exp(-jnp.abs(x)))
    loss_a = jnp.mean(bce)
    loss_b = jnp.abs(jnp.mean(x - y))
    return pred, loss_a + loss_b, jnp.mean(pred), 1.0 - mask


if __name__ == "__main__":
    key = jax.random.PRNGKey(0)
    k_img, k_msk, k_lbl, k_w, k_b = jax.random.split(key, 5)

    B, C, H, W = 2, 3, 16, 16
    image = jax.random.normal(k_img, (B, C, H, W), dtype=jnp.float32)
    mask = jax.random.bernoulli(k_msk, 0.5, (B, 1, H, W)).astype(jnp.float32)
    label = jax.random.bernoulli(k_lbl, 0.5, (B,)).astype(jnp.float32)

    # Deterministic Conv2d(3, 1, kernel_size=3) parameters.
    fan_in = C * 3 * 3
    bound = 1.0 / (fan_in ** 0.5)
    weight = jax.random.uniform(k_w, (1, C, 3, 3), jnp.float32, -bound, bound)
    bias = jax.random.uniform(k_b, (1,), jnp.float32, -bound, bound)

    out = mymodel_forward(image, mask, label, weight, bias)
    jax.block_until_ready(out)

    # Cross-check against a plain-JAX reference.
    ref_pred, ref_loss, ref_label, ref_inv = _reference_forward(
        image, mask, weight, bias)
    assert jnp.allclose(out['pred_mask'], ref_pred, atol=1e-4, rtol=1e-4)
    assert jnp.allclose(out['backward_loss'], ref_loss, atol=1e-4, rtol=1e-4)
    assert jnp.allclose(out['pred_label'], ref_label, atol=1e-4, rtol=1e-4)
    assert jnp.allclose(out['visual_image']['reverse_mask'], ref_inv,
                        atol=1e-6, rtol=1e-6)

    print("KERNEL_OK")
</pallas_src>

<mosaic_0001>
module attributes {stable_mosaic.version = 11 : i64} {
  func.func @_mxu_kernel(%arg0: i32, %arg1: memref<8x768xf32, #tpu.memory_space<vmem>>, %arg2: memref<8x256xf32, #tpu.memory_space<vmem>>, %arg3: memref<768x256xf32, #tpu.memory_space<vmem>>, %arg4: memref<1xf32, #tpu.memory_space<smem>>, %arg5: memref<8x256xf32, #tpu.memory_space<vmem>>, %arg6: memref<8x256xf32, #tpu.memory_space<vmem>>, %arg7: memref<1x1x128xf32, #tpu.memory_space<vmem>>) attributes {dimension_semantics = [#tpu.dimension_semantics<parallel>], iteration_bounds = array<i64: 1>, scalar_prefetch = 0 : i64, scratch_operands = 0 : i64, tpu.core_type = #tpu.core_type<tc>, window_params = [{transform_indices = @transform_0, window_bounds = array<i64: 8, 768>}, {transform_indices = @transform_1, window_bounds = array<i64: 8, 256>}, {pipeline_mode = #tpu.pipeline_mode<synchronous>, transform_indices = @transform_2, window_bounds = array<i64: 768, 256>}, {transform_indices = @transform_3, window_bounds = array<i64: 1>}, {transform_indices = @transform_4, window_bounds = array<i64: 8, 256>}, {transform_indices = @transform_5, window_bounds = array<i64: 8, 256>}, {transform_indices = @transform_6, window_bounds = array<i64: 1, 1, 128>}]} {
    %c0 = arith.constant 0 : index
    %c0_0 = arith.constant 0 : index
    %0 = vector.load %arg1[%c0, %c0_0] : memref<8x768xf32, #tpu.memory_space<vmem>>, vector<8x768xf32>
    %c0_1 = arith.constant 0 : index
    %c0_2 = arith.constant 0 : index
    %1 = vector.load %arg3[%c0_1, %c0_2] : memref<768x256xf32, #tpu.memory_space<vmem>>, vector<768x256xf32>
    %cst = arith.constant dense<0.000000e+00> : vector<8x256xf32>
    %2 = tpu.matmul %0, %1, %cst {dimension_numbers = #tpu.dot_dimension_numbers<[1], [0], [0], [1], [0, 0, 1, 1], [], []>, precision = #tpu.contract_precision<fp32>} : vector<8x768xf32>, vector<768x256xf32>, vector<8x256xf32> -> vector<8x256xf32>
    %c0_3 = arith.constant 0 : index
    %3 = memref.load %arg4[%c0_3] : memref<1xf32, #tpu.memory_space<smem>>
    %4 = vector.broadcast %3 : f32 to vector<8x256xf32>
    %5 = arith.addf %2, %4 : vector<8x256xf32>
    %c0_4 = arith.constant 0 : index
    %c0_5 = arith.constant 0 : index
    %6 = vector.load %arg5[%c0_4, %c0_5] : memref<8x256xf32, #tpu.memory_space<vmem>>, vector<8x256xf32>
    tpu.vector_store %arg5[%c0_4, %c0_5], %5 {strides = array<i32>} : memref<8x256xf32, #tpu.memory_space<vmem>>, vector<8x256xf32>,
    %c0_6 = arith.constant 0 : index
    %c0_7 = arith.constant 0 : index
    %7 = vector.load %arg2[%c0_6, %c0_7] : memref<8x256xf32, #tpu.memory_space<vmem>>, vector<8x256xf32>
    %cst_8 = arith.constant 1.000000e+00 : f32
    %8 = vector.broadcast %cst_8 : f32 to vector<8x256xf32>
    %9 = arith.subf %8, %7 : vector<8x256xf32>
    %c0_9 = arith.constant 0 : index
    %c0_10 = arith.constant 0 : index
    %10 = vector.load %arg6[%c0_9, %c0_10] : memref<8x256xf32, #tpu.memory_space<vmem>>, vector<8x256xf32>
    tpu.vector_store %arg6[%c0_9, %c0_10], %9 {strides = array<i32>} : memref<8x256xf32, #tpu.memory_space<vmem>>, vector<8x256xf32>,
    %cst_11 = arith.constant 0.000000e+00 : f32
    %11 = vector.broadcast %cst_11 : f32 to vector<8x256xf32>
    %12 = arith.maximumf %5, %11 : vector<8x256xf32>
    %13 = arith.mulf %5, %7 : vector<8x256xf32>
    %14 = arith.subf %12, %13 : vector<8x256xf32>
    %15 = math.absf %5 : vector<8x256xf32>
    %cst_12 = arith.constant 0.000000e+00 : f32
    %16 = vector.broadcast %cst_12 : f32 to vector<8x256xf32>
    %17 = arith.subf %16, %15 : vector<8x256xf32>
    %18 = math.exp %17 : vector<8x256xf32>
    %19 = math.log1p %18 : vector<8x256xf32>
    %20 = arith.addf %14, %19 : vector<8x256xf32>
    %21 = vector.shape_cast %20 : vector<8x256xf32> to vector<1x8x256xf32>
    %cst_13 = arith.constant dense<0.000000e+00> : vector<1xf32>
    %22 = vector.multi_reduction <add>, %21, %cst_13 [1, 2] : vector<1x8x256xf32> to vector<1xf32>
    %23 = vector.shape_cast %22 : vector<1xf32> to vector<1x1x1xf32>
    %24 = vector.extract %23[0, 0, 0] : f32 from vector<1x1x1xf32>
    %25 = vector.shape_cast %5 : vector<8x256xf32> to vector<1x8x256xf32>
    %cst_14 = arith.constant dense<0.000000e+00> : vector<1xf32>
    %26 = vector.multi_reduction <add>, %25, %cst_14 [1, 2] : vector<1x8x256xf32> to vector<1xf32>
    %27 = vector.shape_cast %26 : vector<1xf32> to vector<1x1x1xf32>
    %28 = vector.extract %27[0, 0, 0] : f32 from vector<1x1x1xf32>
    %29 = vector.shape_cast %7 : vector<8x256xf32> to vector<1x8x256xf32>
    %cst_15 = arith.constant dense<0.000000e+00> : vector<1xf32>
    %30 = vector.multi_reduction <add>, %29, %cst_15 [1, 2] : vector<1x8x256xf32> to vector<1xf32>
    %31 = vector.shape_cast %30 : vector<1xf32> to vector<1x1x1xf32>
    %32 = vector.extract %31[0, 0, 0] : f32 from vector<1x1x1xf32>
    %33 = tpu.iota {dimensions = array<i32: 2>} : vector<1x1x128xi32>
    %c0_i32 = arith.constant 0 : i32
    %34 = vector.broadcast %c0_i32 : i32 to vector<1x1x128xi32>
    %35 = arith.cmpi eq, %33, %34 : vector<1x1x128xi32>
    %cst_16 = arith.constant 0.000000e+00 : f32
    %36 = vector.broadcast %24 : f32 to vector<1x1x128xf32>
    %37 = vector.broadcast %cst_16 : f32 to vector<1x1x128xf32>
    %38 = arith.select %35, %36, %37 : vector<1x1x128xi1>, vector<1x1x128xf32>
    %c1_i32 = arith.constant 1 : i32
    %39 = vector.broadcast %c1_i32 : i32 to vector<1x1x128xi32>
    %40 = arith.cmpi eq, %33, %39 : vector<1x1x128xi32>
    %41 = arith.subf %28, %32 : f32
    %cst_17 = arith.constant 0.000000e+00 : f32
    %42 = vector.broadcast %41 : f32 to vector<1x1x128xf32>
    %43 = vector.broadcast %cst_17 : f32 to vector<1x1x128xf32>
    %44 = arith.select %40, %42, %43 : vector<1x1x128xi1>, vector<1x1x128xf32>
    %45 = arith.addf %38, %44 : vector<1x1x128xf32>
    %c2_i32 = arith.constant 2 : i32
    %46 = vector.broadcast %c2_i32 : i32 to vector<1x1x128xi32>
    %47 = arith.cmpi eq, %33, %46 : vector<1x1x128xi32>
    %cst_18 = arith.constant 0.000000e+00 : f32
    %48 = vector.broadcast %28 : f32 to vector<1x1x128xf32>
    %49 = vector.broadcast %cst_18 : f32 to vector<1x1x128xf32>
    %50 = arith.select %47, %48, %49 : vector<1x1x128xi1>, vector<1x1x128xf32>
    %51 = arith.addf %45, %50 : vector<1x1x128xf32>
    %c0_19 = arith.constant 0 : index
    %c0_20 = arith.constant 0 : index
    %c0_21 = arith.constant 0 : index
    %52 = vector.load %arg7[%c0_19, %c0_20, %c0_21] : memref<1x1x128xf32, #tpu.memory_space<vmem>>, vector<1x1x128xf32>
    tpu.vector_store %arg7[%c0_19, %c0_20, %c0_21], %51 {strides = array<i32>} : memref<1x1x128xf32, #tpu.memory_space<vmem>>, vector<1x1x128xf32>,
    return
  }
  func.func @transform_0(%arg0: i32) -> (i32, i32) {
    %c0_i32 = arith.constant 0 : i32
    %c0_i32_0 = arith.constant 0 : i32
    return %arg0, %c0_i32 : i32, i32
  }
  func.func @transform_1(%arg0: i32) -> (i32, i32) {
    %c0_i32 = arith.constant 0 : i32
    %c0_i32_0 = arith.constant 0 : i32
    return %arg0, %c0_i32 : i32, i32
  }
  func.func @transform_2(%arg0: i32) -> (i32, i32) {
    %c0_i32 = arith.constant 0 : i32
    %c0_i32_0 = arith.constant 0 : i32
    %c0_i32_1 = arith.constant 0 : i32
    return %c0_i32, %c0_i32_0 : i32, i32
  }
  func.func @transform_3(%arg0: i32) -> i32 {
    %c0_i32 = arith.constant 0 : i32
    %c0_i32_0 = arith.constant 0 : i32
    return %c0_i32 : i32
  }
  func.func @transform_4(%arg0: i32) -> (i32, i32) {
    %c0_i32 = arith.constant 0 : i32
    %c0_i32_0 = arith.constant 0 : i32
    return %arg0, %c0_i32 : i32, i32
  }
  func.func @transform_5(%arg0: i32) -> (i32, i32) {
    %c0_i32 = arith.constant 0 : i32
    %c0_i32_0 = arith.constant 0 : i32
    return %arg0, %c0_i32 : i32, i32
  }
  func.func @transform_6(%arg0: i32) -> (i32, i32, i32) {
    %c0_i32 = arith.constant 0 : i32
    %c0_i32_0 = arith.constant 0 : i32
    %c0_i32_1 = arith.constant 0 : i32
    return %arg0, %c0_i32, %c0_i32_0 : i32, i32, i32
  }
}

</mosaic_0001>

<bundles_post_ra>
// kernel: tpu_custom_call.1
= control target key start
LH: loop header
LB: loop body
LE: loop exit
PB: predicated region body
PF: predicated region fallthrough
CT: control target
= control target key end

     0   :  { %13 = vsyncpa [#allocation4], 0  ;;  %s8204_s0 = inlined_call_operand.hbm [shape: f32[8,768], index: 0, kind: input, shape index: {}]   ;;  %s8205_s1 = inlined_call_operand.hbm [shape: f32[8,256], index: 1, kind: input, shape index: {}]   ;;  %s8206_s2 = inlined_call_operand.hbm [shape: f32[768,256], index: 2, kind: input, shape index: {}]   ;;  %s8207_s3 = inlined_call_operand.<no memory space> [shape: f32[1], index: 3, kind: input, shape index: {}]   ;;  %s8208_s4 = inlined_call_operand.hbm [shape: f32[8,256], index: 4, kind: output, shape index: {0}]   ;;  %s8209_s5 = inlined_call_operand.hbm [shape: f32[8,256], index: 5, kind: output, shape index: {1}]   ;;  %s8210_s6 = inlined_call_operand.hbm [shape: f32[1,1,128], index: 6, kind: output, shape index: {2}]  }
   0x1   :  { %14 = vsyncpa [#allocation7], 0 }
   0x2   :  { %15 = vsyncpa [#allocation5], 0 }
   0x3   :  { %16 = vsyncpa [#allocation11], 0  ;;  %s5592_s21 = smov [#allocation6]   ;;  %s5593_s23 = smov [#allocation3]  }
   0x4   :  { %s33_s22 = sshll.u32 %s5592_s21, 4  ;;  %s23_s24 = sshll.u32 %s5593_s23, 4  ;;  %s34_s22 = int_to_ptr.vmem [resolvable:$true] %s33_s22  ;;  %s24_s24 = int_to_ptr.vmem [resolvable:$true] %s23_s24 }
   0x5   :  { %s5452_s27 = scalar_lea.hbm %s8205_s1, 256 }
   0x6   :  { %p5453_p0 = scmp.ne.s32.totalorder %s8205_s1, %s5452_s27  ;;  %p5456_p1 = scmp.lt.u32.totalorder %s5452_s27, %s8205_s1 }
   0x8   :  { %p5458_p2 = pnand %p5456_p1, %p5453_p0 }
   0xa   :  { %5461 = shalt.err (!%p5458_p2)
}
   0xb   :  { %s5462_s8 = scalar_lea.vmem %s34_s22, 256  ;;  %p5467_p4 = scmp.lt.s32.totalorder %s34_s22, %s34_s22 }
   0xc   :  { %p5463_p3 = scmp.ne.s32.totalorder %s34_s22, %s5462_s8  ;;  %p5468_p5 = scmp.lt.s32.totalorder %s5462_s8, %s5462_s8 }
   0xe   :  { %p5469_p6 = por %p5468_p5, %p5467_p4 }
  0x10   :  { %p5470_p7 = pnand %p5469_p6, %p5463_p3 }
  0x12   :  { %5473 = shalt.err (!%p5470_p7)
}
  0x13   :  { %36 = dma.hbm_to_vmem [thread:$0]  %s8205_s1, 256, %s34_s22, [#allocation7]  }
  0x14   :  { %s5474_s13 = scalar_lea.hbm %s8204_s0, 768 }
  0x15   :  { %p5475_p8 = scmp.ne.s32.totalorder %s8204_s0, %s5474_s13  ;;  %p5478_p9 = scmp.lt.u32.totalorder %s5474_s13, %s8204_s0 }
  0x17   :  { %p5480_p10 = pnand %p5478_p9, %p5475_p8 }
  0x19   :  { %5483 = shalt.err (!%p5480_p10)
}
  0x1a   :  { %s5484_s18 = scalar_lea.vmem %s24_s24, 768  ;;  %p5489_p12 = scmp.lt.s32.totalorder %s24_s24, %s24_s24 }
  0x1b   :  { %p5485_p11 = scmp.ne.s32.totalorder %s24_s24, %s5484_s18  ;;  %p5490_p13 = scmp.lt.s32.totalorder %s5484_s18, %s5484_s18 }
  0x1d   :  { %p5491_p0 = por %p5490_p13, %p5489_p12 }
  0x1f   :  { %p5492_p1 = pnand %p5491_p0, %p5485_p11 }
  0x21   :  { %5495 = shalt.err (!%p5492_p1)
}
  0x22   :  { %26 = dma.hbm_to_vmem [thread:$0]  %s8204_s0, 768, %s24_s24, [#allocation4]  }
  0x23   :  { %s5594_s20 = smov [#allocation8]   ;;  %s5496_s25 = scalar_lea.hbm %s8206_s2, 24576 }
  0x24   :  { %s42_s21 = sshll.u32 %s5594_s20, 4  ;;  %p5497_p2 = scmp.ne.s32.totalorder %s8206_s2, %s5496_s25  ;;  %s43_s21 = int_to_ptr.vmem [resolvable:$true] %s42_s21 }
  0x25   :  { %p5500_p3 = scmp.lt.u32.totalorder %s5496_s25, %s8206_s2 }
  0x27   :  { %p5502_p4 = pnand %p5500_p3, %p5497_p2 }
  0x29   :  { %5505 = shalt.err (!%p5502_p4)
}
  0x2a   :  { %s5506_s30 = scalar_lea.vmem %s43_s21, 24576  ;;  %p5511_p6 = scmp.lt.s32.totalorder %s43_s21, %s43_s21 }
  0x2b   :  { %p5507_p5 = scmp.ne.s32.totalorder %s43_s21, %s5506_s30  ;;  %p5512_p7 = scmp.lt.s32.totalorder %s5506_s30, %s5506_s30 }
  0x2d   :  { %p5513_p8 = por %p5512_p7, %p5511_p6 }
  0x2f   :  { %p5514_p9 = pnand %p5513_p8, %p5507_p5 }
  0x31   :  { %5517 = shalt.err (!%p5514_p9)
}
  0x32   :  { %s5595_s0 = smov 256   ;;  %s5596_s24 = smov 16  }
  0x33   :  { %48 = dma.hbm_to_vmem [thread:$0]  %s8206_s2, 24576, %s43_s21, [#allocation7], %s5595_s0, %s5595_s0, %s5596_s24  }
  0x34   :  { %5584 = dma.done.wait [#allocation4], 768  }
  0x35   :  { %5585 = vsyncadd [#allocation4], 4294966528 }
  0x36   :  { %5586 = dma.done.wait [#allocation7], 24832  }
  0x37   :  { %5587 = vsyncadd [#allocation7], 4294942464  ;;  %v67_v0 = vld [vmem:[#allocation8 + $0x8] sm:$0xff]  ;;  %v69_v1 = vld [vmem:[#allocation8 + $0x18] sm:$0xff]  ;;  %s5598_s11 = smov [#allocation9]  }
  0x38   :  { %v131_v2 = vld [vmem:[#allocation8 + $0x208] sm:$0xff]  ;;  %v260_v3 = vand.u32 4294901760, %v67_v0  ;;  %v264_v4 = vand.u32 4294901760, %v69_v1  ;;  %v133_v5 = vld [vmem:[#allocation8 + $0x218] sm:$0xff]  ;;  %v66_v7 = vld [vmem:[#allocation8] sm:$0xff]  ;;  %s4205_s12 = sshll.u32 %s5598_s11, 4  ;;  %s4206_s12 = int_to_ptr.vmem [resolvable:$true] %s4205_s12 }
  0x39   :  { %v1544_v6 = vand.u32 4294901760, %v131_v2  ;;  %v68_v8 = vld [vmem:[#allocation8 + $0x10] sm:$0xff]  ;;  %v1548_v9 = vand.u32 4294901760, %v133_v5  ;;  %v262_v10 = vand.u32 4294901760, %v66_v7  ;;  %v130_v12 = vld [vmem:[#allocation8 + $0x200] sm:$0xff]  ;;  %v71_v14 = vld [vmem:[#allocation8 + $0x28] sm:$0xff] }
  0x3a   :  { %v266_v11 = vand.u32 4294901760, %v68_v8  ;;  %v132_v13 = vld [vmem:[#allocation8 + $0x210] sm:$0xff]  ;;  %v5671_v15 = vpack.c.bf16 %v264_v4, %v260_v3  ;;  %v5673_v16 = vsub.f32 %v67_v0, %v260_v3  ;;  %v5675_v17 = vsub.f32 %v69_v1, %v264_v4  ;;  %v73_v19 = vld [vmem:[#allocation8 + $0x38] sm:$0xff]  ;;  %v135_v20 = vld [vmem:[#allocation8 + $0x228] sm:$0xff] }
  0x3b   :  { %v5677_v18 = vsub.f32 %v131_v2, %v1544_v6  ;;  %v137_v21 = vld [vmem:[#allocation8 + $0x238] sm:$0xff]  ;;  %v5679_v22 = vpack.c.bf16 %v1548_v9, %v1544_v6  ;;  %v5681_v23 = vsub.f32 %v133_v5, %v1548_v9  ;;  %v5685_v25 = vsub.f32 %v66_v7, %v262_v10  ;;  %v70_v26 = vld [vmem:[#allocation8 + $0x20] sm:$0xff]  ;;  %v72_v31 = vld [vmem:[#allocation8 + $0x30] sm:$0xff] }
  0x3c   :  { %8949 = vst [vmem:[#allocation17_spill] sm:$0xff] %v5671_v15  ;;  %8950 = vst [vmem:[#allocation18_spill] sm:$0xff] %v5675_v17  ;;  %v5683_v24 = vpack.c.bf16 %v266_v11, %v262_v10  ;;  %4243 = vmatprep.subr.bf16.mxu1 %v5671_v15  ;;  %v5688_v27 = vsub.f32 %v68_v8, %v266_v11  ;;  %v1546_v28 = vand.u32 4294901760, %v130_v12  ;;  %v1550_v29 = vand.u32 4294901760, %v132_v13  ;;  %v134_v36 = vld [vmem:[#allocation8 + $0x220] sm:$0xff]  ;;  %v136_v37 = vld [vmem:[#allocation8 + $0x230] sm:$0xff] }
  0x3d   :  { %8951 = vst [vmem:[#allocation19_spill] sm:$0xff] %v5677_v18  ;;  %8952 = vst [vmem:[#allocation20_spill] sm:$0xff] %v5679_v22  ;;  %v268_v30 = vand.u32 4294901760, %v71_v14  ;;  %4819 = vmatprep.subr.bf16.mxu0 %v5679_v22  ;;  %v272_v32 = vand.u32 4294901760, %v73_v19  ;;  %v1552_v33 = vand.u32 4294901760, %v135_v20  ;;  %v1556_v34 = vand.u32 4294901760, %v137_v21 }
  0x3e   :  { %8953 = vst [vmem:[#allocation21_spill] sm:$0xff] %v5681_v23  ;;  %8954 = vst [vmem:[#allocation22_spill] sm:$0xff] %v5683_v24  ;;  %4245 = vmatpush1.bf16.msra.mxu1 %v5683_v24  ;;  %v270_v35 = vand.u32 4294901760, %v70_v26  ;;  %v5692_v38 = vpack.c.bf16 %v1550_v29, %v1546_v28  ;;  %v5694_v39 = vsub.f32 %v130_v12, %v1546_v28  ;;  %v75_v42 = vld [vmem:[#allocation8 + $0x48] sm:$0xff]  ;;  %v77_v43 = vld [vmem:[#allocation8 + $0x58] sm:$0xff]  ;;  %v274_v51 = vand.u32 4294901760, %v72_v31 }
  0x3f   :  { %8955 = vst [vmem:[#allocation23_spill] sm:$0xff] %v5685_v25  ;;  %8956 = vst [vmem:[#allocation24_spill] sm:$0xff] %v5688_v27  ;;  %v5696_v40 = vsub.f32 %v132_v13, %v1550_v29  ;;  %v5698_v41 = vsub.f32 %v71_v14, %v268_v30  ;;  %v139_v44 = vld [vmem:[#allocation8 + $0x248] sm:$0xff]  ;;  %v5700_v45 = vpack.c.bf16 %v272_v32, %v268_v30  ;;  %v141_v49 = vld [vmem:[#allocation8 + $0x258] sm:$0xff]  ;;  %v1554_v53 = vand.u32 4294901760, %v134_v36 }
  0x40   :  { %8957 = vst [vmem:[#allocation25_spill] sm:$0xff] %v5692_v38  ;;  %8958 = vst [vmem:[#allocation26_spill] sm:$0xff] %v5694_v39  ;;  %v5702_v46 = vsub.f32 %v73_v19, %v272_v32  ;;  %v5704_v47 = vpack.c.bf16 %v1556_v34, %v1552_v33  ;;  %v5706_v48 = vsub.f32 %v135_v20, %v1552_v33  ;;  %4821 = vmatpush1.bf16.msra.mxu0 %v5692_v38  ;;  %v74_v58 = vld [vmem:[#allocation8 + $0x40] sm:$0xff]  ;;  %v76_v59 = vld [vmem:[#allocation8 + $0x50] sm:$0xff] }
  0x41   :  { %8959 = vst [vmem:[#allocation27_spill] sm:$0xff] %v5696_v40  ;;  %8960 = vst [vmem:[#allocation28_spill] sm:$0xff] %v5698_v41  ;;  %v5709_v50 = vsub.f32 %v137_v21, %v1556_v34  ;;  %v5711_v52 = vsub.f32 %v70_v26, %v270_v35  ;;  %4247 = vmatprep.subr.bf16.mxu1 %v5700_v45  ;;  %v1558_v54 = vand.u32 4294901760, %v136_v37  ;;  %v276_v55 = vand.u32 4294901760, %v75_v42  ;;  %v138_v0 = vld [vmem:[#allocation8 + $0x240] sm:$0xff]  ;;  %v140_v1 = vld [vmem:[#allocation8 + $0x250] sm:$0xff] }
  0x42   :  { %8961 = vst [vmem:[#allocation29_spill] sm:$0xff] %v5700_v45  ;;  %8962 = vst [vmem:[#allocation30_spill] sm:$0xff] %v5702_v46  ;;  %4823 = vmatprep.subr.bf16.mxu0 %v5704_v47  ;;  %v280_v56 = vand.u32 4294901760, %v77_v43  ;;  %v1560_v57 = vand.u32 4294901760, %v139_v44  ;;  %v5715_v60 = vpack.c.bf16 %v274_v51, %v270_v35  ;;  %v5717_v61 = vsub.f32 %v72_v31, %v274_v51  ;;  %v79_v2 = vld [vmem:[#allocation8 + $0x68] sm:$0xff]  ;;  %v81_v7 = vld [vmem:[#allocation8 + $0x78] sm:$0xff] }
  0x43   :  { %8963 = vst [vmem:[#allocation31_spill] sm:$0xff] %v5704_v47  ;;  %8964 = vst [vmem:[#allocation32_spill] sm:$0xff] %v5706_v48  ;;  %v5719_v62 = vsub.f32 %v134_v36, %v1554_v53  ;;  %v1564_v63 = vand.u32 4294901760, %v141_v49  ;;  %v5721_v3 = vpack.c.bf16 %v1558_v54, %v1554_v53  ;;  %v5723_v4 = vsub.f32 %v136_v37, %v1558_v54  ;;  %v143_v8 = vld [vmem:[#allocation8 + $0x268] sm:$0xff]  ;;  %v145_v9 = vld [vmem:[#allocation8 + $0x278] sm:$0xff] }
  0x44   :  { %8965 = vst [vmem:[#allocation33_spill] sm:$0xff] %v5709_v50  ;;  %8966 = vst [vmem:[#allocation34_spill] sm:$0xff] %v5711_v52  ;;  %v5725_v5 = vpack.c.bf16 %v280_v56, %v276_v55  ;;  %v5727_v6 = vsub.f32 %v75_v42, %v276_v55  ;;  %4249 = vmatpush1.bf16.msra.mxu1 %v5715_v60  ;;  %v5730_v10 = vsub.f32 %v77_v43, %v280_v56  ;;  %v78_v31 = vld [vmem:[#allocation8 + $0x60] sm:$0xff]  ;;  %v80_v36 = vld [vmem:[#allocation8 + $0x70] sm:$0xff] }
  0x45   :  { %8967 = vst [vmem:[#allocation35_spill] sm:$0xff] %v5715_v60  ;;  %8968 = vst [vmem:[#allocation36_spill] sm:$0xff] %v5717_v61  ;;  %v5732_v11 = vpack.c.bf16 %v1564_v63, %v1560_v57  ;;  %v5734_v12 = vsub.f32 %v139_v44, %v1560_v57  ;;  %v5736_v13 = vsub.f32 %v141_v49, %v1564_v63  ;;  %4825 = vmatpush1.bf16.msra.mxu0 %v5721_v3  ;;  %v142_v37 = vld [vmem:[#allocation8 + $0x260] sm:$0xff]  ;;  %v144_v42 = vld [vmem:[#allocation8 + $0x270] sm:$0xff] }
  0x46   :  { %8969 = vst [vmem:[#allocation37_spill] sm:$0xff] %v5719_v62  ;;  %8970 = vst [vmem:[#allocation38_spill] sm:$0xff] %v5721_v3  ;;  %4251 = vmatprep.subr.bf16.mxu1 %v5725_v5  ;;  %v278_v14 = vand.u32 4294901760, %v74_v58  ;;  %v282_v19 = vand.u32 4294901760, %v76_v59  ;;  %v1562_v20 = vand.u32 4294901760, %v138_v0  ;;  %v1566_v21 = vand.u32 4294901760, %v140_v1 }
  0x47   :  { %8971 = vst [vmem:[#allocation39_spill] sm:$0xff] %v5723_v4  ;;  %8972 = vst [vmem:[#allocation40_spill] sm:$0xff] %v5725_v5  ;;  %4827 = vmatprep.subr.bf16.mxu0 %v5732_v11  ;;  %v284_v26 = vand.u32 4294901760, %v79_v2  ;;  %v288_v28 = vand.u32 4294901760, %v81_v7  ;;  %v1568_v29 = vand.u32 4294901760, %v143_v8  ;;  %v1572_v30 = vand.u32 4294901760, %v145_v9 }
  0x48   :  { %8973 = vst [vmem:[#allocation41_spill] sm:$0xff] %v5727_v6  ;;  %8974 = vst [vmem:[#allocation42_spill] sm:$0xff] %v5730_v10  ;;  %v5741_v32 = vpack.c.bf16 %v282_v19, %v278_v14  ;;  %v5743_v33 = vsub.f32 %v74_v58, %v278_v14  ;;  %v5745_v34 = vsub.f32 %v76_v59, %v282_v19  ;;  %v83_v53 = vld [vmem:[#allocation8 + $0x88] sm:$0xff]  ;;  %v85_v54 = vld [vmem:[#allocation8 + $0x98] sm:$0xff]  ;;  %v286_v59 = vand.u32 4294901760, %v78_v31 }
  0x49   :  { %8975 = vst [vmem:[#allocation43_spill] sm:$0xff] %v5732_v11  ;;  %8976 = vst [vmem:[#allocation44_spill] sm:$0xff] %v5734_v12  ;;  %v5747_v35 = vpack.c.bf16 %v1566_v21, %v1562_v20  ;;  %v5749_v43 = vsub.f32 %v138_v0, %v1562_v20  ;;  %v5751_v44 = vsub.f32 %v140_v1, %v1566_v21  ;;  %v147_v55 = vld [vmem:[#allocation8 + $0x288] sm:$0xff]  ;;  %v290_v0 = vand.u32 4294901760, %v80_v36  ;;  %v149_v14 = vld [vmem:[#allocation8 + $0x298] sm:$0xff] }
  0x4a   :  { %8977 = vst [vmem:[#allocation45_spill] sm:$0xff] %v5736_v13  ;;  %8978 = vst [vmem:[#allocation46_spill] sm:$0xff] %v5741_v32  ;;  %v5753_v49 = vpack.c.bf16 %v288_v28, %v284_v26  ;;  %v5755_v51 = vsub.f32 %v79_v2, %v284_v26  ;;  %4253 = vmatpush1.bf16.msra.mxu1 %v5741_v32  ;;  %v5759_v56 = vsub.f32 %v81_v7, %v288_v28  ;;  %v82_v26 = vld [vmem:[#allocation8 + $0x80] sm:$0xff]  ;;  %v84_v28 = vld [vmem:[#allocation8 + $0x90] sm:$0xff] }
  0x4b   :  { %8979 = vst [vmem:[#allocation47_spill] sm:$0xff] %v5743_v33  ;;  %8980 = vst [vmem:[#allocation48_spill] sm:$0xff] %v5745_v34  ;;  %4829 = vmatpush1.bf16.msra.mxu0 %v5747_v35  ;;  %v5761_v57 = vpack.c.bf16 %v1572_v30, %v1568_v29  ;;  %v5763_v58 = vsub.f32 %v143_v8, %v1568_v29  ;;  %v5766_v63 = vsub.f32 %v145_v9, %v1572_v30  ;;  %v146_v8 = vld [vmem:[#allocation8 + $0x280] sm:$0xff]  ;;  %v87_v5 = vld [vmem:[#allocation8 + $0xa8] sm:$0xff] }
  0x4c   :  { %8981 = vst [vmem:[#allocation49_spill] sm:$0xff] %v5747_v35  ;;  %8982 = vst [vmem:[#allocation50_spill] sm:$0xff] %v5749_v43  ;;  %4255 = vmatprep.subr.bf16.mxu1 %v5753_v49  ;;  %v1570_v1 = vand.u32 4294901760, %v142_v37  ;;  %v1574_v2 = vand.u32 4294901760, %v144_v42  ;;  %v5769_v19 = vsub.f32 %v78_v31, %v286_v59  ;;  %v292_v20 = vand.u32 4294901760, %v83_v53  ;;  %v89_v60 = vld [vmem:[#allocation8 + $0xb8] sm:$0xff] }
  0x4d   :  { %8983 = vst [vmem:[#allocation51_spill] sm:$0xff] %v5751_v44  ;;  %8984 = vst [vmem:[#allocation52_spill] sm:$0xff] %v5753_v49  ;;  %4831 = vmatprep.subr.bf16.mxu0 %v5761_v57  ;;  %v296_v7 = vand.u32 4294901760, %v85_v54  ;;  %v1576_v21 = vand.u32 4294901760, %v147_v55  ;;  %v5771_v29 = vpack.c.bf16 %v290_v0, %v286_v59  ;;  %v5773_v32 = vsub.f32 %v80_v36, %v290_v0  ;;  %v148_v49 = vld [vmem:[#allocation8 + $0x290] sm:$0xff]  ;;  %v151_v35 = vld [vmem:[#allocation8 + $0x2a8] sm:$0xff] }
  0x4e   :  { %8985 = vst [vmem:[#allocation53_spill] sm:$0xff] %v5755_v51  ;;  %8986 = vst [vmem:[#allocation54_spill] sm:$0xff] %v5759_v56  ;;  %v5775_v9 = vpack.c.bf16 %v1574_v2, %v1570_v1  ;;  %v5777_v30 = vsub.f32 %v142_v37, %v1570_v1  ;;  %v5779_v45 = vsub.f32 %v144_v42, %v1574_v2  ;;  %v1580_v36 = vand.u32 4294901760, %v149_v14  ;;  %v150_v11 = vld [vmem:[#allocation8 + $0x2a0] sm:$0xff]  ;;  %v152_v22 = vld [vmem:[#allocation8 + $0x2b0] sm:$0xff] }
  0x4f   :  { %8987 = vst [vmem:[#allocation55_spill] sm:$0xff] %v5761_v57  ;;  %8988 = vst [vmem:[#allocation56_spill] sm:$0xff] %v5763_v58  ;;  %v5781_v31 = vpack.c.bf16 %v296_v7, %v292_v20  ;;  %v5783_v24 = vsub.f32 %v83_v53, %v292_v20  ;;  %v5785_v15 = vsub.f32 %v85_v54, %v296_v7  ;;  %4257 = vmatpush1.bf16.msra.mxu1 %v5771_v29  ;;  %v153_v53 = vld [vmem:[#allocation8 + $0x2b8] sm:$0xff] }
  0x50   :  { %8989 = vst [vmem:[#allocation57_spill] sm:$0xff] %v5766_v63  ;;  %8990 = vst [vmem:[#allocation58_spill] sm:$0xff] %v5769_v19  ;;  %4833 = vmatpush1.bf16.msra.mxu0 %v5775_v9  ;;  %v5789_v59 = vsub.f32 %v147_v55, %v1576_v21  ;;  %v294_v37 = vand.u32 4294901760, %v82_v26  ;;  %v298_v0 = vand.u32 4294901760, %v84_v28  ;;  %v1578_v1 = vand.u32 4294901760, %v146_v8  ;;  %v86_v55 = vld [vmem:[#allocation8 + $0xa0] sm:$0xff] }
  0x51   :  { %8991 = vst [vmem:[#allocation59_spill] sm:$0xff] %v5771_v29  ;;  %8992 = vst [vmem:[#allocation60_spill] sm:$0xff] %v5773_v32  ;;  %4259 = vmatprep.subr.bf16.mxu1 %v5781_v31  ;;  %v1582_v42 = vand.u32 4294901760, %v148_v49  ;;  %v300_v2 = vand.u32 4294901760, %v87_v5  ;;  %v304_v57 = vand.u32 4294901760, %v89_v60  ;;  %v5792_v20 = vpack.c.bf16 %v1580_v36, %v1576_v21  ;;  %v91_v21 = vld [vmem:[#allocation8 + $0xc8] sm:$0xff] }
  0x52   :  { %8993 = vst [vmem:[#allocation61_spill] sm:$0xff] %v5775_v9  ;;  %8994 = vst [vmem:[#allocation62_spill] sm:$0xff] %v5777_v30  ;;  %v5794_v54 = vsub.f32 %v149_v14, %v1580_v36  ;;  %v5796_v7 = vpack.c.bf16 %v298_v0, %v294_v37  ;;  %v5798_v29 = vsub.f32 %v82_v26, %v294_v37  ;;  %v88_v9 = vld [vmem:[#allocation8 + $0xb0] sm:$0xff]  ;;  %v302_v37 = vand.u32 4294901760, %v86_v55 }
  0x53   :  { %8995 = vst [vmem:[#allocation63_spill] sm:$0xff] %v5779_v45  ;;  %8996 = vst [vmem:[#allocation64_spill] sm:$0xff] %v5781_v31  ;;  %v5800_v3 = vsub.f32 %v84_v28, %v298_v0  ;;  %v5802_v31 = vpack.c.bf16 %v1582_v42, %v1578_v1  ;;  %v5804_v47 = vsub.f32 %v146_v8, %v1578_v1  ;;  %4835 = vmatprep.subr.bf16.mxu0 %v5792_v20 }
  0x54   :  { %8997 = vst [vmem:[#allocation65_spill] sm:$0xff] %v5783_v24  ;;  %8998 = vst [vmem:[#allocation66_spill] sm:$0xff] %v5785_v15  ;;  %v5806_v38 = vsub.f32 %v148_v49, %v1582_v42  ;;  %4261 = vmatpush1.bf16.msra.mxu1 %v5796_v7  ;;  %v5810_v14 = vpack.c.bf16 %v304_v57, %v300_v2  ;;  %v5812_v26 = vsub.f32 %v87_v5, %v300_v2 }
  0x55   :  { %8999 = vst [vmem:[#allocation67_spill] sm:$0xff] %v5789_v59  ;;  %9000 = vst [vmem:[#allocation68_spill] sm:$0xff] %v5792_v20  ;;  %v93_v59 = vld [vmem:[#allocation8 + $0xd8] sm:$0xff]  ;;  %v5814_v36 = vsub.f32 %v89_v60, %v304_v57  ;;  %v1584_v28 = vand.u32 4294901760, %v151_v35  ;;  %4837 = vmatpush1.bf16.msra.mxu0 %v5802_v31  ;;  %v1588_v8 = vand.u32 4294901760, %v153_v53  ;;  %v306_v49 = vand.u32 4294901760, %v88_v9 }
  0x56   :  { %9001 = vst [vmem:[#allocation69_spill] sm:$0xff] %v5794_v54  ;;  %9002 = vst [vmem:[#allocation70_spill] sm:$0xff] %v5796_v7  ;;  %v1586_v0 = vand.u32 4294901760, %v150_v11  ;;  %4263 = vmatprep.subr.bf16.mxu1 %v5810_v14  ;;  %v1590_v42 = vand.u32 4294901760, %v152_v22  ;;  %v308_v20 = vand.u32 4294901760, %v91_v21  ;;  %v312_v7 = vand.u32 4294901760, %v93_v59 }
  0x57   :  { %9003 = vst [vmem:[#allocation71_spill] sm:$0xff] %v5798_v29  ;;  %9004 = vst [vmem:[#allocation72_spill] sm:$0xff] %v5800_v3  ;;  %v5818_v1 = vsub.f32 %v151_v35, %v1584_v28  ;;  %v5820_v5 = vpack.c.bf16 %v1588_v8, %v1584_v28  ;;  %v5822_v60 = vsub.f32 %v153_v53, %v1588_v8  ;;  %v156_v29 = vld [vmem:[#allocation8 + $0x2d0] sm:$0xff]  ;;  %v95_v28 = vld [vmem:[#allocation8 + $0xe8] sm:$0xff] }
  0x58   :  { %9005 = vst [vmem:[#allocation73_spill] sm:$0xff] %v5802_v31  ;;  %9006 = vst [vmem:[#allocation74_spill] sm:$0xff] %v5804_v47  ;;  %v157_v47 = vld [vmem:[#allocation8 + $0x2d8] sm:$0xff]  ;;  %v5824_v57 = vpack.c.bf16 %v306_v49, %v302_v37  ;;  %v5826_v2 = vsub.f32 %v86_v55, %v302_v37  ;;  %v90_v31 = vld [vmem:[#allocation8 + $0xc0] sm:$0xff]  ;;  %v5828_v3 = vsub.f32 %v88_v9, %v306_v49 }
  0x59   :  { %9007 = vst [vmem:[#allocation75_spill] sm:$0xff] %v5806_v38  ;;  %9008 = vst [vmem:[#allocation76_spill] sm:$0xff] %v5810_v14  ;;  %v155_v38 = vld [vmem:[#allocation8 + $0x2c8] sm:$0xff]  ;;  %v5830_v35 = vpack.c.bf16 %v1590_v42, %v1586_v0  ;;  %v5832_v14 = vsub.f32 %v150_v11, %v1586_v0  ;;  %v97_v54 = vld [vmem:[#allocation8 + $0xf8] sm:$0xff]  ;;  %4839 = vmatprep.subr.bf16.mxu0 %v5820_v5  ;;  %v5838_v53 = vpack.c.bf16 %v312_v7, %v308_v20 }
  0x5a   :  { %9009 = vst [vmem:[#allocation77_spill] sm:$0xff] %v5812_v26  ;;  %9010 = vst [vmem:[#allocation78_spill] sm:$0xff] %v5814_v36  ;;  %v92_v36 = vld [vmem:[#allocation8 + $0xd0] sm:$0xff]  ;;  %v154_v26 = vld [vmem:[#allocation8 + $0x2c0] sm:$0xff]  ;;  %4265 = vmatpush1.bf16.msra.mxu1 %v5824_v57  ;;  %v5840_v55 = vsub.f32 %v91_v21, %v308_v20  ;;  %v5842_v8 = vsub.f32 %v93_v59, %v312_v7  ;;  %v1592_v9 = vand.u32 4294901760, %v155_v38  ;;  %v1596_v11 = vand.u32 4294901760, %v157_v47 }
  0x5b   :  { %9011 = vst [vmem:[#allocation79_spill] sm:$0xff] %v5818_v1  ;;  %9012 = vst [vmem:[#allocation80_spill] sm:$0xff] %v5820_v5  ;;  %v5834_v1 = vsub.f32 %v152_v22, %v1590_v42  ;;  %4841 = vmatpush1.bf16.msra.mxu0 %v5830_v35  ;;  %v310_v37 = vand.u32 4294901760, %v90_v31  ;;  %v314_v22 = vand.u32 4294901760, %v92_v36  ;;  %v1594_v49 = vand.u32 4294901760, %v154_v26  ;;  %4267 = vmatprep.subr.bf16.mxu1 %v5838_v53 }
  0x5c   :  { %9013 = vst [vmem:[#allocation81_spill] sm:$0xff] %v5822_v60  ;;  %9014 = vst [vmem:[#allocation82_spill] sm:$0xff] %v5824_v57  ;;  %v5846_v0 = vsub.f32 %v155_v38, %v1592_v9  ;;  %v1598_v42 = vand.u32 4294901760, %v156_v29  ;;  %v316_v5 = vand.u32 4294901760, %v95_v28  ;;  %v320_v57 = vand.u32 4294901760, %v97_v54  ;;  %v101_v60 = vld [vmem:[#allocation8 + $0x118] sm:$0xff] }
  0x5d   :  { %9015 = vst [vmem:[#allocation83_spill] sm:$0xff] %v5826_v2  ;;  %9016 = vst [vmem:[#allocation84_spill] sm:$0xff] %v5828_v3  ;;  %v5848_v20 = vpack.c.bf16 %v1596_v11, %v1592_v9  ;;  %v5850_v59 = vsub.f32 %v157_v47, %v1596_v11  ;;  %v5852_v7 = vpack.c.bf16 %v314_v22, %v310_v37  ;;  %v160_v2 = vld [vmem:[#allocation8 + $0x2f0] sm:$0xff]  ;;  %v99_v9 = vld [vmem:[#allocation8 + $0x108] sm:$0xff] }
  0x5e   :  { %9017 = vst [vmem:[#allocation85_spill] sm:$0xff] %v5830_v35  ;;  %9018 = vst [vmem:[#allocation86_spill] sm:$0xff] %v5832_v14  ;;  %v161_v14 = vld [vmem:[#allocation8 + $0x2f8] sm:$0xff]  ;;  %v5854_v21 = vsub.f32 %v90_v31, %v310_v37  ;;  %v94_v35 = vld [vmem:[#allocation8 + $0xe0] sm:$0xff]  ;;  %v5856_v3 = vsub.f32 %v92_v36, %v314_v22  ;;  %v5858_v38 = vpack.c.bf16 %v1598_v42, %v1594_v49 }
  0x5f   :  { %9019 = vst [vmem:[#allocation87_spill] sm:$0xff] %v5834_v1  ;;  %9020 = vst [vmem:[#allocation88_spill] sm:$0xff] %v5838_v53  ;;  %v159_v1 = vld [vmem:[#allocation8 + $0x2e8] sm:$0xff]  ;;  %v5860_v53 = vsub.f32 %v154_v26, %v1594_v49  ;;  %4843 = vmatprep.subr.bf16.mxu0 %v5848_v20  ;;  %4269 = vmatpush1.bf16.msra.mxu1 %v5852_v7  ;;  %v5866_v47 = vpack.c.bf16 %v320_v57, %v316_v5  ;;  %v1604_v26 = vand.u32 4294901760, %v161_v14 }
  0x60   :  { %9021 = vst [vmem:[#allocation89_spill] sm:$0xff] %v5840_v55  ;;  %9022 = vst [vmem:[#allocation90_spill] sm:$0xff] %v5842_v8  ;;  %v96_v8 = vld [vmem:[#allocation8 + $0xf0] sm:$0xff]  ;;  %v158_v55 = vld [vmem:[#allocation8 + $0x2e0] sm:$0xff]  ;;  %v5868_v31 = vsub.f32 %v95_v28, %v316_v5  ;;  %v5870_v11 = vsub.f32 %v97_v54, %v320_v57  ;;  %v1600_v36 = vand.u32 4294901760, %v159_v1  ;;  %4845 = vmatpush1.bf16.msra.mxu0 %v5858_v38  ;;  %v318_v37 = vand.u32 4294901760, %v94_v35 }
  0x61   :  { %9023 = vst [vmem:[#allocation91_spill] sm:$0xff] %v5846_v0  ;;  %9024 = vst [vmem:[#allocation92_spill] sm:$0xff] %v5848_v20  ;;  %v5862_v0 = vsub.f32 %v156_v29, %v1598_v42  ;;  %v322_v29 = vand.u32 4294901760, %v96_v8  ;;  %v1602_v22 = vand.u32 4294901760, %v158_v55  ;;  %4271 = vmatprep.subr.bf16.mxu1 %v5866_v47  ;;  %v1606_v42 = vand.u32 4294901760, %v160_v2 }
  0x62   :  { %9025 = vst [vmem:[#allocation93_spill] sm:$0xff] %v5850_v59  ;;  %9026 = vst [vmem:[#allocation94_spill] sm:$0xff] %v5852_v7  ;;  %v5874_v49 = vsub.f32 %v159_v1, %v1600_v36  ;;  %v324_v20 = vand.u32 4294901760, %v99_v9  ;;  %v328_v7 = vand.u32 4294901760, %v101_v60  ;;  %v5876_v5 = vpack.c.bf16 %v1604_v26, %v1600_v36  ;;  %v103_v36 = vld [vmem:[#allocation8 + $0x128] sm:$0xff]  ;;  %v105_v59 = vld [vmem:[#allocation8 + $0x138] sm:$0xff] }
  0x63   :  { %9027 = vst [vmem:[#allocation95_spill] sm:$0xff] %v5854_v21  ;;  %9028 = vst [vmem:[#allocation96_spill] sm:$0xff] %v5856_v3  ;;  %v5878_v54 = vsub.f32 %v161_v14, %v1604_v26  ;;  %v5880_v57 = vpack.c.bf16 %v322_v29, %v318_v37  ;;  %v5882_v28 = vsub.f32 %v94_v35, %v318_v37  ;;  %v164_v21 = vld [vmem:[#allocation8 + $0x310] sm:$0xff] }
  0x64   :  { %9029 = vst [vmem:[#allocation97_spill] sm:$0xff] %v5858_v38  ;;  %9030 = vst [vmem:[#allocation98_spill] sm:$0xff] %v5860_v53  ;;  %v165_v53 = vld [vmem:[#allocation8 + $0x318] sm:$0xff]  ;;  %v98_v38 = vld [vmem:[#allocation8 + $0x100] sm:$0xff]  ;;  %v5884_v3 = vsub.f32 %v96_v8, %v322_v29  ;;  %v5886_v1 = vpack.c.bf16 %v1606_v42, %v1602_v22  ;;  %4847 = vmatprep.subr.bf16.mxu0 %v5876_v5  ;;  %v5894_v14 = vpack.c.bf16 %v328_v7, %v324_v20 }
  0x65   :  { %9031 = vst [vmem:[#allocation99_spill] sm:$0xff] %v5862_v0  ;;  %9032 = vst [vmem:[#allocation100_spill] sm:$0xff] %v5866_v47  ;;  %v163_v0 = vld [vmem:[#allocation8 + $0x308] sm:$0xff]  ;;  %v5888_v47 = vsub.f32 %v158_v55, %v1602_v22  ;;  %4273 = vmatpush1.bf16.msra.mxu1 %v5880_v57  ;;  %v5896_v35 = vsub.f32 %v99_v9, %v324_v20  ;;  %v5898_v26 = vsub.f32 %v101_v60, %v328_v7 }
  0x66   :  { %9033 = vst [vmem:[#allocation101_spill] sm:$0xff] %v5868_v31  ;;  %9034 = vst [vmem:[#allocation102_spill] sm:$0xff] %v5870_v11  ;;  %v100_v11 = vld [vmem:[#allocation8 + $0x110] sm:$0xff]  ;;  %v162_v31 = vld [vmem:[#allocation8 + $0x300] sm:$0xff]  ;;  %v1608_v8 = vand.u32 4294901760, %v163_v0  ;;  %4849 = vmatpush1.bf16.msra.mxu0 %v5886_v1  ;;  %v1612_v55 = vand.u32 4294901760, %v165_v53  ;;  %4275 = vmatprep.subr.bf16.mxu1 %v5894_v14 }
  0x67   :  { %9035 = vst [vmem:[#allocation103_spill] sm:$0xff] %v5874_v49  ;;  %9036 = vst [vmem:[#allocation104_spill] sm:$0xff] %v5876_v5  ;;  %v5890_v49 = vsub.f32 %v160_v2, %v1606_v42  ;;  %v326_v37 = vand.u32 4294901760, %v98_v38  ;;  %v330_v2 = vand.u32 4294901760, %v100_v11  ;;  %v1610_v29 = vand.u32 4294901760, %v162_v31 }
  0x68   :  { %9037 = vst [vmem:[#allocation105_spill] sm:$0xff] %v5878_v54  ;;  %9038 = vst [vmem:[#allocation106_spill] sm:$0xff] %v5880_v57  ;;  %v5902_v22 = vsub.f32 %v163_v0, %v1608_v8  ;;  %v1614_v42 = vand.u32 4294901760, %v164_v21  ;;  %v332_v5 = vand.u32 4294901760, %v103_v36  ;;  %v336_v57 = vand.u32 4294901760, %v105_v59  ;;  %v109_v54 = vld [vmem:[#allocation8 + $0x158] sm:$0xff] }
  0x69   :  { %9039 = vst [vmem:[#allocation107_spill] sm:$0xff] %v5882_v28  ;;  %9040 = vst [vmem:[#allocation108_spill] sm:$0xff] %v5884_v3  ;;  %v5904_v20 = vpack.c.bf16 %v1612_v55, %v1608_v8  ;;  %v5906_v60 = vsub.f32 %v165_v53, %v1612_v55  ;;  %v5908_v7 = vpack.c.bf16 %v330_v2, %v326_v37  ;;  %v168_v28 = vld [vmem:[#allocation8 + $0x330] sm:$0xff]  ;;  %v107_v8 = vld [vmem:[#allocation8 + $0x148] sm:$0xff] }
  0x6a   :  { %9041 = vst [vmem:[#allocation109_spill] sm:$0xff] %v5886_v1  ;;  %9042 = vst [vmem:[#allocation110_spill] sm:$0xff] %v5888_v47  ;;  %v169_v47 = vld [vmem:[#allocation8 + $0x338] sm:$0xff]  ;;  %v5910_v9 = vsub.f32 %v98_v38, %v326_v37  ;;  %v102_v1 = vld [vmem:[#allocation8 + $0x120] sm:$0xff]  ;;  %v5912_v3 = vsub.f32 %v100_v11, %v330_v2  ;;  %v5914_v0 = vpack.c.bf16 %v1614_v42, %v1610_v29 }
  0x6b   :  { %9043 = vst [vmem:[#allocation111_spill] sm:$0xff] %v5890_v49  ;;  %9044 = vst [vmem:[#allocation112_spill] sm:$0xff] %v5894_v14  ;;  %v167_v49 = vld [vmem:[#allocation8 + $0x328] sm:$0xff]  ;;  %v5916_v14 = vsub.f32 %v162_v31, %v1610_v29  ;;  %4851 = vmatprep.subr.bf16.mxu0 %v5904_v20  ;;  %4277 = vmatpush1.bf16.msra.mxu1 %v5908_v7  ;;  %v5922_v53 = vpack.c.bf16 %v336_v57, %v332_v5  ;;  %v1620_v31 = vand.u32 4294901760, %v169_v47 }
  0x6c   :  { %9045 = vst [vmem:[#allocation113_spill] sm:$0xff] %v5896_v35  ;;  %9046 = vst [vmem:[#allocation114_spill] sm:$0xff] %v5898_v26  ;;  %v104_v26 = vld [vmem:[#allocation8 + $0x130] sm:$0xff]  ;;  %v166_v35 = vld [vmem:[#allocation8 + $0x320] sm:$0xff]  ;;  %v5924_v38 = vsub.f32 %v103_v36, %v332_v5  ;;  %v5926_v55 = vsub.f32 %v105_v59, %v336_v57  ;;  %v1616_v11 = vand.u32 4294901760, %v167_v49  ;;  %4853 = vmatpush1.bf16.msra.mxu0 %v5914_v0  ;;  %v334_v37 = vand.u32 4294901760, %v102_v1 }
  0x6d   :  { %9047 = vst [vmem:[#allocation115_spill] sm:$0xff] %v5902_v22  ;;  %9048 = vst [vmem:[#allocation116_spill] sm:$0xff] %v5904_v20  ;;  %v5918_v22 = vsub.f32 %v164_v21, %v1614_v42  ;;  %v338_v21 = vand.u32 4294901760, %v104_v26  ;;  %v1618_v2 = vand.u32 4294901760, %v166_v35  ;;  %4279 = vmatprep.subr.bf16.mxu1 %v5922_v53  ;;  %v1622_v42 = vand.u32 4294901760, %v168_v28 }
  0x6e   :  { %9049 = vst [vmem:[#allocation117_spill] sm:$0xff] %v5906_v60  ;;  %9050 = vst [vmem:[#allocation118_spill] sm:$0xff] %v5908_v7  ;;  %v5930_v29 = vsub.f32 %v167_v49, %v1616_v11  ;;  %v340_v20 = vand.u32 4294901760, %v107_v8  ;;  %v344_v7 = vand.u32 4294901760, %v109_v54  ;;  %v5932_v5 = vpack.c.bf16 %v1620_v31, %v1616_v11  ;;  %v111_v11 = vld [vmem:[#allocation8 + $0x168] sm:$0xff]  ;;  %v113_v60 = vld [vmem:[#allocation8 + $0x178] sm:$0xff] }
  0x6f   :  { %9051 = vst [vmem:[#allocation119_spill] sm:$0xff] %v5910_v9  ;;  %9052 = vst [vmem:[#allocation120_spill] sm:$0xff] %v5912_v3  ;;  %v5934_v59 = vsub.f32 %v169_v47, %v1620_v31  ;;  %v5936_v57 = vpack.c.bf16 %v338_v21, %v334_v37  ;;  %v5938_v36 = vsub.f32 %v102_v1, %v334_v37  ;;  %v172_v9 = vld [vmem:[#allocation8 + $0x350] sm:$0xff] }
  0x70   :  { %9053 = vst [vmem:[#allocation121_spill] sm:$0xff] %v5914_v0  ;;  %9054 = vst [vmem:[#allocation122_spill] sm:$0xff] %v5916_v14  ;;  %v173_v14 = vld [vmem:[#allocation8 + $0x358] sm:$0xff]  ;;  %v106_v0 = vld [vmem:[#allocation8 + $0x140] sm:$0xff]  ;;  %v5940_v3 = vsub.f32 %v104_v26, %v338_v21  ;;  %v5942_v49 = vpack.c.bf16 %v1622_v42, %v1618_v2  ;;  %4855 = vmatprep.subr.bf16.mxu0 %v5932_v5  ;;  %v5950_v47 = vpack.c.bf16 %v344_v7, %v340_v20 }
  0x71   :  { %9055 = vst [vmem:[#allocation123_spill] sm:$0xff] %v5918_v22  ;;  %9056 = vst [vmem:[#allocation124_spill] sm:$0xff] %v5922_v53  ;;  %v171_v22 = vld [vmem:[#allocation8 + $0x348] sm:$0xff]  ;;  %v5944_v53 = vsub.f32 %v166_v35, %v1618_v2  ;;  %4281 = vmatpush1.bf16.msra.mxu1 %v5936_v57  ;;  %v5952_v1 = vsub.f32 %v107_v8, %v340_v20  ;;  %v5954_v31 = vsub.f32 %v109_v54, %v344_v7 }
  0x72   :  { %9057 = vst [vmem:[#allocation125_spill] sm:$0xff] %v5924_v38  ;;  %9058 = vst [vmem:[#allocation126_spill] sm:$0xff] %v5926_v55  ;;  %v108_v55 = vld [vmem:[#allocation8 + $0x150] sm:$0xff]  ;;  %v170_v38 = vld [vmem:[#allocation8 + $0x340] sm:$0xff]  ;;  %v1624_v26 = vand.u32 4294901760, %v171_v22  ;;  %4857 = vmatpush1.bf16.msra.mxu0 %v5942_v49  ;;  %v1628_v35 = vand.u32 4294901760, %v173_v14  ;;  %4283 = vmatprep.subr.bf16.mxu1 %v5950_v47 }
  0x73   :  { %9059 = vst [vmem:[#allocation127_spill] sm:$0xff] %v5930_v29  ;;  %9060 = vst [vmem:[#allocation128_spill] sm:$0xff] %v5932_v5  ;;  %v5946_v29 = vsub.f32 %v168_v28, %v1622_v42  ;;  %v342_v37 = vand.u32 4294901760, %v106_v0  ;;  %v346_v28 = vand.u32 4294901760, %v108_v55  ;;  %v1626_v21 = vand.u32 4294901760, %v170_v38 }
  0x74   :  { %9061 = vst [vmem:[#allocation129_spill] sm:$0xff] %v5934_v59  ;;  %9062 = vst [vmem:[#allocation130_spill] sm:$0xff] %v5936_v57  ;;  %v5958_v2 = vsub.f32 %v171_v22, %v1624_v26  ;;  %v1630_v42 = vand.u32 4294901760, %v172_v9  ;;  %v348_v5 = vand.u32 4294901760, %v111_v11  ;;  %v352_v57 = vand.u32 4294901760, %v113_v60  ;;  %v117_v59 = vld [vmem:[#allocation8 + $0x198] sm:$0xff] }
  0x75   :  { %9063 = vst [vmem:[#allocation131_spill] sm:$0xff] %v5938_v36  ;;  %9064 = vst [vmem:[#allocation132_spill] sm:$0xff] %v5940_v3  ;;  %v5960_v20 = vpack.c.bf16 %v1628_v35, %v1624_v26  ;;  %v5962_v54 = vsub.f32 %v173_v14, %v1628_v35  ;;  %v5964_v7 = vpack.c.bf16 %v346_v28, %v342_v37  ;;  %v176_v36 = vld [vmem:[#allocation8 + $0x370] sm:$0xff]  ;;  %v115_v26 = vld [vmem:[#allocation8 + $0x188] sm:$0xff] }
  0x76   :  { %9065 = vst [vmem:[#allocation133_spill] sm:$0xff] %v5942_v49  ;;  %9066 = vst [vmem:[#allocation134_spill] sm:$0xff] %v5944_v53  ;;  %v177_v53 = vld [vmem:[#allocation8 + $0x378] sm:$0xff]  ;;  %v5966_v8 = vsub.f32 %v106_v0, %v342_v37  ;;  %v110_v49 = vld [vmem:[#allocation8 + $0x160] sm:$0xff]  ;;  %v5968_v3 = vsub.f32 %v108_v55, %v346_v28  ;;  %v5970_v22 = vpack.c.bf16 %v1630_v42, %v1626_v21 }
  0x77   :  { %9067 = vst [vmem:[#allocation135_spill] sm:$0xff] %v5946_v29  ;;  %9068 = vst [vmem:[#allocation136_spill] sm:$0xff] %v5950_v47  ;;  %v175_v29 = vld [vmem:[#allocation8 + $0x368] sm:$0xff]  ;;  %v5972_v47 = vsub.f32 %v170_v38, %v1626_v21  ;;  %4859 = vmatprep.subr.bf16.mxu0 %v5960_v20  ;;  %4285 = vmatpush1.bf16.msra.mxu1 %v5964_v7  ;;  %v5978_v14 = vpack.c.bf16 %v352_v57, %v348_v5  ;;  %v1636_v38 = vand.u32 4294901760, %v177_v53 }
  0x78   :  { %9069 = vst [vmem:[#allocation137_spill] sm:$0xff] %v5952_v1  ;;  %9070 = vst [vmem:[#allocation138_spill] sm:$0xff] %v5954_v31  ;;  %v112_v31 = vld [vmem:[#allocation8 + $0x170] sm:$0xff]  ;;  %v174_v1 = vld [vmem:[#allocation8 + $0x360] sm:$0xff]  ;;  %v5980_v0 = vsub.f32 %v111_v11, %v348_v5  ;;  %v5982_v35 = vsub.f32 %v113_v60, %v352_v57  ;;  %v1632_v55 = vand.u32 4294901760, %v175_v29  ;;  %4861 = vmatpush1.bf16.msra.mxu0 %v5970_v22  ;;  %v350_v37 = vand.u32 4294901760, %v110_v49 }
  0x79   :  { %9071 = vst [vmem:[#allocation139_spill] sm:$0xff] %v5958_v2  ;;  %9072 = vst [vmem:[#allocation140_spill] sm:$0xff] %v5960_v20  ;;  %v5974_v2 = vsub.f32 %v172_v9, %v1630_v42  ;;  %v354_v9 = vand.u32 4294901760, %v112_v31  ;;  %v1634_v28 = vand.u32 4294901760, %v174_v1  ;;  %4287 = vmatprep.subr.bf16.mxu1 %v5978_v14  ;;  %v1638_v42 = vand.u32 4294901760, %v176_v36 }
  0x7a   :  { %9073 = vst [vmem:[#allocation141_spill] sm:$0xff] %v5962_v54  ;;  %9074 = vst [vmem:[#allocation142_spill] sm:$0xff] %v5964_v7  ;;  %v5986_v21 = vsub.f32 %v175_v29, %v1632_v55  ;;  %v356_v20 = vand.u32 4294901760, %v115_v26  ;;  %v360_v7 = vand.u32 4294901760, %v117_v59  ;;  %v5988_v5 = vpack.c.bf16 %v1636_v38, %v1632_v55  ;;  %v119_v55 = vld [vmem:[#allocation8 + $0x1a8] sm:$0xff]  ;;  %v121_v54 = vld [vmem:[#allocation8 + $0x1b8] sm:$0xff] }
  0x7b   :  { %9075 = vst [vmem:[#allocation143_spill] sm:$0xff] %v5966_v8  ;;  %9076 = vst [vmem:[#allocation144_spill] sm:$0xff] %v5968_v3  ;;  %v5990_v60 = vsub.f32 %v177_v53, %v1636_v38  ;;  %v5992_v57 = vpack.c.bf16 %v354_v9, %v350_v37  ;;  %v5994_v11 = vsub.f32 %v110_v49, %v350_v37  ;;  %v180_v8 = vld [vmem:[#allocation8 + $0x390] sm:$0xff] }
  0x7c   :  { %9077 = vst [vmem:[#allocation145_spill] sm:$0xff] %v5970_v22  ;;  %9078 = vst [vmem:[#allocation146_spill] sm:$0xff] %v5972_v47  ;;  %v181_v47 = vld [vmem:[#allocation8 + $0x398] sm:$0xff]  ;;  %v114_v22 = vld [vmem:[#allocation8 + $0x180] sm:$0xff]  ;;  %v5996_v3 = vsub.f32 %v112_v31, %v354_v9  ;;  %v5998_v29 = vpack.c.bf16 %v1638_v42, %v1634_v28  ;;  %4863 = vmatprep.subr.bf16.mxu0 %v5988_v5  ;;  %v6006_v53 = vpack.c.bf16 %v360_v7, %v356_v20 }
  0x7d   :  { %9079 = vst [vmem:[#allocation147_spill] sm:$0xff] %v5974_v2  ;;  %9080 = vst [vmem:[#allocation148_spill] sm:$0xff] %v5978_v14  ;;  %v179_v2 = vld [vmem:[#allocation8 + $0x388] sm:$0xff]  ;;  %v6000_v14 = vsub.f32 %v174_v1, %v1634_v28  ;;  %4289 = vmatpush1.bf16.msra.mxu1 %v5992_v57  ;;  %v6008_v49 = vsub.f32 %v115_v26, %v356_v20  ;;  %v6010_v38 = vsub.f32 %v117_v59, %v360_v7 }
  0x7e   :  { %9081 = vst [vmem:[#allocation149_spill] sm:$0xff] %v5980_v0  ;;  %9082 = vst [vmem:[#allocation150_spill] sm:$0xff] %v5982_v35  ;;  %v116_v35 = vld [vmem:[#allocation8 + $0x190] sm:$0xff]  ;;  %v178_v0 = vld [vmem:[#allocation8 + $0x380] sm:$0xff]  ;;  %v1640_v31 = vand.u32 4294901760, %v179_v2  ;;  %4865 = vmatpush1.bf16.msra.mxu0 %v5998_v29  ;;  %v1644_v1 = vand.u32 4294901760, %v181_v47  ;;  %4291 = vmatprep.subr.bf16.mxu1 %v6006_v53 }
  0x7f   :  { %9083 = vst [vmem:[#allocation151_spill] sm:$0xff] %v5986_v21  ;;  %9084 = vst [vmem:[#allocation152_spill] sm:$0xff] %v5988_v5  ;;  %v6002_v21 = vsub.f32 %v176_v36, %v1638_v42  ;;  %v358_v37 = vand.u32 4294901760, %v114_v22  ;;  %v362_v36 = vand.u32 4294901760, %v116_v35  ;;  %v1642_v9 = vand.u32 4294901760, %v178_v0 }
  0x80   :  { %9085 = vst [vmem:[#allocation153_spill] sm:$0xff] %v5990_v60  ;;  %9086 = vst [vmem:[#allocation154_spill] sm:$0xff] %v5992_v57  ;;  %v6014_v28 = vsub.f32 %v179_v2, %v1640_v31  ;;  %v1646_v42 = vand.u32 4294901760, %v180_v8  ;;  %v364_v5 = vand.u32 4294901760, %v119_v55  ;;  %v368_v57 = vand.u32 4294901760, %v121_v54  ;;  %v125_v60 = vld [vmem:[#allocation8 + $0x1d8] sm:$0xff] }
  0x81   :  { %9087 = vst [vmem:[#allocation155_spill] sm:$0xff] %v5994_v11  ;;  %9088 = vst [vmem:[#allocation156_spill] sm:$0xff] %v5996_v3  ;;  %v6016_v20 = vpack.c.bf16 %v1644_v1, %v1640_v31  ;;  %v6018_v59 = vsub.f32 %v181_v47, %v1644_v1  ;;  %v6020_v7 = vpack.c.bf16 %v362_v36, %v358_v37  ;;  %v184_v11 = vld [vmem:[#allocation8 + $0x3b0] sm:$0xff]  ;;  %v123_v31 = vld [vmem:[#allocation8 + $0x1c8] sm:$0xff] }
  0x82   :  { %9089 = vst [vmem:[#allocation157_spill] sm:$0xff] %v5998_v29  ;;  %9090 = vst [vmem:[#allocation158_spill] sm:$0xff] %v6000_v14  ;;  %v185_v14 = vld [vmem:[#allocation8 + $0x3b8] sm:$0xff]  ;;  %v6022_v26 = vsub.f32 %v114_v22, %v358_v37  ;;  %v118_v29 = vld [vmem:[#allocation8 + $0x1a0] sm:$0xff]  ;;  %v6024_v3 = vsub.f32 %v116_v35, %v362_v36  ;;  %v6026_v2 = vpack.c.bf16 %v1646_v42, %v1642_v9 }
  0x83   :  { %9091 = vst [vmem:[#allocation159_spill] sm:$0xff] %v6002_v21  ;;  %9092 = vst [vmem:[#allocation160_spill] sm:$0xff] %v6006_v53  ;;  %v183_v21 = vld [vmem:[#allocation8 + $0x3a8] sm:$0xff]  ;;  %v6028_v53 = vsub.f32 %v178_v0, %v1642_v9  ;;  %4867 = vmatprep.subr.bf16.mxu0 %v6016_v20  ;;  %4293 = vmatpush1.bf16.msra.mxu1 %v6020_v7  ;;  %v6034_v47 = vpack.c.bf16 %v368_v57, %v364_v5  ;;  %v1652_v0 = vand.u32 4294901760, %v185_v14 }
  0x84   :  { %9093 = vst [vmem:[#allocation161_spill] sm:$0xff] %v6008_v49  ;;  %9094 = vst [vmem:[#allocation162_spill] sm:$0xff] %v6010_v38  ;;  %v120_v38 = vld [vmem:[#allocation8 + $0x1b0] sm:$0xff]  ;;  %v182_v49 = vld [vmem:[#allocation8 + $0x3a0] sm:$0xff]  ;;  %v6036_v22 = vsub.f32 %v119_v55, %v364_v5  ;;  %v6038_v1 = vsub.f32 %v121_v54, %v368_v57  ;;  %v1648_v35 = vand.u32 4294901760, %v183_v21  ;;  %4869 = vmatpush1.bf16.msra.mxu0 %v6026_v2  ;;  %v366_v37 = vand.u32 4294901760, %v118_v29 }
  0x85   :  { %9095 = vst [vmem:[#allocation163_spill] sm:$0xff] %v6014_v28  ;;  %9096 = vst [vmem:[#allocation164_spill] sm:$0xff] %v6016_v20  ;;  %v6030_v28 = vsub.f32 %v180_v8, %v1646_v42  ;;  %v370_v8 = vand.u32 4294901760, %v120_v38  ;;  %v1650_v36 = vand.u32 4294901760, %v182_v49  ;;  %4295 = vmatprep.subr.bf16.mxu1 %v6034_v47  ;;  %v1654_v42 = vand.u32 4294901760, %v184_v11 }
  0x86   :  { %9097 = vst [vmem:[#allocation165_spill] sm:$0xff] %v6018_v59  ;;  %9098 = vst [vmem:[#allocation166_spill] sm:$0xff] %v6020_v7  ;;  %v6042_v9 = vsub.f32 %v183_v21, %v1648_v35  ;;  %v372_v20 = vand.u32 4294901760, %v123_v31  ;;  %v376_v7 = vand.u32 4294901760, %v125_v60  ;;  %v6044_v5 = vpack.c.bf16 %v1652_v0, %v1648_v35  ;;  %v127_v35 = vld [vmem:[#allocation8 + $0x1e8] sm:$0xff]  ;;  %v129_v59 = vld [vmem:[#allocation8 + $0x1f8] sm:$0xff] }
  0x87   :  { %9099 = vst [vmem:[#allocation167_spill] sm:$0xff] %v6022_v26  ;;  %9100 = vst [vmem:[#allocation168_spill] sm:$0xff] %v6024_v3  ;;  %v6046_v54 = vsub.f32 %v185_v14, %v1652_v0  ;;  %v6048_v57 = vpack.c.bf16 %v370_v8, %v366_v37  ;;  %v6050_v55 = vsub.f32 %v118_v29, %v366_v37  ;;  %v188_v26 = vld [vmem:[#allocation8 + $0x3d0] sm:$0xff] }
  0x88   :  { %9101 = vst [vmem:[#allocation169_spill] sm:$0xff] %v6026_v2  ;;  %9102 = vst [vmem:[#allocation170_spill] sm:$0xff] %v6028_v53  ;;  %v189_v53 = vld [vmem:[#allocation8 + $0x3d8] sm:$0xff]  ;;  %v122_v2 = vld [vmem:[#allocation8 + $0x1c0] sm:$0xff]  ;;  %v6052_v3 = vsub.f32 %v120_v38, %v370_v8  ;;  %v6054_v21 = vpack.c.bf16 %v1654_v42, %v1650_v36  ;;  %4871 = vmatprep.subr.bf16.mxu0 %v6044_v5  ;;  %v6062_v14 = vpack.c.bf16 %v376_v7, %v372_v20 }
  0x89   :  { %9103 = vst [vmem:[#allocation171_spill] sm:$0xff] %v6030_v28  ;;  %9104 = vst [vmem:[#allocation172_spill] sm:$0xff] %v6034_v47  ;;  %v187_v28 = vld [vmem:[#allocation8 + $0x3c8] sm:$0xff]  ;;  %v6056_v47 = vsub.f32 %v182_v49, %v1650_v36  ;;  %4297 = vmatpush1.bf16.msra.mxu1 %v6048_v57  ;;  %v6064_v29 = vsub.f32 %v123_v31, %v372_v20  ;;  %v6066_v0 = vsub.f32 %v125_v60, %v376_v7 }
  0x8a   :  { %9105 = vst [vmem:[#allocation173_spill] sm:$0xff] %v6036_v22  ;;  %9106 = vst [vmem:[#allocation174_spill] sm:$0xff] %v6038_v1  ;;  %v124_v1 = vld [vmem:[#allocation8 + $0x1d0] sm:$0xff]  ;;  %v186_v22 = vld [vmem:[#allocation8 + $0x3c0] sm:$0xff]  ;;  %v1656_v38 = vand.u32 4294901760, %v187_v28  ;;  %4873 = vmatpush1.bf16.msra.mxu0 %v6054_v21  ;;  %v1660_v49 = vand.u32 4294901760, %v189_v53  ;;  %4299 = vmatprep.subr.bf16.mxu1 %v6062_v14 }
  0x8b   :  { %9107 = vst [vmem:[#allocation175_spill] sm:$0xff] %v6042_v9  ;;  %9108 = vst [vmem:[#allocation176_spill] sm:$0xff] %v6044_v5  ;;  %v6058_v9 = vsub.f32 %v184_v11, %v1654_v42  ;;  %v374_v37 = vand.u32 4294901760, %v122_v2  ;;  %v378_v11 = vand.u32 4294901760, %v124_v1  ;;  %v1658_v8 = vand.u32 4294901760, %v186_v22 }
  0x8c   :  { %9109 = vst [vmem:[#allocation177_spill] sm:$0xff] %v6046_v54  ;;  %9110 = vst [vmem:[#allocation178_spill] sm:$0xff] %v6048_v57  ;;  %v6070_v36 = vsub.f32 %v187_v28, %v1656_v38  ;;  %v1662_v42 = vand.u32 4294901760, %v188_v26  ;;  %v380_v5 = vand.u32 4294901760, %v127_v35  ;;  %v384_v57 = vand.u32 4294901760, %v129_v59 }
  0x8d   :  { %9111 = vst [vmem:[#allocation179_spill] sm:$0xff] %v6050_v55  ;;  %9112 = vst [vmem:[#allocation180_spill] sm:$0xff] %v6052_v3  ;;  %v6072_v20 = vpack.c.bf16 %v1660_v49, %v1656_v38  ;;  %v6074_v60 = vsub.f32 %v189_v53, %v1660_v49  ;;  %v6076_v7 = vpack.c.bf16 %v378_v11, %v374_v37  ;;  %v192_v55 = vld [vmem:[#allocation8 + $0x3f0] sm:$0xff]  ;;  %v61_v38 = vld [vmem:[#allocation3 + $0x8] sm:$0xff] }
  0x8e   :  { %9113 = vst [vmem:[#allocation181_spill] sm:$0xff] %v6054_v21  ;;  %9114 = vst [vmem:[#allocation182_spill] sm:$0xff] %v6056_v47  ;;  %v193_v47 = vld [vmem:[#allocation8 + $0x3f8] sm:$0xff]  ;;  %v6078_v31 = vsub.f32 %v122_v2, %v374_v37  ;;  %v126_v21 = vld [vmem:[#allocation8 + $0x1e0] sm:$0xff]  ;;  %v6080_v3 = vsub.f32 %v124_v1, %v378_v11  ;;  %v6082_v28 = vpack.c.bf16 %v1662_v42, %v1658_v8 }
  0x8f   :  { %9115 = vst [vmem:[#allocation183_spill] sm:$0xff] %v6058_v9  ;;  %9116 = vst [vmem:[#allocation184_spill] sm:$0xff] %v6062_v14  ;;  %v191_v9 = vld [vmem:[#allocation8 + $0x3e8] sm:$0xff]  ;;  %v6084_v14 = vsub.f32 %v186_v22, %v1658_v8  ;;  %4875 = vmatprep.subr.bf16.mxu0 %v6072_v20  ;;  %4301 = vmatpush1.bf16.msra.mxu1 %v6076_v7  ;;  %v6090_v53 = vpack.c.bf16 %v384_v57, %v380_v5  ;;  %v1668_v37 = vand.u32 4294901760, %v193_v47 }
  0x90   :  { %9117 = vst [vmem:[#allocation185_spill] sm:$0xff] %v6064_v29  ;;  %9118 = vst [vmem:[#allocation186_spill] sm:$0xff] %v6066_v0  ;;  %v128_v0 = vld [vmem:[#allocation8 + $0x1f0] sm:$0xff]  ;;  %v190_v29 = vld [vmem:[#allocation8 + $0x3e0] sm:$0xff]  ;;  %v6092_v2 = vsub.f32 %v127_v35, %v380_v5  ;;  %v6094_v49 = vsub.f32 %v129_v59, %v384_v57  ;;  %v1664_v1 = vand.u32 4294901760, %v191_v9  ;;  %4877 = vmatpush1.bf16.msra.mxu0 %v6082_v28  ;;  %v382_v22 = vand.u32 4294901760, %v126_v21 }
  0x91   :  { %9119 = vst [vmem:[#allocation187_spill] sm:$0xff] %v6070_v36  ;;  %9120 = vst [vmem:[#allocation188_spill] sm:$0xff] %v6072_v20  ;;  %v6086_v36 = vsub.f32 %v188_v26, %v1662_v42  ;;  %v386_v11 = vand.u32 4294901760, %v128_v0  ;;  %v1666_v26 = vand.u32 4294901760, %v190_v29  ;;  %4303 = vmatprep.subr.bf16.mxu1 %v6090_v53  ;;  %v1670_v42 = vand.u32 4294901760, %v192_v55  ;;  %v63_v5 = vld [vmem:[#allocation3 + $0x18] sm:$0xff] }
  0x92   :  { %9121 = vst [vmem:[#allocation189_spill] sm:$0xff] %v6074_v60  ;;  %9122 = vst [vmem:[#allocation190_spill] sm:$0xff] %v6076_v7  ;;  %v6098_v8 = vsub.f32 %v191_v9, %v1664_v1  ;;  %v6100_v20 = vand.u32 4294901760, %v61_v38  ;;  %v8416_v7 = vand.u32 4294901760, %v5673_v16  ;;  %v6103_v35 = vpack.c.bf16 %v1668_v37, %v1664_v1 }
  0x93   :  { %9123 = vst [vmem:[#allocation191_spill] sm:$0xff] %v6078_v31  ;;  %9124 = vst [vmem:[#allocation192_spill] sm:$0xff] %v6080_v3  ;;  %v6105_v59 = vsub.f32 %v193_v47, %v1668_v37  ;;  %v6107_v57 = vpack.c.bf16 %v386_v11, %v382_v22  ;;  %v6115_v9 = vsub.f32 %v190_v29, %v1666_v26  ;;  %v6128_v1 = vand.u32 4294901760, %v63_v5 }
  0x94   :  { %9125 = vst [vmem:[#allocation193_spill] sm:$0xff] %v6082_v28  ;;  %9126 = vst [vmem:[#allocation194_spill] sm:$0xff] %v6084_v14  ;;  %v6109_v28 = vsub.f32 %v126_v21, %v382_v22  ;;  %4879 = vmatprep.subr.bf16.mxu0 %v6103_v35  ;;  %v6122_v47 = vsub.f32 %v61_v38, %v6100_v20  ;;  %v408_v21 = vsub.f32 %v5673_v16, %v8416_v7  ;;  %v62_v38 = vld [vmem:[#allocation3 + $0x10] sm:$0xff] }
  0x95   :  { %9127 = vst [vmem:[#allocation195_spill] sm:$0xff] %v6086_v36  ;;  %9128 = vst [vmem:[#allocation196_spill] sm:$0xff] %v6090_v53  ;;  %v6113_v53 = vpack.c.bf16 %v1670_v42, %v1666_v26  ;;  %4305 = vmatpush1.bf16.msra.mxu1 %v6107_v57  ;;  %v8428_v29 = vand.u32 4294901760, %v5681_v23  ;;  %v8430_v22 = vand.u32 4294901760, %v5685_v25  ;;  %v6141_v7 = vsub.f32 %v63_v5, %v6128_v1 }
  0x96   :  { %9129 = vst [vmem:[#allocation197_spill] sm:$0xff] %v6092_v2  ;;  %9130 = vst [vmem:[#allocation198_spill] sm:$0xff] %v6094_v49  ;;  %v60_v49 = vld [vmem:[#allocation3] sm:$0xff]  ;;  %v6111_v2 = vsub.f32 %v128_v0, %v386_v11  ;;  %v8423_v0 = vand.u32 4294901760, %v5675_v17  ;;  %v409_v26 = vand.u32 4294901760, %v408_v21  ;;  %v8438_v21 = vand.u32 4294901760, %v5688_v27 }
  0x97   :  { %9131 = vst [vmem:[#allocation199_spill] sm:$0xff] %v6098_v8  ;;  %9132 = vst [vmem:[#allocation200_spill] sm:$0xff] %v6100_v20  ;;  %v6117_v8 = vsub.f32 %v192_v55, %v1670_v42  ;;  %4881 = vmatpush1.bf16.msra.mxu0 %v6113_v53  ;;  %v8429_v55 = vand.u32 4294901760, %v5677_v18  ;;  %v6133_v37 = vand.u32 4294901760, %v60_v49  ;;  %v414_v11 = vsub.f32 %v5685_v25, %v8430_v22 }
  0x98   :  { %9133 = vst [vmem:[#allocation201_spill] sm:$0xff] %v6103_v35  ;;  %9134 = vst [vmem:[#allocation202_spill] sm:$0xff] %v6105_v59  ;;  %v420_v42 = vsub.f32 %v5675_v17, %v8423_v0  ;;  %v9146_v35 = vand.u32 4294901760, %v6122_v47  ;;  %v8437_v17 = vand.u32 4294901760, %v6141_v7  ;;  %v6158_v18 = vand.u32 4294901760, %v62_v38 }
  0x99   :  { %9135 = vst [vmem:[#allocation203_spill] sm:$0xff] %v6107_v57  ;;  %9136 = vst [vmem:[#allocation204_spill] sm:$0xff] %v6109_v28  ;;  %v4882_v57 = vpack.c.bf16 %v8428_v29, %v8429_v55  ;;  %v426_v55 = vsub.f32 %v5688_v27, %v8438_v21  ;;  %v8440_v22 = vand.u32 4294901760, %v5694_v39 }
  0x9a   :  { %9137 = vst [vmem:[#allocation205_spill] sm:$0xff] %v6111_v2  ;;  %9138 = vst [vmem:[#allocation206_spill] sm:$0xff] %v6113_v53  ;;  %v6148_v53 = vsub.f32 %v60_v49, %v6133_v37  ;;  %v391_v0 = vsub.f32 %v6122_v47, %v9146_v35  ;;  %v421_v5 = vand.u32 4294901760, %v420_v42  ;;  %v415_v49 = vand.u32 4294901760, %v414_v11  ;;  %2416 = vmatprep.mubr.f32.mxu0 %v8437_v17 }
  0x9b   :  { %9139 = vst [vmem:[#allocation207_spill] sm:$0xff] %v6115_v9  ;;  %9140 = vst [vmem:[#allocation208_spill] sm:$0xff] %v6117_v8  ;;  %4883 = vmatprep.subr.bf16.mxu0 %v4882_v57  ;;  %v6168_v35 = vsub.f32 %v62_v38, %v6158_v18  ;;  %v427_v42 = vand.u32 4294901760, %v426_v55  ;;  %v8439_v11 = vand.u32 4294901760, %v5696_v40  ;;  %v8444_v38 = vand.u32 4294901760, %v5709_v50  ;;  %v9169_v50 = vld [vmem:[#allocation93_spill] sm:$0xff] }
  0x9c   :  { %9141 = vst [vmem:[#allocation209_spill] sm:$0xff] %v6122_v47  ;;  %9142 = vst [vmem:[#allocation210_spill] sm:$0xff] %v6128_v1  ;;  %v8442_v29 = vand.u32 4294901760, %v6148_v53  ;;  %v392_v23 = vand.u32 4294901760, %v391_v0  ;;  %v8450_v47 = vand.u32 4294901760, %v5698_v41 }
  0x9d   :  { %9143 = vst [vmem:[#allocation211_spill] sm:$0xff] %v6133_v37  ;;  %9144 = vst [vmem:[#allocation212_spill] sm:$0xff] %v6141_v7  ;;  %v4306_v37 = vpack.c.bf16 %v421_v5, %v409_v26  ;;  %v8441_v0 = vand.u32 4294901760, %v6168_v35  ;;  %v8443_v26 = vand.u32 4294901760, %v5702_v46  ;;  %v8445_v5 = vand.u32 4294901760, %v5706_v48  ;;  %v9178_v7 = vld [vmem:[#allocation105_spill] sm:$0xff] }
  0x9e   :  { %9145 = vst [vmem:[#allocation213_spill] sm:$0xff] %v6148_v53  ;;  %9147 = vst [vmem:[#allocation214_spill] sm:$0xff] %v6158_v18  ;;  %v397_v57 = vsub.f32 %v6148_v53, %v8442_v29  ;;  %393 = vmatprep.mubr.f32.mxu1 %v392_v23  ;;  %v4308_v21 = vpack.c.bf16 %v427_v42, %v415_v49  ;;  %v4884_v55 = vpack.c.bf16 %v8439_v11, %v8440_v22 }
  0x9f   :  { %9148 = vst [vmem:[#allocation215_spill] sm:$0xff] %v6168_v35  ;;  %4307 = vmatprep.subr.bf16.mxu1 %v4306_v37  ;;  %v432_v23 = vsub.f32 %v5698_v41, %v8450_v47  ;;  %2420 = vmatmul.mubr.f32.vlgmr.msra.gmra.mrb[0].mxu0 %v8441_v0  ;;  %v444_v37 = vsub.f32 %v5702_v46, %v8443_v26  ;;  %v8446_v11 = vand.u32 4294901760, %v5717_v61  ;;  %v8449_v22 = vand.u32 4294901760, %v5719_v62 }
  0xa0   :  { %v398_v17 = vand.u32 4294901760, %v397_v57  ;;  %v4886_v49 = vpack.c.bf16 %v8444_v38, %v8445_v5  ;;  %v8447_v57 = vand.u32 4294901760, %v5711_v52  ;;  %4885 = vmatpush1.bf16.msra.mxu0 %v4884_v55  ;;  %v8448_v0 = vand.u32 4294901760, %v5723_v4  ;;  %2683 = vmatprep.mubr.f32.mxu0 %v6128_v1 }
  0xa1   :  { %v433_v42 = vand.u32 4294901760, %v432_v23  ;;  %v445_v29 = vand.u32 4294901760, %v444_v37  ;;  %v8451_v38 = vand.u32 4294901760, %v5727_v6  ;;  %v8452_v23 = vand.u32 4294901760, %v5730_v10 }
  0xa2   :  { %399 = vmatmul.mubr.f32.vlgmr.msra.gmra.mrb[0].mxu1 %v398_v17  ;;  %4887 = vmatprep.subr.bf16.mxu0 %v4886_v49  ;;  %v438_v26 = vsub.f32 %v5711_v52, %v8447_v57  ;;  %v450_v17 = vsub.f32 %v5717_v61, %v8446_v11  ;;  %v4888_v55 = vpack.c.bf16 %v8448_v0, %v8449_v22  ;;  %v8453_v11 = vand.u32 4294901760, %v5736_v13 }
  0xa3   :  { %4309 = vmatpush1.bf16.msra.mxu1 %v4308_v21  ;;  %790 = vmatprep.mubr.f32.mxu1 %v6100_v20  ;;  %v4310_v37 = vpack.c.bf16 %v445_v29, %v433_v42  ;;  %v456_v5 = vsub.f32 %v5727_v6, %v8451_v38  ;;  %v468_v0 = vsub.f32 %v5730_v10, %v8452_v23  ;;  %v8454_v22 = vand.u32 4294901760, %v5743_v33 }
  0xa4   :  { %v439_v49 = vand.u32 4294901760, %v438_v26  ;;  %v451_v57 = vand.u32 4294901760, %v450_v17  ;;  %4889 = vmatpush1.bf16.msra.mxu0 %v4888_v55  ;;  %v8459_v47 = vand.u32 4294901760, %v5745_v34  ;;  %v9149_v29 = vand.u32 4294901760, %v5734_v12  ;;  %v9160_v12 = vld [vmem:[#allocation81_spill] sm:$0xff] }
  0xa5   :  { %4311 = vmatprep.subr.bf16.mxu1 %v4310_v37  ;;  %v457_v21 = vand.u32 4294901760, %v456_v5  ;;  %v8458_v42 = vand.u32 4294901760, %v5749_v43  ;;  %v8457_v17 = vand.u32 4294901760, %v5751_v44  ;;  %v469_v38 = vand.u32 4294901760, %v468_v0 }
  0xa6   :  { %v4890_v26 = vpack.c.bf16 %v8453_v11, %v9149_v29  ;;  %v4312_v55 = vpack.c.bf16 %v451_v57, %v439_v49  ;;  %v462_v23 = vsub.f32 %v5743_v33, %v8454_v22  ;;  %v474_v37 = vsub.f32 %v5745_v34, %v8459_v47  ;;  %v9196_v33 = vld [vmem:[#allocation129_spill] sm:$0xff] }
  0xa7   :  { %v4892_v5 = vpack.c.bf16 %v8457_v17, %v8458_v42  ;;  %v8463_v29 = vand.u32 4294901760, %v5755_v51  ;;  %v8460_v11 = vand.u32 4294901760, %v5759_v56  ;;  %v8462_v0 = vand.u32 4294901760, %v5763_v58 }
  0xa8   :  { %4891 = vmatprep.subr.bf16.mxu0 %v4890_v26  ;;  %4313 = vmatpush1.bf16.msra.mxu1 %v4312_v55  ;;  %v4314_v57 = vpack.c.bf16 %v469_v38, %v457_v21  ;;  %v463_v49 = vand.u32 4294901760, %v462_v23  ;;  %v475_v22 = vand.u32 4294901760, %v474_v37  ;;  %v8461_v13 = vand.u32 4294901760, %v5766_v63  ;;  %v9151_v63 = vld [vmem:[#allocation69_spill] sm:$0xff] }
  0xa9   :  { %4893 = vmatpush1.bf16.msra.mxu0 %v4892_v5  ;;  %v480_v26 = vsub.f32 %v5755_v51, %v8463_v29  ;;  %v492_v17 = vsub.f32 %v5759_v56, %v8460_v11  ;;  %v8464_v42 = vand.u32 4294901760, %v5769_v19  ;;  %v8471_v47 = vand.u32 4294901760, %v5773_v32 }
  0xaa   :  { %4315 = vmatprep.subr.bf16.mxu1 %v4314_v57  ;;  %v4316_v55 = vpack.c.bf16 %v475_v22, %v463_v49  ;;  %v4894_v38 = vpack.c.bf16 %v8461_v13, %v8462_v0  ;;  %v8470_v23 = vand.u32 4294901760, %v5777_v30  ;;  %v8469_v21 = vand.u32 4294901760, %v5779_v45 }
  0xab   :  { %v481_v37 = vand.u32 4294901760, %v480_v26  ;;  %v493_v5 = vand.u32 4294901760, %v492_v17  ;;  %v486_v11 = vsub.f32 %v5769_v19, %v8464_v42  ;;  %v498_v57 = vsub.f32 %v5773_v32, %v8471_v47  ;;  %v9150_v17 = vld [vmem:[#allocation67_spill] sm:$0xff]  ;;  %v9153_v47 = vld [vmem:[#allocation72_spill] sm:$0xff]  ;;  %v9187_v19 = vld [vmem:[#allocation117_spill] sm:$0xff] }
  0xac   :  { %4317 = vmatpush1.bf16.msra.mxu1 %v4316_v55  ;;  %4895 = vmatprep.subr.bf16.mxu0 %v4894_v38  ;;  %v4896_v22 = vpack.c.bf16 %v8469_v21, %v8470_v23  ;;  %v8476_v49 = vand.u32 4294901760, %v5783_v24  ;;  %v8479_v26 = vand.u32 4294901760, %v5785_v15  ;;  %v8480_v58 = vand.u32 4294901760, %v9151_v63  ;;  %v9152_v21 = vld [vmem:[#allocation71_spill] sm:$0xff] }
  0xad   :  { %v4318_v0 = vpack.c.bf16 %v493_v5, %v481_v37  ;;  %v487_v29 = vand.u32 4294901760, %v486_v11  ;;  %v499_v42 = vand.u32 4294901760, %v498_v57  ;;  %v8485_v23 = vand.u32 4294901760, %v9152_v21  ;;  %v9155_v5 = vld [vmem:[#allocation74_spill] sm:$0xff] }
  0xae   :  { %4897 = vmatpush1.bf16.msra.mxu0 %v4896_v22  ;;  %v504_v55 = vsub.f32 %v5783_v24, %v8476_v49  ;;  %v516_v38 = vsub.f32 %v5785_v15, %v8479_v26  ;;  %v8492_v45 = vand.u32 4294901760, %v9153_v47  ;;  %v9154_v11 = vand.u32 4294901760, %v9150_v17  ;;  %v9156_v22 = vld [vmem:[#allocation75_spill] sm:$0xff] }
  0xaf   :  { %4319 = vmatprep.subr.bf16.mxu1 %v4318_v0  ;;  %v4320_v13 = vpack.c.bf16 %v499_v42, %v487_v29  ;;  %v8491_v57 = vand.u32 4294901760, %v9155_v5  ;;  %v8490_v30 = vand.u32 4294901760, %v9156_v22  ;;  %v510_v26 = vsub.f32 %v9152_v21, %v8485_v23  ;;  %v9157_v29 = vld [vmem:[#allocation77_spill] sm:$0xff] }
  0xb0   :  { %v4898_v37 = vpack.c.bf16 %v8480_v58, %v9154_v11  ;;  %v505_v49 = vand.u32 4294901760, %v504_v55  ;;  %v517_v44 = vand.u32 4294901760, %v516_v38  ;;  %v522_v0 = vsub.f32 %v9153_v47, %v8492_v45  ;;  %v9158_v58 = vld [vmem:[#allocation78_spill] sm:$0xff]  ;;  %v9159_v38 = vld [vmem:[#allocation79_spill] sm:$0xff]  ;;  %v9162_v45 = vld [vmem:[#allocation84_spill] sm:$0xff] }
  0xb1   :  { %4321 = vmatpush1.bf16.msra.mxu1 %v4320_v13  ;;  %v4900_v42 = vpack.c.bf16 %v8490_v30, %v8491_v57  ;;  %v8495_v11 = vand.u32 4294901760, %v9157_v29  ;;  %v8498_v55 = vand.u32 4294901760, %v9158_v58  ;;  %v511_v43 = vand.u32 4294901760, %v510_v26  ;;  %v9161_v30 = vld [vmem:[#allocation83_spill] sm:$0xff]  ;;  %v9164_v26 = vld [vmem:[#allocation86_spill] sm:$0xff] }
  0xb2   :  { %4899 = vmatprep.subr.bf16.mxu0 %v4898_v37  ;;  %v4322_v17 = vpack.c.bf16 %v517_v44, %v505_v49  ;;  %v523_v23 = vand.u32 4294901760, %v522_v0  ;;  %v8499_v4 = vand.u32 4294901760, %v9160_v12  ;;  %v8504_v57 = vand.u32 4294901760, %v9161_v30 }
  0xb3   :  { %4901 = vmatpush1.bf16.msra.mxu0 %v4900_v42  ;;  %v528_v13 = vsub.f32 %v9157_v29, %v8495_v11  ;;  %v540_v37 = vsub.f32 %v9158_v58, %v8498_v55  ;;  %v8511_v22 = vand.u32 4294901760, %v9162_v45  ;;  %v9163_v44 = vand.u32 4294901760, %v9159_v38  ;;  %v9165_v42 = vld [vmem:[#allocation87_spill] sm:$0xff] }
  0xb4   :  { %4323 = vmatprep.subr.bf16.mxu1 %v4322_v17  ;;  %v4324_v63 = vpack.c.bf16 %v523_v23, %v511_v43  ;;  %v8510_v0 = vand.u32 4294901760, %v9164_v26  ;;  %v8509_v5 = vand.u32 4294901760, %v9165_v42  ;;  %v534_v55 = vsub.f32 %v9161_v30, %v8504_v57  ;;  %v9166_v23 = vld [vmem:[#allocation89_spill] sm:$0xff] }
  0xb5   :  { %v4902_v49 = vpack.c.bf16 %v8499_v4, %v9163_v44  ;;  %v529_v11 = vand.u32 4294901760, %v528_v13  ;;  %v541_v62 = vand.u32 4294901760, %v540_v37  ;;  %v546_v17 = vsub.f32 %v9162_v45, %v8511_v22  ;;  %v9167_v4 = vld [vmem:[#allocation90_spill] sm:$0xff]  ;;  %v9168_v37 = vld [vmem:[#allocation91_spill] sm:$0xff]  ;;  %v9171_v22 = vld [vmem:[#allocation96_spill] sm:$0xff] }
  0xb6   :  { %4325 = vmatpush1.bf16.msra.mxu1 %v4324_v63  ;;  %v4904_v43 = vpack.c.bf16 %v8509_v5, %v8510_v0  ;;  %v8514_v44 = vand.u32 4294901760, %v9166_v23  ;;  %v8517_v13 = vand.u32 4294901760, %v9167_v4  ;;  %v535_v35 = vand.u32 4294901760, %v534_v55  ;;  %v9170_v5 = vld [vmem:[#allocation95_spill] sm:$0xff]  ;;  %v9173_v55 = vld [vmem:[#allocation98_spill] sm:$0xff] }
  0xb7   :  { %4903 = vmatprep.subr.bf16.mxu0 %v4902_v49  ;;  %v4326_v38 = vpack.c.bf16 %v541_v62, %v529_v11  ;;  %v547_v57 = vand.u32 4294901760, %v546_v17  ;;  %v8518_v48 = vand.u32 4294901760, %v9169_v50  ;;  %v8523_v0 = vand.u32 4294901760, %v9170_v5 }
  0xb8   :  { %4905 = vmatpush1.bf16.msra.mxu0 %v4904_v43  ;;  %v552_v63 = vsub.f32 %v9166_v23, %v8514_v44  ;;  %v564_v49 = vsub.f32 %v9167_v4, %v8517_v13  ;;  %v8530_v42 = vand.u32 4294901760, %v9171_v22  ;;  %v9172_v62 = vand.u32 4294901760, %v9168_v37  ;;  %v9174_v43 = vld [vmem:[#allocation99_spill] sm:$0xff] }
  0xb9   :  { %4327 = vmatprep.subr.bf16.mxu1 %v4326_v38  ;;  %v4328_v12 = vpack.c.bf16 %v547_v57, %v535_v35  ;;  %v8529_v17 = vand.u32 4294901760, %v9173_v55  ;;  %v8528_v26 = vand.u32 4294901760, %v9174_v43  ;;  %v558_v13 = vsub.f32 %v9170_v5, %v8523_v0  ;;  %v9175_v57 = vld [vmem:[#allocation101_spill] sm:$0xff] }
  0xba   :  { %v4906_v11 = vpack.c.bf16 %v8518_v48, %v9172_v62  ;;  %v553_v44 = vand.u32 4294901760, %v552_v63  ;;  %v565_v40 = vand.u32 4294901760, %v564_v49  ;;  %v570_v38 = vsub.f32 %v9171_v22, %v8530_v42  ;;  %v9176_v48 = vld [vmem:[#allocation102_spill] sm:$0xff]  ;;  %v9177_v49 = vld [vmem:[#allocation103_spill] sm:$0xff]  ;;  %v9180_v42 = vld [vmem:[#allocation108_spill] sm:$0xff] }
  0xbb   :  { %4329 = vmatpush1.bf16.msra.mxu1 %v4328_v12  ;;  %v4908_v35 = vpack.c.bf16 %v8528_v26, %v8529_v17  ;;  %v8533_v62 = vand.u32 4294901760, %v9175_v57  ;;  %v8536_v63 = vand.u32 4294901760, %v9176_v48  ;;  %v559_v39 = vand.u32 4294901760, %v558_v13  ;;  %v9179_v26 = vld [vmem:[#allocation107_spill] sm:$0xff]  ;;  %v9182_v13 = vld [vmem:[#allocation110_spill] sm:$0xff] }
  0xbc   :  { %4907 = vmatprep.subr.bf16.mxu0 %v4906_v11  ;;  %v4330_v37 = vpack.c.bf16 %v565_v40, %v553_v44  ;;  %v571_v0 = vand.u32 4294901760, %v570_v38  ;;  %v8537_v20 = vand.u32 4294901760, %v9178_v7  ;;  %v8542_v17 = vand.u32 4294901760, %v9179_v26 }
  0xbd   :  { %4909 = vmatpush1.bf16.msra.mxu0 %v4908_v35  ;;  %v576_v12 = vsub.f32 %v9175_v57, %v8533_v62  ;;  %v588_v11 = vsub.f32 %v9176_v48, %v8536_v63  ;;  %v8549_v43 = vand.u32 4294901760, %v9180_v42  ;;  %v9181_v40 = vand.u32 4294901760, %v9177_v49  ;;  %v9183_v35 = vld [vmem:[#allocation111_spill] sm:$0xff] }
  0xbe   :  { %4331 = vmatprep.subr.bf16.mxu1 %v4330_v37  ;;  %v4332_v50 = vpack.c.bf16 %v571_v0, %v559_v39  ;;  %v8548_v38 = vand.u32 4294901760, %v9182_v13  ;;  %v8547_v55 = vand.u32 4294901760, %v9183_v35  ;;  %v582_v63 = vsub.f32 %v9179_v26, %v8542_v17  ;;  %v9184_v0 = vld [vmem:[#allocation113_spill] sm:$0xff] }
  0xbf   :  { %v4910_v44 = vpack.c.bf16 %v8537_v20, %v9181_v40  ;;  %v577_v62 = vand.u32 4294901760, %v576_v12  ;;  %v589_v53 = vand.u32 4294901760, %v588_v11  ;;  %v594_v37 = vsub.f32 %v9180_v42, %v8549_v43  ;;  %v9185_v20 = vld [vmem:[#allocation114_spill] sm:$0xff]  ;;  %v9186_v11 = vld [vmem:[#allocation115_spill] sm:$0xff]  ;;  %v9189_v43 = vld [vmem:[#allocation120_spill] sm:$0xff] }
  0xc0   :  { %4333 = vmatpush1.bf16.msra.mxu1 %v4332_v50  ;;  %v4912_v39 = vpack.c.bf16 %v8547_v55, %v8548_v38  ;;  %v8552_v40 = vand.u32 4294901760, %v9184_v0  ;;  %v8555_v12 = vand.u32 4294901760, %v9185_v20  ;;  %v583_v32 = vand.u32 4294901760, %v582_v63  ;;  %v9188_v55 = vld [vmem:[#allocation119_spill] sm:$0xff]  ;;  %v9191_v63 = vld [vmem:[#allocation122_spill] sm:$0xff] }
  0xc1   :  { %4911 = vmatprep.subr.bf16.mxu0 %v4910_v44  ;;  %v4334_v49 = vpack.c.bf16 %v589_v53, %v577_v62  ;;  %v595_v17 = vand.u32 4294901760, %v594_v37  ;;  %v8556_v56 = vand.u32 4294901760, %v9187_v19  ;;  %v8561_v38 = vand.u32 4294901760, %v9188_v55 }
  0xc2   :  { %4913 = vmatpush1.bf16.msra.mxu0 %v4912_v39  ;;  %v600_v50 = vsub.f32 %v9184_v0, %v8552_v40  ;;  %v612_v44 = vsub.f32 %v9185_v20, %v8555_v12  ;;  %v8568_v35 = vand.u32 4294901760, %v9189_v43  ;;  %v9190_v53 = vand.u32 4294901760, %v9186_v11  ;;  %v9192_v39 = vld [vmem:[#allocation123_spill] sm:$0xff] }
  0xc3   :  { %4335 = vmatprep.subr.bf16.mxu1 %v4334_v49  ;;  %v4336_v7 = vpack.c.bf16 %v595_v17, %v583_v32  ;;  %v8567_v37 = vand.u32 4294901760, %v9191_v63  ;;  %v8566_v13 = vand.u32 4294901760, %v9192_v39  ;;  %v606_v12 = vsub.f32 %v9188_v55, %v8561_v38  ;;  %v9193_v17 = vld [vmem:[#allocation125_spill] sm:$0xff] }
  0xc4   :  { %v4914_v62 = vpack.c.bf16 %v8556_v56, %v9190_v53  ;;  %v601_v40 = vand.u32 4294901760, %v600_v50  ;;  %v613_v51 = vand.u32 4294901760, %v612_v44  ;;  %v618_v49 = vsub.f32 %v9189_v43, %v8568_v35  ;;  %v9194_v56 = vld [vmem:[#allocation126_spill] sm:$0xff]  ;;  %v9195_v44 = vld [vmem:[#allocation127_spill] sm:$0xff]  ;;  %v9198_v35 = vld [vmem:[#allocation132_spill] sm:$0xff] }
  0xc5   :  { %4337 = vmatpush1.bf16.msra.mxu1 %v4336_v7  ;;  %v4916_v32 = vpack.c.bf16 %v8566_v13, %v8567_v37  ;;  %v8571_v53 = vand.u32 4294901760, %v9193_v17  ;;  %v8574_v50 = vand.u32 4294901760, %v9194_v56  ;;  %v607_v34 = vand.u32 4294901760, %v606_v12  ;;  %v9197_v13 = vld [vmem:[#allocation131_spill] sm:$0xff]  ;;  %v9200_v12 = vld [vmem:[#allocation134_spill] sm:$0xff] }
  0xc6   :  { %4915 = vmatprep.subr.bf16.mxu0 %v4914_v62  ;;  %v4338_v11 = vpack.c.bf16 %v613_v51, %v601_v40  ;;  %v619_v38 = vand.u32 4294901760, %v618_v49  ;;  %v8575_v1 = vand.u32 4294901760, %v9196_v33  ;;  %v8580_v37 = vand.u32 4294901760, %v9197_v13 }
  0xc7   :  { %4917 = vmatpush1.bf16.msra.mxu0 %v4916_v32  ;;  %v624_v7 = vsub.f32 %v9193_v17, %v8571_v53  ;;  %v636_v62 = vsub.f32 %v9194_v56, %v8574_v50  ;;  %v8585_v39 = vand.u32 4294901760, %v9198_v35  ;;  %v9199_v51 = vand.u32 4294901760, %v9195_v44  ;;  %v9201_v32 = vld [vmem:[#allocation135_spill] sm:$0xff] }
  0xc8   :  { %4339 = vmatprep.subr.bf16.mxu1 %v4338_v11  ;;  %v4340_v19 = vpack.c.bf16 %v619_v38, %v607_v34  ;;  %v8584_v49 = vand.u32 4294901760, %v9200_v12  ;;  %v8583_v63 = vand.u32 4294901760, %v9201_v32  ;;  %v630_v50 = vsub.f32 %v9197_v13, %v8580_v37  ;;  %v9202_v38 = vld [vmem:[#allocation137_spill] sm:$0xff] }
  0xc9   :  { %v4918_v40 = vpack.c.bf16 %v8575_v1, %v9199_v51  ;;  %v625_v53 = vand.u32 4294901760, %v624_v7  ;;  %v637_v10 = vand.u32 4294901760, %v636_v62  ;;  %v642_v11 = vsub.f32 %v9198_v35, %v8585_v39  ;;  %v9203_v1 = vld [vmem:[#allocation138_spill] sm:$0xff]  ;;  %v9204_v62 = vld [vmem:[#allocation139_spill] sm:$0xff]  ;;  %v9205_v13 = vld [vmem:[#allocation141_spill] sm:$0xff] }
  0xca   :  { %4341 = vmatpush1.bf16.msra.mxu1 %v4340_v19  ;;  %v4920_v34 = vpack.c.bf16 %v8583_v63, %v8584_v49  ;;  %v8588_v51 = vand.u32 4294901760, %v9202_v38  ;;  %v8590_v7 = vand.u32 4294901760, %v9203_v1  ;;  %v631_v6 = vand.u32 4294901760, %v630_v50  ;;  %v9206_v63 = vld [vmem:[#allocation143_spill] sm:$0xff]  ;;  %v9207_v39 = vld [vmem:[#allocation144_spill] sm:$0xff]  ;;  %v9209_v50 = vld [vmem:[#allocation146_spill] sm:$0xff] }
  0xcb   :  { %4919 = vmatprep.subr.bf16.mxu0 %v4918_v40  ;;  %v4342_v44 = vpack.c.bf16 %v637_v10, %v625_v53  ;;  %v643_v37 = vand.u32 4294901760, %v642_v11  ;;  %v8591_v56 = vand.u32 4294901760, %v9205_v13  ;;  %v8595_v49 = vand.u32 4294901760, %v9206_v63 }
  0xcc   :  { %4921 = vmatpush1.bf16.msra.mxu0 %v4920_v34  ;;  %v648_v19 = vsub.f32 %v9202_v38, %v8588_v51  ;;  %v660_v40 = vsub.f32 %v9203_v1, %v8590_v7  ;;  %v8600_v32 = vand.u32 4294901760, %v9207_v39  ;;  %v9208_v10 = vand.u32 4294901760, %v9204_v62  ;;  %v9210_v34 = vld [vmem:[#allocation147_spill] sm:$0xff] }
  0xcd   :  { %4343 = vmatprep.subr.bf16.mxu1 %v4342_v44  ;;  %v4344_v33 = vpack.c.bf16 %v643_v37, %v631_v6  ;;  %v8599_v11 = vand.u32 4294901760, %v9209_v50  ;;  %v8598_v12 = vand.u32 4294901760, %v9210_v34  ;;  %v654_v7 = vsub.f32 %v9206_v63, %v8595_v49  ;;  %v9211_v37 = vld [vmem:[#allocation149_spill] sm:$0xff] }
  0xce   :  { %v4922_v53 = vpack.c.bf16 %v8591_v56, %v9208_v10  ;;  %v649_v51 = vand.u32 4294901760, %v648_v19  ;;  %v661_v38 = vand.u32 4294901760, %v660_v40  ;;  %v666_v44 = vsub.f32 %v9207_v39, %v8600_v32  ;;  %v9212_v56 = vld [vmem:[#allocation150_spill] sm:$0xff]  ;;  %v9213_v40 = vld [vmem:[#allocation151_spill] sm:$0xff]  ;;  %v9214_v63 = vld [vmem:[#allocation153_spill] sm:$0xff] }
  0xcf   :  { %4345 = vmatpush1.bf16.msra.mxu1 %v4344_v33  ;;  %v4924_v6 = vpack.c.bf16 %v8598_v12, %v8599_v11  ;;  %v8603_v10 = vand.u32 4294901760, %v9211_v37  ;;  %v8605_v19 = vand.u32 4294901760, %v9212_v56  ;;  %v655_v1 = vand.u32 4294901760, %v654_v7  ;;  %v9215_v12 = vld [vmem:[#allocation155_spill] sm:$0xff]  ;;  %v9216_v32 = vld [vmem:[#allocation156_spill] sm:$0xff]  ;;  %v9218_v7 = vld [vmem:[#allocation158_spill] sm:$0xff] }
  0xd0   :  { %4923 = vmatprep.subr.bf16.mxu0 %v4922_v53  ;;  %v4346_v62 = vpack.c.bf16 %v661_v38, %v649_v51  ;;  %v667_v49 = vand.u32 4294901760, %v666_v44  ;;  %v8606_v35 = vand.u32 4294901760, %v9214_v63  ;;  %v8610_v11 = vand.u32 4294901760, %v9215_v12 }
  0xd1   :  { %4925 = vmatpush1.bf16.msra.mxu0 %v4924_v6  ;;  %v672_v33 = vsub.f32 %v9211_v37, %v8603_v10  ;;  %v684_v53 = vsub.f32 %v9212_v56, %v8605_v19  ;;  %v8615_v34 = vand.u32 4294901760, %v9216_v32  ;;  %v9217_v38 = vand.u32 4294901760, %v9213_v40  ;;  %v9219_v6 = vld [vmem:[#allocation159_spill] sm:$0xff] }
  0xd2   :  { %4347 = vmatprep.subr.bf16.mxu1 %v4346_v62  ;;  %v4348_v13 = vpack.c.bf16 %v667_v49, %v655_v1  ;;  %v8614_v44 = vand.u32 4294901760, %v9218_v7  ;;  %v8613_v50 = vand.u32 4294901760, %v9219_v6  ;;  %v678_v19 = vsub.f32 %v9215_v12, %v8610_v11  ;;  %v9220_v49 = vld [vmem:[#allocation161_spill] sm:$0xff] }
  0xd3   :  { %v4926_v51 = vpack.c.bf16 %v8606_v35, %v9217_v38  ;;  %v673_v10 = vand.u32 4294901760, %v672_v33  ;;  %v685_v37 = vand.u32 4294901760, %v684_v53  ;;  %v690_v62 = vsub.f32 %v9216_v32, %v8615_v34  ;;  %v9221_v35 = vld [vmem:[#allocation162_spill] sm:$0xff]  ;;  %v9222_v53 = vld [vmem:[#allocation163_spill] sm:$0xff]  ;;  %v9223_v12 = vld [vmem:[#allocation165_spill] sm:$0xff] }
  0xd4   :  { %4349 = vmatpush1.bf16.msra.mxu1 %v4348_v13  ;;  %v4928_v1 = vpack.c.bf16 %v8613_v50, %v8614_v44  ;;  %v8618_v38 = vand.u32 4294901760, %v9220_v49  ;;  %v8620_v33 = vand.u32 4294901760, %v9221_v35  ;;  %v679_v56 = vand.u32 4294901760, %v678_v19  ;;  %v9224_v50 = vld [vmem:[#allocation167_spill] sm:$0xff]  ;;  %v9225_v34 = vld [vmem:[#allocation168_spill] sm:$0xff]  ;;  %v9227_v19 = vld [vmem:[#allocation170_spill] sm:$0xff] }
  0xd5   :  { %4927 = vmatprep.subr.bf16.mxu0 %v4926_v51  ;;  %v4350_v40 = vpack.c.bf16 %v685_v37, %v673_v10  ;;  %v691_v11 = vand.u32 4294901760, %v690_v62  ;;  %v8621_v39 = vand.u32 4294901760, %v9223_v12  ;;  %v8625_v44 = vand.u32 4294901760, %v9224_v50 }
  0xd6   :  { %4929 = vmatpush1.bf16.msra.mxu0 %v4928_v1  ;;  %v696_v13 = vsub.f32 %v9220_v49, %v8618_v38  ;;  %v708_v51 = vsub.f32 %v9221_v35, %v8620_v33  ;;  %v8629_v6 = vand.u32 4294901760, %v9225_v34  ;;  %v9226_v37 = vand.u32 4294901760, %v9222_v53  ;;  %v9228_v1 = vld [vmem:[#allocation171_spill] sm:$0xff] }
  0xd7   :  { %4351 = vmatprep.subr.bf16.mxu1 %v4350_v40  ;;  %v4352_v63 = vpack.c.bf16 %v691_v11, %v679_v56  ;;  %v8628_v62 = vand.u32 4294901760, %v9227_v19  ;;  %v8627_v7 = vand.u32 4294901760, %v9228_v1  ;;  %v702_v33 = vsub.f32 %v9224_v50, %v8625_v44  ;;  %v9229_v11 = vld [vmem:[#allocation173_spill] sm:$0xff] }
  0xd8   :  { %v4930_v10 = vpack.c.bf16 %v8621_v39, %v9226_v37  ;;  %v697_v38 = vand.u32 4294901760, %v696_v13  ;;  %v709_v49 = vand.u32 4294901760, %v708_v51  ;;  %v714_v40 = vsub.f32 %v9225_v34, %v8629_v6  ;;  %v9230_v39 = vld [vmem:[#allocation174_spill] sm:$0xff]  ;;  %v9231_v51 = vld [vmem:[#allocation175_spill] sm:$0xff]  ;;  %v9233_v6 = vld [vmem:[#allocation180_spill] sm:$0xff] }
  0xd9   :  { %4353 = vmatpush1.bf16.msra.mxu1 %v4352_v63  ;;  %v4932_v56 = vpack.c.bf16 %v8627_v7, %v8628_v62  ;;  %v8632_v37 = vand.u32 4294901760, %v9229_v11  ;;  %v8634_v13 = vand.u32 4294901760, %v9230_v39  ;;  %v703_v35 = vand.u32 4294901760, %v702_v33  ;;  %v9232_v7 = vld [vmem:[#allocation179_spill] sm:$0xff]  ;;  %v9235_v33 = vld [vmem:[#allocation182_spill] sm:$0xff] }
  0xda   :  { %4931 = vmatprep.subr.bf16.mxu0 %v4930_v10  ;;  %v4354_v53 = vpack.c.bf16 %v709_v49, %v697_v38  ;;  %v715_v44 = vand.u32 4294901760, %v714_v40  ;;  %v8635_v50 = vand.u32 4294901760, %v6046_v54  ;;  %v8640_v62 = vand.u32 4294901760, %v9232_v7 }
  0xdb   :  { %4933 = vmatpush1.bf16.msra.mxu0 %v4932_v56  ;;  %v720_v63 = vsub.f32 %v9229_v11, %v8632_v37  ;;  %v732_v10 = vsub.f32 %v9230_v39, %v8634_v13  ;;  %v8644_v1 = vand.u32 4294901760, %v9233_v6  ;;  %v9234_v49 = vand.u32 4294901760, %v9231_v51  ;;  %v9236_v56 = vld [vmem:[#allocation183_spill] sm:$0xff] }
  0xdc   :  { %4355 = vmatprep.subr.bf16.mxu1 %v4354_v53  ;;  %v4356_v12 = vpack.c.bf16 %v715_v44, %v703_v35  ;;  %v8643_v40 = vand.u32 4294901760, %v9235_v33  ;;  %v8642_v19 = vand.u32 4294901760, %v9236_v56  ;;  %v726_v13 = vsub.f32 %v9232_v7, %v8640_v62  ;;  %v9237_v44 = vld [vmem:[#allocation185_spill] sm:$0xff] }
  0xdd   :  { %v4934_v38 = vpack.c.bf16 %v8635_v50, %v9234_v49  ;;  %v721_v37 = vand.u32 4294901760, %v720_v63  ;;  %v733_v11 = vand.u32 4294901760, %v732_v10  ;;  %v738_v53 = vsub.f32 %v9233_v6, %v8644_v1  ;;  %v9238_v50 = vld [vmem:[#allocation186_spill] sm:$0xff]  ;;  %v9239_v10 = vld [vmem:[#allocation187_spill] sm:$0xff]  ;;  %v9250_v33 = vld [vmem:[#allocation137_spill] sm:$0xff] }
  0xde   :  { %4357 = vmatpush1.bf16.msra.mxu1 %v4356_v12  ;;  %v4936_v35 = vpack.c.bf16 %v8642_v19, %v8643_v40  ;;  %v8648_v49 = vand.u32 4294901760, %v9237_v44  ;;  %v8645_v63 = vand.u32 4294901760, %v9238_v50  ;;  %v8647_v54 = vand.u32 4294901760, %v9239_v10 }
  0xdf   :  { %4935 = vmatprep.subr.bf16.mxu0 %v4934_v38  ;;  %v4358_v51 = vpack.c.bf16 %v733_v11, %v721_v37  ;;  %v727_v39 = vand.u32 4294901760, %v726_v13  ;;  %v739_v62 = vand.u32 4294901760, %v738_v53  ;;  %v8646_v7 = vand.u32 4294901760, %v6074_v60 }
  0xe0   :  { %4937 = vmatpush1.bf16.msra.mxu0 %v4936_v35  ;;  %v744_v12 = vsub.f32 %v9237_v44, %v8648_v49  ;;  %v756_v38 = vsub.f32 %v9238_v50, %v8645_v63  ;;  %v8652_v19 = vand.u32 4294901760, %v6078_v31  ;;  %v8656_v40 = vand.u32 4294901760, %v6080_v3 }
  0xe1   :  { %4359 = vmatprep.subr.bf16.mxu1 %v4358_v51  ;;  %v4360_v1 = vpack.c.bf16 %v739_v62, %v727_v39  ;;  %v4938_v11 = vpack.c.bf16 %v8646_v7, %v8647_v54  ;;  %v8655_v37 = vand.u32 4294901760, %v6084_v14  ;;  %v8654_v13 = vand.u32 4294901760, %v6086_v36  ;;  %v9240_v62 = vld [vmem:[#allocation197_spill] sm:$0xff]  ;;  %v9241_v54 = vld [vmem:[#allocation198_spill] sm:$0xff]  ;;  %v9249_v36 = vld [vmem:[#allocation132_spill] sm:$0xff] }
  0xe2   :  { %v745_v53 = vand.u32 4294901760, %v744_v12  ;;  %v757_v35 = vand.u32 4294901760, %v756_v38  ;;  %v750_v63 = vsub.f32 %v6078_v31, %v8652_v19  ;;  %v762_v51 = vsub.f32 %v6080_v3, %v8656_v40  ;;  %v9242_v38 = vld [vmem:[#allocation199_spill] sm:$0xff] }
  0xe3   :  { %4361 = vmatpush1.bf16.msra.mxu1 %v4360_v1  ;;  %4939 = vmatprep.subr.bf16.mxu0 %v4938_v11  ;;  %v4940_v39 = vpack.c.bf16 %v8654_v13, %v8655_v37  ;;  %v8664_v7 = vand.u32 4294901760, %v9240_v62  ;;  %v8657_v12 = vand.u32 4294901760, %v9241_v54  ;;  %v8659_v49 = vand.u32 4294901760, %v9242_v38  ;;  %v9248_v38 = vld [vmem:[#allocation131_spill] sm:$0xff] }
  0xe4   :  { %v4362_v60 = vpack.c.bf16 %v757_v35, %v745_v53  ;;  %v751_v10 = vand.u32 4294901760, %v750_v63  ;;  %v763_v19 = vand.u32 4294901760, %v762_v51  ;;  %v8658_v56 = vand.u32 4294901760, %v6105_v59  ;;  %v9247_v59 = vld [vmem:[#allocation31_spill] sm:$0xff] }
  0xe5   :  { %4941 = vmatpush1.bf16.msra.mxu0 %v4940_v39  ;;  %v768_v1 = vsub.f32 %v9240_v62, %v8664_v7  ;;  %v780_v11 = vsub.f32 %v9241_v54, %v8657_v12  ;;  %v8660_v13 = vand.u32 4294901760, %v6109_v28  ;;  %v8661_v37 = vand.u32 4294901760, %v6111_v2 }
  0xe6   :  { %4363 = vmatprep.subr.bf16.mxu1 %v4362_v60  ;;  %v4364_v40 = vpack.c.bf16 %v763_v19, %v751_v10  ;;  %v4942_v63 = vpack.c.bf16 %v8658_v56, %v8659_v49  ;;  %v8663_v53 = vand.u32 4294901760, %v6115_v9  ;;  %v8662_v35 = vand.u32 4294901760, %v6117_v8  ;;  %v9246_v8 = vld [vmem:[#allocation126_spill] sm:$0xff] }
  0xe7   :  { %v769_v51 = vand.u32 4294901760, %v768_v1  ;;  %v781_v39 = vand.u32 4294901760, %v780_v11  ;;  %v774_v12 = vsub.f32 %v6109_v28, %v8660_v13  ;;  %v786_v60 = vsub.f32 %v6111_v2, %v8661_v37  ;;  %v9243_v1 = vld [vmem:[#allocation18_spill] sm:$0xff] }
  0xe8   :  { %4365 = vmatpush1.bf16.msra.mxu1 %v4364_v40  ;;  %4943 = vmatprep.subr.bf16.mxu0 %v4942_v63  ;;  %v4944_v19 = vpack.c.bf16 %v8662_v35, %v8663_v53  ;;  %v4370_v11 = vpack.c.bf16 %v9243_v1, %v5673_v16  ;;  %v4372_v13 = vpack.c.bf16 %v5688_v27, %v5685_v25  ;;  %v9244_v63 = vld [vmem:[#allocation20_spill] sm:$0xff]  ;;  %v9245_v53 = vld [vmem:[#allocation25_spill] sm:$0xff] }
  0xe9   :  { %v4366_v10 = vpack.c.bf16 %v781_v39, %v769_v51  ;;  %v775_v56 = vand.u32 4294901760, %v774_v12  ;;  %v787_v49 = vand.u32 4294901760, %v786_v60  ;;  %v4374_v37 = vpack.c.bf16 %v5702_v46, %v5698_v41  ;;  %v9366_v46 = vld [vmem:[#allocation70_spill] sm:$0xff]  ;;  %v234_v27 = vld [vmem:[#allocation8 + $0x540] sm:$0xff] }
  0xea   :  { %4945 = vmatpush1.bf16.msra.mxu0 %v4944_v19  ;;  %v4376_v35 = vpack.c.bf16 %v5717_v61, %v5711_v52  ;;  %v4386_v12 = vpack.c.bf16 %v5785_v15, %v5783_v24  ;;  %v4388_v51 = vpack.c.bf16 %v9153_v47, %v9152_v21  ;;  %v4390_v39 = vpack.c.bf16 %v9158_v58, %v9157_v29  ;;  %v210_v47 = vld [vmem:[#allocation8 + $0x480] sm:$0xff]  ;;  %v231_v61 = vld [vmem:[#allocation8 + $0x528] sm:$0xff]  ;;  %v233_v52 = vld [vmem:[#allocation8 + $0x538] sm:$0xff] }
  0xeb   :  { %4367 = vmatprep.subr.bf16.mxu1 %v4366_v10  ;;  %v4368_v40 = vpack.c.bf16 %v787_v49, %v775_v56  ;;  %4947 = vmatprep.subr.bf16.mxu0 %v9244_v63  ;;  %v4392_v60 = vpack.c.bf16 %v9162_v45, %v9161_v30  ;;  %v4394_v56 = vpack.c.bf16 %v9167_v4, %v9166_v23  ;;  %v9251_v63 = vld [vmem:[#allocation138_spill] sm:$0xff]  ;;  %v9275_v23 = vld [vmem:[#allocation55_spill] sm:$0xff]  ;;  %v9277_v45 = vld [vmem:[#allocation60_spill] sm:$0xff] }
  0xec   :  { %v4396_v49 = vpack.c.bf16 %v9171_v22, %v9170_v5  ;;  %v4398_v19 = vpack.c.bf16 %v9176_v48, %v9175_v57  ;;  %v4400_v10 = vpack.c.bf16 %v9180_v42, %v9179_v26  ;;  %v4402_v7 = vpack.c.bf16 %v9185_v20, %v9184_v0  ;;  %v9253_v26 = vld [vmem:[#allocation144_spill] sm:$0xff]  ;;  %v9254_v48 = vld [vmem:[#allocation149_spill] sm:$0xff]  ;;  %v9255_v57 = vld [vmem:[#allocation150_spill] sm:$0xff] }
  0xed   :  { %4369 = vmatpush1.bf16.msra.mxu1 %v4368_v40  ;;  %2685 = vmatmul.mubr.f32.vlgmr.msra.gmra.mrb[0].mxu0 %v6158_v18  ;;  %v4404_v40 = vpack.c.bf16 %v9189_v43, %v9188_v55  ;;  %v4406_v9 = vpack.c.bf16 %v9246_v8, %v9193_v17  ;;  %v4408_v14 = vpack.c.bf16 %v9249_v36, %v9248_v38  ;;  %v9256_v0 = vld [vmem:[#allocation211_spill] sm:$0xff]  ;;  %v9258_v8 = vld [vmem:[#allocation161_spill] sm:$0xff]  ;;  %v9259_v17 = vld [vmem:[#allocation162_spill] sm:$0xff] }
  0xee   :  { %4371 = vmatprep.subr.bf16.mxu1 %v4370_v11  ;;  %4949 = vmatpush1.bf16.msra.mxu0 %v9245_v53  ;;  %v4410_v42 = vpack.c.bf16 %v9251_v63, %v9250_v33  ;;  %v9252_v11 = vld [vmem:[#allocation143_spill] sm:$0xff]  ;;  %v4414_v20 = vpack.c.bf16 %v9255_v57, %v9254_v48  ;;  %v9261_v38 = vld [vmem:[#allocation173_spill] sm:$0xff]  ;;  %v9262_v5 = vld [vmem:[#allocation174_spill] sm:$0xff] }
  0xef   :  { %4951 = vmatprep.subr.bf16.mxu0 %v9247_v59  ;;  %v4412_v53 = vpack.c.bf16 %v9253_v26, %v9252_v11  ;;  %v9257_v43 = vld [vmem:[#allocation155_spill] sm:$0xff]  ;;  %v4418_v59 = vpack.c.bf16 %v9259_v17, %v9258_v8  ;;  %v9264_v17 = vld [vmem:[#allocation38_spill] sm:$0xff]  ;;  %v9265_v36 = vld [vmem:[#allocation41_spill] sm:$0xff] }
  0xf0   :  { %792 = vmatmul.mubr.f32.vlgmr.msra.gmra.mrb[0].mxu1 %v9256_v0  ;;  %v4416_v55 = vpack.c.bf16 %v9216_v32, %v9257_v43  ;;  %v9260_v22 = vld [vmem:[#allocation167_spill] sm:$0xff]  ;;  %v9266_v8 = vld [vmem:[#allocation42_spill] sm:$0xff]  ;;  %v9268_v26 = vld [vmem:[#allocation209_spill] sm:$0xff] }
  0xf1   :  { %4373 = vmatpush1.bf16.msra.mxu1 %v4372_v13  ;;  %v9263_v33 = vld [vmem:[#allocation179_spill] sm:$0xff]  ;;  %v4378_v43 = vpack.c.bf16 %v9266_v8, %v9265_v36  ;;  %992 = vmatprep.mubr.f32.mxu1 %v9268_v26  ;;  %v9269_v57 = vld [vmem:[#allocation210_spill] sm:$0xff]  ;;  %v9271_v48 = vld [vmem:[#allocation48_spill] sm:$0xff] }
  0xf2   :  { %4375 = vmatprep.subr.bf16.mxu1 %v4374_v37  ;;  %4953 = vmatpush1.bf16.msra.mxu0 %v9264_v17  ;;  %v9267_v63 = vld [vmem:[#allocation43_spill] sm:$0xff]  ;;  %v9272_v37 = vld [vmem:[#allocation49_spill] sm:$0xff]  ;;  %v9274_v17 = vld [vmem:[#allocation54_spill] sm:$0xff] }
  0xf3   :  { %4955 = vmatprep.subr.bf16.mxu0 %v9267_v63  ;;  %2820 = vmatprep.mubr.f32.mxu0 %v9269_v57  ;;  %v9270_v0 = vld [vmem:[#allocation47_spill] sm:$0xff]  ;;  %v9273_v32 = vld [vmem:[#allocation53_spill] sm:$0xff]  ;;  %v9276_v13 = vld [vmem:[#allocation58_spill] sm:$0xff] }
  0xf4   :  { %v4380_v11 = vpack.c.bf16 %v9271_v48, %v9270_v0  ;;  %v4382_v4 = vpack.c.bf16 %v9274_v17, %v9273_v32  ;;  %v4384_v63 = vpack.c.bf16 %v9277_v45, %v9276_v13  ;;  %v9278_v30 = vld [vmem:[#allocation61_spill] sm:$0xff]  ;;  %v9279_v57 = vld [vmem:[#allocation68_spill] sm:$0xff]  ;;  %v9334_v13 = vld [vmem:[#allocation35_spill] sm:$0xff] }
  0xf5   :  { %4377 = vmatpush1.bf16.msra.mxu1 %v4376_v35  ;;  %v9280_v35 = vld [vmem:[#allocation73_spill] sm:$0xff]  ;;  %v9357_v8 = vld [vmem:[#allocation64_spill] sm:$0xff] }
  0xf6   :  { %4379 = vmatprep.subr.bf16.mxu1 %v4378_v43  ;;  %4957 = vmatpush1.bf16.msra.mxu0 %v9272_v37  ;;  %v9281_v43 = vld [vmem:[#allocation80_spill] sm:$0xff]  ;;  %v9282_v37 = vld [vmem:[#allocation85_spill] sm:$0xff] }
  0xf7   :  { %4959 = vmatprep.subr.bf16.mxu0 %v9275_v23  ;;  %v9283_v23 = vld [vmem:[#allocation92_spill] sm:$0xff] }
  0xf9   :  { %4381 = vmatpush1.bf16.msra.mxu1 %v4380_v11  ;;  %v9284_v11 = vld [vmem:[#allocation97_spill] sm:$0xff] }
  0xfa   :  { %4383 = vmatprep.subr.bf16.mxu1 %v4382_v4  ;;  %4961 = vmatpush1.bf16.msra.mxu0 %v9278_v30  ;;  %v9285_v4 = vld [vmem:[#allocation104_spill] sm:$0xff] }
  0xfb   :  { %4963 = vmatprep.subr.bf16.mxu0 %v9279_v57 }
  0xfd   :  { %4385 = vmatpush1.bf16.msra.mxu1 %v4384_v63  ;;  %v9286_v63 = vld [vmem:[#allocation109_spill] sm:$0xff] }
  0xfe   :  { %4387 = vmatprep.subr.bf16.mxu1 %v4386_v12  ;;  %4965 = vmatpush1.bf16.msra.mxu0 %v9280_v35  ;;  %v9287_v12 = vld [vmem:[#allocation116_spill] sm:$0xff] }
  0xff   :  { %4967 = vmatprep.subr.bf16.mxu0 %v9281_v43 }
 0x101   :  { %4389 = vmatpush1.bf16.msra.mxu1 %v4388_v51  ;;  %v9288_v51 = vld [vmem:[#allocation121_spill] sm:$0xff] }
 0x102   :  { %4391 = vmatprep.subr.bf16.mxu1 %v4390_v39  ;;  %4969 = vmatpush1.bf16.msra.mxu0 %v9282_v37  ;;  %v9289_v39 = vld [vmem:[#allocation128_spill] sm:$0xff]  ;;  %v9314_v37 = vld [vmem:[#allocation206_spill] sm:$0xff] }
 0x103   :  { %4971 = vmatprep.subr.bf16.mxu0 %v9283_v23  ;;  %v6751_v23 = vld [vmem:[#allocation8 + $0x448] sm:$0xff] }
 0x104   :  { %v2844_v30 = vand.u32 4294901760, %v6751_v23 }
 0x105   :  { %4393 = vmatpush1.bf16.msra.mxu1 %v4392_v60  ;;  %v9290_v60 = vld [vmem:[#allocation133_spill] sm:$0xff] }
 0x106   :  { %4395 = vmatprep.subr.bf16.mxu1 %v4394_v56  ;;  %4973 = vmatpush1.bf16.msra.mxu0 %v9284_v11  ;;  %v9291_v56 = vld [vmem:[#allocation140_spill] sm:$0xff] }
 0x107   :  { %4975 = vmatprep.subr.bf16.mxu0 %v9285_v4  ;;  %v6744_v4 = vld [vmem:[#allocation8 + $0x420] sm:$0xff] }
 0x108   :  { %v2838_v35 = vand.u32 4294901760, %v6744_v4 }
 0x109   :  { %4397 = vmatpush1.bf16.msra.mxu1 %v4396_v49  ;;  %v9292_v49 = vld [vmem:[#allocation145_spill] sm:$0xff] }
 0x10a   :  { %4399 = vmatprep.subr.bf16.mxu1 %v4398_v19  ;;  %4977 = vmatpush1.bf16.msra.mxu0 %v9286_v63  ;;  %v9293_v19 = vld [vmem:[#allocation152_spill] sm:$0xff]  ;;  %v65_v63 = vld [vmem:[#allocation3 + $0x28] sm:$0xff] }
 0x10b   :  { %4979 = vmatprep.subr.bf16.mxu0 %v9287_v12 }
 0x10d   :  { %4401 = vmatpush1.bf16.msra.mxu1 %v4400_v10  ;;  %v9295_v10 = vld [vmem:[#allocation164_spill] sm:$0xff] }
 0x10e   :  { %4403 = vmatprep.subr.bf16.mxu1 %v4402_v7  ;;  %4981 = vmatpush1.bf16.msra.mxu0 %v9288_v51  ;;  %v9294_v7 = vld [vmem:[#allocation157_spill] sm:$0xff] }
 0x10f   :  { %4983 = vmatprep.subr.bf16.mxu0 %v9289_v39  ;;  %v6696_v39 = vand.u32 4294901760, %v65_v63 }
 0x111   :  { %4405 = vmatpush1.bf16.msra.mxu1 %v4404_v40  ;;  %9296 = vst [vmem:[#allocation18_spill] sm:$0xff] %v6696_v39  ;;  %v9298_v40 = vld [vmem:[#allocation176_spill] sm:$0xff] }
 0x112   :  { %4407 = vmatprep.subr.bf16.mxu1 %v4406_v9  ;;  %4985 = vmatpush1.bf16.msra.mxu0 %v9290_v60  ;;  %v9297_v9 = vld [vmem:[#allocation169_spill] sm:$0xff] }
 0x113   :  { %4987 = vmatprep.subr.bf16.mxu0 %v9291_v56  ;;  %v9307_v56 = vld [vmem:[#allocation201_spill] sm:$0xff] }
 0x115   :  { %4409 = vmatpush1.bf16.msra.mxu1 %v4408_v14  ;;  %v6701_v14 = vsub.f32 %v65_v63, %v6696_v39  ;;  %v229_v39 = vld [vmem:[#allocation8 + $0x518] sm:$0xff] }
 0x116   :  { %4411 = vmatprep.subr.bf16.mxu1 %v4410_v42  ;;  %4989 = vmatpush1.bf16.msra.mxu0 %v9292_v49  ;;  %v6703_v42 = vld [vmem:[#allocation8 + $0x408] sm:$0xff] }
 0x117   :  { %4991 = vmatprep.subr.bf16.mxu0 %v9293_v19  ;;  %9299 = vst [vmem:[#allocation209_spill] sm:$0xff] %v6701_v14  ;;  %v6705_v19 = vld [vmem:[#allocation8 + $0x418] sm:$0xff]  ;;  %v6722_v49 = vld [vmem:[#allocation8 + $0x428] sm:$0xff] }
 0x118   :  { %v9309_v60 = vand.u32 4294901760, %v6705_v19  ;;  %v9329_v21 = vand.u32 4294901760, %v6705_v19 }
 0x119   :  { %4413 = vmatpush1.bf16.msra.mxu1 %v4412_v53  ;;  %v9301_v53 = vpack.c.bf16 %v9262_v5, %v9261_v38  ;;  %v206_v5 = vld [vmem:[#allocation8 + $0x460] sm:$0xff]  ;;  %v208_v38 = vld [vmem:[#allocation8 + $0x470] sm:$0xff] }
 0x11a   :  { %4415 = vmatprep.subr.bf16.mxu1 %v4414_v20  ;;  %4993 = vmatpush1.bf16.msra.mxu0 %v9294_v7  ;;  %v9300_v20 = vpack.c.bf16 %v9225_v34, %v9260_v22  ;;  %v9308_v7 = vand.u32 4294901760, %v6703_v42  ;;  %v2854_v34 = vand.u32 4294901760, %v206_v5  ;;  %v2858_v22 = vand.u32 4294901760, %v208_v38 }
 0x11b   :  { %4995 = vmatprep.subr.bf16.mxu0 %v9295_v10  ;;  %v6719_v10 = vld [vmem:[#allocation8 + $0x410] sm:$0xff]  ;;  %v6804_v15 = vsub.f32 %v6705_v19, %v9329_v21  ;;  %v2862_v19 = vand.u32 4294901760, %v210_v47 }
 0x11c   :  { %v6740_v51 = vpack.c.bf16 %v9309_v60, %v9308_v7  ;;  %v9312_v60 = vpack.c.bf16 %v6080_v3, %v6078_v31  ;;  %v9313_v7 = vpack.c.bf16 %v9241_v54, %v9240_v62  ;;  %v204_v3 = vld [vmem:[#allocation8 + $0x450] sm:$0xff]  ;;  %v209_v62 = vld [vmem:[#allocation8 + $0x478] sm:$0xff]  ;;  %v9318_v31 = vld [vmem:[#allocation17_spill] sm:$0xff]  ;;  %v6821_v21 = vpack.c.bf16 %v2858_v22, %v2854_v34 }
 0x11d   :  { %4417 = vmatpush1.bf16.msra.mxu1 %v4416_v55  ;;  %v9303_v55 = vld [vmem:[#allocation188_spill] sm:$0xff]  ;;  %9330 = vst [vmem:[#allocation224_spill] sm:$0xff] %v6804_v15 }
 0x11e   :  { %4419 = vmatprep.subr.bf16.mxu1 %v4418_v59  ;;  %4997 = vmatpush1.bf16.msra.mxu0 %v9297_v9  ;;  %v9302_v59 = vld [vmem:[#allocation181_spill] sm:$0xff]  ;;  %9310 = vst [vmem:[#allocation216_spill] sm:$0xff] %v6740_v51  ;;  %9337 = vst [vmem:[#allocation229_spill] sm:$0xff] %v6821_v21 }
 0x11f   :  { %4999 = vmatprep.subr.bf16.mxu0 %v9298_v40  ;;  %v6717_v9 = vld [vmem:[#allocation8 + $0x400] sm:$0xff] }
 0x120   :  { %v9306_v40 = vld [vmem:[#allocation193_spill] sm:$0xff]  ;;  %v2830_v63 = vand.u32 4294901760, %v6717_v9 }
 0x121   :  { %4421 = vmatpush1.bf16.msra.mxu1 %v9300_v20  ;;  %v6724_v20 = vld [vmem:[#allocation8 + $0x438] sm:$0xff] }
 0x122   :  { %4423 = vmatprep.subr.bf16.mxu1 %v9301_v53  ;;  %5001 = vmatpush1.bf16.msra.mxu0 %v9302_v59  ;;  %v9304_v53 = vpack.c.bf16 %v9233_v6, %v9263_v33  ;;  %v2834_v59 = vand.u32 4294901760, %v6719_v10  ;;  %v2840_v12 = vand.u32 4294901760, %v6724_v20  ;;  %v2856_v33 = vand.u32 4294901760, %v209_v62 }
 0x123   :  { %5003 = vmatprep.subr.bf16.mxu0 %v9303_v55  ;;  %v9305_v55 = vpack.c.bf16 %v9238_v50, %v9237_v44  ;;  %v2850_v44 = vand.u32 4294901760, %v204_v3 }
 0x124   :  { %v6762_v43 = vpack.c.bf16 %v2834_v59, %v2830_v63  ;;  %v6810_v24 = vsub.f32 %v6719_v10, %v2834_v59  ;;  %v6845_v48 = vsub.f32 %v209_v62, %v2856_v33 }
 0x125   :  { %4425 = vmatpush1.bf16.msra.mxu1 %v9304_v53  ;;  %v2836_v53 = vand.u32 4294901760, %v6722_v49  ;;  %v6841_v17 = vsub.f32 %v204_v3, %v2850_v44  ;;  %v223_v3 = vld [vmem:[#allocation8 + $0x4e8] sm:$0xff] }
 0x126   :  { %4427 = vmatprep.subr.bf16.mxu1 %v9305_v55  ;;  %5005 = vmatpush1.bf16.msra.mxu0 %v9306_v40  ;;  %v6746_v55 = vld [vmem:[#allocation8 + $0x430] sm:$0xff]  ;;  %v9311_v40 = vand.u32 4294901760, %v6701_v14  ;;  %9315 = vst [vmem:[#allocation217_spill] sm:$0xff] %v6762_v43  ;;  %9332 = vst [vmem:[#allocation226_spill] sm:$0xff] %v6810_v24 }
 0x127   :  { %5007 = vmatprep.subr.bf16.mxu0 %v9307_v56  ;;  %v6753_v56 = vld [vmem:[#allocation8 + $0x458] sm:$0xff]  ;;  %v6767_v57 = vpack.c.bf16 %v2840_v12, %v2836_v53  ;;  %v6813_v45 = vsub.f32 %v6722_v49, %v2836_v53  ;;  %v214_v53 = vld [vmem:[#allocation8 + $0x4a0] sm:$0xff]  ;;  %9343 = vst [vmem:[#allocation234_spill] sm:$0xff] %v6841_v17  ;;  %9345 = vst [vmem:[#allocation236_spill] sm:$0xff] %v6845_v48 }
 0x128   :  { %v2959_v11 = vsub.f32 %v6701_v14, %v9311_v40  ;;  %v2842_v40 = vand.u32 4294901760, %v6746_v55  ;;  %v202_v14 = vld [vmem:[#allocation8 + $0x440] sm:$0xff] }
 0x129   :  { %4429 = vmatpush1.bf16.msra.mxu1 %v9312_v60  ;;  %9316 = vst [vmem:[#allocation218_spill] sm:$0xff] %v6767_v57  ;;  %v2848_v60 = vand.u32 4294901760, %v6753_v56  ;;  %v2846_v50 = vand.u32 4294901760, %v202_v14  ;;  %9333 = vst [vmem:[#allocation227_spill] sm:$0xff] %v6813_v45 }
 0x12a   :  { %4431 = vmatprep.subr.bf16.mxu1 %v9313_v7  ;;  %5009 = vmatpush1.bf16.msra.mxu0 %v9314_v37  ;;  %v2960_v54 = vand.u32 4294901760, %v2959_v11  ;;  %v207_v7 = vld [vmem:[#allocation8 + $0x468] sm:$0xff]  ;;  %v9317_v37 = vpack.c.bf16 %v6111_v2, %v6109_v28  ;;  %v6783_v2 = vld [vmem:[#allocation8 + $0x498] sm:$0xff] }
 0x12b   :  { %5011 = vmatprep.subr.bf16.mxu0 %v6740_v51  ;;  %v6777_v51 = vpack.c.bf16 %v2842_v40, %v2838_v35  ;;  %v6780_v6 = vpack.c.bf16 %v2848_v60, %v2844_v30  ;;  %v2852_v11 = vand.u32 4294901760, %v207_v7  ;;  %v9324_v28 = vld [vmem:[#allocation29_spill] sm:$0xff]  ;;  %v2864_v29 = vand.u32 4294901760, %v6783_v2 }
 0x12d   :  { %4433 = vmatpush1.bf16.msra.mxu1 %v9317_v37  ;;  %2822 = vmatmul.mubr.f32.vlgmr.msra.gmra.mrb[0].mxu0 %v6158_v18  ;;  %9319 = vst [vmem:[#allocation219_spill] sm:$0xff] %v6777_v51  ;;  %9320 = vst [vmem:[#allocation220_spill] sm:$0xff] %v6780_v6  ;;  %v9321_v37 = vld [vmem:[#allocation213_spill] sm:$0xff]  ;;  %v6843_v32 = vsub.f32 %v207_v7, %v2852_v11 }
 0x12e   :  { %4435 = vmatprep.subr.bf16.mxu1 %v9318_v31  ;;  %5013 = vmatpush1.bf16.msra.mxu0 %v6762_v43  ;;  %v211_v18 = vld [vmem:[#allocation8 + $0x488] sm:$0xff]  ;;  %v9323_v43 = vand.u32 4294901760, %v9268_v26  ;;  %v9327_v26 = vand.u32 4294901760, %v6703_v42  ;;  %v222_v7 = vld [vmem:[#allocation8 + $0x4e0] sm:$0xff] }
 0x12f   :  { %5015 = vmatprep.subr.bf16.mxu0 %v6767_v57  ;;  %2961 = vmatprep.mubr.f32.mxu0 %v2960_v54  ;;  %v9322_v31 = vld [vmem:[#allocation22_spill] sm:$0xff]  ;;  %v6790_v57 = vpack.c.bf16 %v2850_v44, %v2846_v50  ;;  %v6793_v54 = vpack.c.bf16 %v2856_v33, %v2852_v11  ;;  %v2860_v58 = vand.u32 4294901760, %v211_v18  ;;  %9344 = vst [vmem:[#allocation235_spill] sm:$0xff] %v6843_v32  ;;  %v225_v44 = vld [vmem:[#allocation8 + $0x4f8] sm:$0xff] }
 0x130   :  { %995 = vmatmul.mubr.f32.vlgmr.msra.gmra.mrb[0].mxu1 %v9321_v37  ;;  %v224_v11 = vld [vmem:[#allocation8 + $0x4f0] sm:$0xff]  ;;  %v227_v37 = vld [vmem:[#allocation8 + $0x508] sm:$0xff] }
 0x131   :  { %4437 = vmatpush1.bf16.msra.mxu1 %v9322_v31  ;;  %1132 = vmatprep.mubr.f32.mxu1 %v9323_v43  ;;  %9325 = vst [vmem:[#allocation221_spill] sm:$0xff] %v6790_v57  ;;  %9326 = vst [vmem:[#allocation222_spill] sm:$0xff] %v6793_v54  ;;  %v212_v31 = vld [vmem:[#allocation8 + $0x490] sm:$0xff]  ;;  %v6799_v43 = vsub.f32 %v6703_v42, %v9327_v26  ;;  %v6817_v42 = vsub.f32 %v6724_v20, %v2840_v12  ;;  %v9336_v26 = vld [vmem:[#allocation40_spill] sm:$0xff] }
 0x132   :  { %4439 = vmatprep.subr.bf16.mxu1 %v9324_v28  ;;  %5017 = vmatpush1.bf16.msra.mxu0 %v6777_v51  ;;  %v215_v28 = vld [vmem:[#allocation8 + $0x4a8] sm:$0xff]  ;;  %v217_v51 = vld [vmem:[#allocation8 + $0x4b8] sm:$0xff]  ;;  %v6827_v49 = vpack.c.bf16 %v2864_v29, %v2860_v58  ;;  %v216_v12 = vld [vmem:[#allocation8 + $0x4b0] sm:$0xff]  ;;  %v6830_v20 = vsub.f32 %v6746_v55, %v2842_v40  ;;  %v6847_v55 = vsub.f32 %v206_v5, %v2854_v34 }
 0x133   :  { %5019 = vmatprep.subr.bf16.mxu0 %v6780_v6  ;;  %9328 = vst [vmem:[#allocation223_spill] sm:$0xff] %v6799_v43  ;;  %v6807_v6 = vsub.f32 %v6717_v9, %v2830_v63  ;;  %9335 = vst [vmem:[#allocation228_spill] sm:$0xff] %v6817_v42  ;;  %v2866_v9 = vand.u32 4294901760, %v212_v31  ;;  %v6824_v63 = vsub.f32 %v6744_v4, %v2838_v35  ;;  %v2868_v10 = vand.u32 4294901760, %v215_v28  ;;  %v219_v35 = vld [vmem:[#allocation8 + $0x4c8] sm:$0xff]  ;;  %v221_v4 = vld [vmem:[#allocation8 + $0x4d8] sm:$0xff] }
 0x134   :  { %9338 = vst [vmem:[#allocation230_spill] sm:$0xff] %v6827_v49  ;;  %v2872_v59 = vand.u32 4294901760, %v217_v51  ;;  %9346 = vst [vmem:[#allocation237_spill] sm:$0xff] %v6847_v55  ;;  %v218_v40 = vld [vmem:[#allocation8 + $0x4c0] sm:$0xff]  ;;  %v6856_v33 = vsub.f32 %v211_v18, %v2860_v58  ;;  %v2876_v34 = vand.u32 4294901760, %v219_v35  ;;  %v2880_v62 = vand.u32 4294901760, %v221_v4 }
 0x135   :  { %9331 = vst [vmem:[#allocation225_spill] sm:$0xff] %v6807_v6  ;;  %4441 = vmatpush1.bf16.msra.mxu1 %v9334_v13  ;;  %v6838_v13 = vsub.f32 %v202_v14, %v2846_v50  ;;  %v6851_v50 = vsub.f32 %v208_v38, %v2858_v22  ;;  %v2870_v14 = vand.u32 4294901760, %v214_v53  ;;  %v6863_v22 = vsub.f32 %v210_v47, %v2862_v19 }
 0x136   :  { %4443 = vmatprep.subr.bf16.mxu1 %v9336_v26  ;;  %5021 = vmatpush1.bf16.msra.mxu0 %v6790_v57  ;;  %v6833_v57 = vsub.f32 %v6751_v23, %v2844_v30  ;;  %v6836_v26 = vsub.f32 %v6753_v56, %v2848_v60  ;;  %v220_v30 = vld [vmem:[#allocation8 + $0x4d0] sm:$0xff]  ;;  %v9347_v23 = vld [vmem:[#allocation52_spill] sm:$0xff]  ;;  %v6853_v56 = vpack.c.bf16 %v2866_v9, %v2862_v19  ;;  %v2874_v60 = vand.u32 4294901760, %v216_v12 }
 0x137   :  { %5023 = vmatprep.subr.bf16.mxu0 %v6793_v54  ;;  %9341 = vst [vmem:[#allocation233_spill] sm:$0xff] %v6838_v13  ;;  %v9342_v54 = vld [vmem:[#allocation46_spill] sm:$0xff]  ;;  %9348 = vst [vmem:[#allocation238_spill] sm:$0xff] %v6851_v50  ;;  %v6858_v5 = vpack.c.bf16 %v2872_v59, %v2868_v10  ;;  %v2878_v38 = vand.u32 4294901760, %v218_v40  ;;  %v6866_v0 = vsub.f32 %v212_v31, %v2866_v9  ;;  %v2884_v18 = vand.u32 4294901760, %v223_v3 }
 0x138   :  { %9339 = vst [vmem:[#allocation231_spill] sm:$0xff] %v6833_v57  ;;  %9340 = vst [vmem:[#allocation232_spill] sm:$0xff] %v6836_v26  ;;  %v2888_v58 = vand.u32 4294901760, %v225_v44  ;;  %v6874_v47 = vpack.c.bf16 %v2874_v60, %v2870_v14  ;;  %v2890_v19 = vand.u32 4294901760, %v224_v11  ;;  %v6877_v31 = vsub.f32 %v214_v53, %v2870_v14 }
 0x139   :  { %4445 = vmatpush1.bf16.msra.mxu1 %v9342_v54  ;;  %9349 = vst [vmem:[#allocation239_spill] sm:$0xff] %v6853_v56  ;;  %9350 = vst [vmem:[#allocation240_spill] sm:$0xff] %v6856_v33  ;;  %v9354_v54 = vld [vmem:[#allocation59_spill] sm:$0xff]  ;;  %v6881_v9 = vpack.c.bf16 %v2880_v62, %v2876_v34  ;;  %v6885_v36 = vsub.f32 %v221_v4, %v2880_v62  ;;  %v6890_v53 = vsub.f32 %v218_v40, %v2878_v38  ;;  %v9371_v4 = vld [vmem:[#allocation76_spill] sm:$0xff] }
 0x13a   :  { %4447 = vmatprep.subr.bf16.mxu1 %v9347_v23  ;;  %5025 = vmatpush1.bf16.msra.mxu0 %v6821_v21  ;;  %9351 = vst [vmem:[#allocation241_spill] sm:$0xff] %v6858_v5  ;;  %v6861_v21 = vsub.f32 %v6783_v2, %v2864_v29  ;;  %9353 = vst [vmem:[#allocation243_spill] sm:$0xff] %v6863_v22  ;;  %v2882_v23 = vand.u32 4294901760, %v220_v30  ;;  %v6872_v2 = vsub.f32 %v217_v51, %v2872_v59  ;;  %v235_v40 = vld [vmem:[#allocation8 + $0x548] sm:$0xff] }
 0x13b   :  { %5027 = vmatprep.subr.bf16.mxu0 %v6827_v49  ;;  %9355 = vst [vmem:[#allocation244_spill] sm:$0xff] %v6866_v0  ;;  %v6868_v49 = vsub.f32 %v215_v28, %v2868_v10  ;;  %9359 = vst [vmem:[#allocation247_spill] sm:$0xff] %v6874_v47  ;;  %v2886_v29 = vand.u32 4294901760, %v222_v7  ;;  %v6879_v28 = vsub.f32 %v216_v12, %v2874_v60  ;;  %v2892_v59 = vand.u32 4294901760, %v227_v37  ;;  %v230_v60 = vld [vmem:[#allocation8 + $0x520] sm:$0xff] }
 0x13c   :  { %9352 = vst [vmem:[#allocation242_spill] sm:$0xff] %v6861_v21  ;;  %9358 = vst [vmem:[#allocation246_spill] sm:$0xff] %v6872_v2  ;;  %v6883_v10 = vsub.f32 %v219_v35, %v2876_v34  ;;  %v6887_v51 = vpack.c.bf16 %v2882_v23, %v2878_v38  ;;  %v6892_v12 = vsub.f32 %v220_v30, %v2882_v23  ;;  %v232_v34 = vld [vmem:[#allocation8 + $0x530] sm:$0xff]  ;;  %v237_v38 = vld [vmem:[#allocation8 + $0x558] sm:$0xff] }
 0x13d   :  { %4449 = vmatpush1.bf16.msra.mxu1 %v9354_v54  ;;  %9356 = vst [vmem:[#allocation245_spill] sm:$0xff] %v6868_v49  ;;  %9360 = vst [vmem:[#allocation248_spill] sm:$0xff] %v6877_v31  ;;  %v226_v54 = vld [vmem:[#allocation8 + $0x500] sm:$0xff]  ;;  %v6894_v14 = vpack.c.bf16 %v2888_v58, %v2884_v18  ;;  %v6896_v35 = vsub.f32 %v223_v3, %v2884_v18  ;;  %v6900_v62 = vsub.f32 %v225_v44, %v2888_v58  ;;  %v9462_v2 = vld [vmem:[#allocation166_spill] sm:$0xff] }
 0x13e   :  { %4451 = vmatprep.subr.bf16.mxu1 %v9357_v8  ;;  %5029 = vmatpush1.bf16.msra.mxu0 %v6853_v56  ;;  %9361 = vst [vmem:[#allocation249_spill] sm:$0xff] %v6879_v28  ;;  %9362 = vst [vmem:[#allocation250_spill] sm:$0xff] %v6881_v9  ;;  %v228_v8 = vld [vmem:[#allocation8 + $0x510] sm:$0xff]  ;;  %v2896_v56 = vand.u32 4294901760, %v229_v39  ;;  %v2894_v41 = vand.u32 4294901760, %v226_v54  ;;  %v6905_v30 = vsub.f32 %v222_v7, %v2886_v29  ;;  %v2900_v3 = vand.u32 4294901760, %v231_v61 }
 0x13f   :  { %5031 = vmatprep.subr.bf16.mxu0 %v6858_v5  ;;  %9363 = vst [vmem:[#allocation251_spill] sm:$0xff] %v6883_v10  ;;  %9364 = vst [vmem:[#allocation252_spill] sm:$0xff] %v6885_v36  ;;  %v6902_v5 = vpack.c.bf16 %v2890_v19, %v2886_v29  ;;  %v6907_v23 = vsub.f32 %v224_v11, %v2890_v19  ;;  %v2904_v18 = vand.u32 4294901760, %v233_v52  ;;  %v2902_v58 = vand.u32 4294901760, %v230_v60  ;;  %v239_v11 = vld [vmem:[#allocation8 + $0x568] sm:$0xff]  ;;  %v241_v19 = vld [vmem:[#allocation8 + $0x578] sm:$0xff] }
 0x140   :  { %9365 = vst [vmem:[#allocation253_spill] sm:$0xff] %v6887_v51  ;;  %9367 = vst [vmem:[#allocation254_spill] sm:$0xff] %v6890_v53  ;;  %v6909_v25 = vpack.c.bf16 %v2896_v56, %v2892_v59  ;;  %v6911_v44 = vsub.f32 %v227_v37, %v2892_v59  ;;  %v2908_v7 = vand.u32 4294901760, %v235_v40  ;;  %v2912_v29 = vand.u32 4294901760, %v237_v38  ;;  %v244_v53 = vld [vmem:[#allocation8 + $0x590] sm:$0xff] }
 0x141   :  { %4453 = vmatpush1.bf16.msra.mxu1 %v9366_v46  ;;  %9368 = vst [vmem:[#allocation255_spill] sm:$0xff] %v6892_v12  ;;  %9369 = vst [vmem:[#allocation256_spill] sm:$0xff] %v6894_v14  ;;  %v2898_v46 = vand.u32 4294901760, %v228_v8  ;;  %v6916_v12 = vsub.f32 %v226_v54, %v2894_v41  ;;  %v2910_v59 = vand.u32 4294901760, %v234_v27  ;;  %v6927_v54 = vsub.f32 %v231_v61, %v2900_v3  ;;  %v9390_v36 = vld [vmem:[#allocation94_spill] sm:$0xff] }
 0x142   :  { %9370 = vst [vmem:[#allocation257_spill] sm:$0xff] %v6896_v35  ;;  %4455 = vmatprep.subr.bf16.mxu1 %v9371_v4  ;;  %5033 = vmatpush1.bf16.msra.mxu0 %v6874_v47  ;;  %9372 = vst [vmem:[#allocation258_spill] sm:$0xff] %v6900_v62  ;;  %v236_v4 = vld [vmem:[#allocation8 + $0x550] sm:$0xff]  ;;  %v2906_v47 = vand.u32 4294901760, %v232_v34  ;;  %v6914_v35 = vsub.f32 %v229_v39, %v2896_v56  ;;  %v6925_v39 = vpack.c.bf16 %v2904_v18, %v2900_v3 }
 0x143   :  { %9373 = vst [vmem:[#allocation259_spill] sm:$0xff] %v6902_v5  ;;  %5035 = vmatprep.subr.bf16.mxu0 %v6881_v9  ;;  %9374 = vst [vmem:[#allocation260_spill] sm:$0xff] %v6905_v30  ;;  %v9378_v62 = vld [vmem:[#allocation82_spill] sm:$0xff]  ;;  %v9381_v9 = vld [vmem:[#allocation88_spill] sm:$0xff]  ;;  %v6922_v37 = vsub.f32 %v228_v8, %v2898_v46  ;;  %v6929_v56 = vsub.f32 %v233_v52, %v2904_v18  ;;  %v2916_v8 = vand.u32 4294901760, %v239_v11 }
 0x144   :  { %9375 = vst [vmem:[#allocation261_spill] sm:$0xff] %v6907_v23  ;;  %9376 = vst [vmem:[#allocation262_spill] sm:$0xff] %v6909_v25  ;;  %v6920_v23 = vpack.c.bf16 %v2898_v46, %v2894_v41  ;;  %v238_v30 = vld [vmem:[#allocation8 + $0x560] sm:$0xff]  ;;  %v6933_v41 = vpack.c.bf16 %v2906_v47, %v2902_v58  ;;  %v6935_v46 = vsub.f32 %v232_v34, %v2906_v47  ;;  %v249_v18 = vld [vmem:[#allocation8 + $0x5b8] sm:$0xff] }
 0x145   :  { %9377 = vst [vmem:[#allocation263_spill] sm:$0xff] %v6911_v44  ;;  %4457 = vmatpush1.bf16.msra.mxu1 %v9378_v62  ;;  %9379 = vst [vmem:[#allocation264_spill] sm:$0xff] %v6914_v35  ;;  %v2914_v44 = vand.u32 4294901760, %v236_v4  ;;  %v240_v62 = vld [vmem:[#allocation8 + $0x570] sm:$0xff]  ;;  %v242_v35 = vld [vmem:[#allocation8 + $0x580] sm:$0xff]  ;;  %v6940_v61 = vsub.f32 %v235_v40, %v2908_v7  ;;  %v2918_v52 = vand.u32 4294901760, %v238_v30  ;;  %v6944_v47 = vsub.f32 %v237_v38, %v2912_v29 }
 0x146   :  { %9380 = vst [vmem:[#allocation265_spill] sm:$0xff] %v6916_v12  ;;  %4459 = vmatprep.subr.bf16.mxu1 %v9381_v9  ;;  %5037 = vmatpush1.bf16.msra.mxu0 %v6887_v51  ;;  %9382 = vst [vmem:[#allocation266_spill] sm:$0xff] %v6920_v23  ;;  %v6931_v12 = vsub.f32 %v230_v60, %v2902_v58  ;;  %v243_v9 = vld [vmem:[#allocation8 + $0x588] sm:$0xff]  ;;  %v245_v51 = vld [vmem:[#allocation8 + $0x598] sm:$0xff]  ;;  %v2922_v3 = vand.u32 4294901760, %v240_v62 }
 0x147   :  { %9383 = vst [vmem:[#allocation267_spill] sm:$0xff] %v6922_v37  ;;  %5039 = vmatprep.subr.bf16.mxu0 %v6894_v14  ;;  %9384 = vst [vmem:[#allocation268_spill] sm:$0xff] %v6925_v39  ;;  %v2920_v37 = vand.u32 4294901760, %v241_v19  ;;  %v6938_v14 = vpack.c.bf16 %v2912_v29, %v2908_v7  ;;  %v247_v60 = vld [vmem:[#allocation8 + $0x5a8] sm:$0xff]  ;;  %v6946_v34 = vpack.c.bf16 %v2914_v44, %v2910_v59  ;;  %v2924_v58 = vand.u32 4294901760, %v243_v9 }
 0x148   :  { %9385 = vst [vmem:[#allocation269_spill] sm:$0xff] %v6927_v54  ;;  %9386 = vst [vmem:[#allocation270_spill] sm:$0xff] %v6929_v56  ;;  %v6951_v40 = vsub.f32 %v236_v4, %v2914_v44  ;;  %v2926_v7 = vand.u32 4294901760, %v242_v35  ;;  %v246_v56 = vld [vmem:[#allocation8 + $0x5a0] sm:$0xff]  ;;  %v248_v54 = vld [vmem:[#allocation8 + $0x5b0] sm:$0xff]  ;;  %v2932_v38 = vand.u32 4294901760, %v247_v60  ;;  %v6962_v4 = vsub.f32 %v238_v30, %v2918_v52 }
 0x149   :  { %9387 = vst [vmem:[#allocation271_spill] sm:$0xff] %v6931_v12  ;;  %9388 = vst [vmem:[#allocation272_spill] sm:$0xff] %v6933_v41  ;;  %4461 = vmatpush1.bf16.msra.mxu1 %v9390_v36  ;;  %v9393_v12 = vld [vmem:[#allocation100_spill] sm:$0xff]  ;;  %v6949_v36 = vsub.f32 %v234_v27, %v2910_v59  ;;  %v6953_v10 = vpack.c.bf16 %v2920_v37, %v2916_v8  ;;  %v2936_v29 = vand.u32 4294901760, %v249_v18  ;;  %v9400_v28 = vld [vmem:[#allocation106_spill] sm:$0xff] }
 0x14a   :  { %9389 = vst [vmem:[#allocation273_spill] sm:$0xff] %v6935_v46  ;;  %9391 = vst [vmem:[#allocation274_spill] sm:$0xff] %v6938_v14  ;;  %4463 = vmatprep.subr.bf16.mxu1 %v9393_v12  ;;  %5041 = vmatpush1.bf16.msra.mxu0 %v6902_v5  ;;  %v2928_v46 = vand.u32 4294901760, %v245_v51  ;;  %v6955_v12 = vsub.f32 %v239_v11, %v2916_v8  ;;  %v251_v5 = vld [vmem:[#allocation8 + $0x5c8] sm:$0xff]  ;;  %v6958_v31 = vsub.f32 %v241_v19, %v2920_v37  ;;  %v9405_v59 = vld [vmem:[#allocation112_spill] sm:$0xff] }
 0x14b   :  { %9392 = vst [vmem:[#allocation275_spill] sm:$0xff] %v6940_v61  ;;  %9394 = vst [vmem:[#allocation276_spill] sm:$0xff] %v6944_v47  ;;  %5043 = vmatprep.subr.bf16.mxu0 %v6909_v25  ;;  %v2930_v61 = vand.u32 4294901760, %v244_v53  ;;  %v253_v47 = vld [vmem:[#allocation8 + $0x5d8] sm:$0xff]  ;;  %v6960_v27 = vpack.c.bf16 %v2922_v3, %v2918_v52  ;;  %v6964_v44 = vsub.f32 %v240_v62, %v2922_v3  ;;  %v2934_v25 = vand.u32 4294901760, %v246_v56  ;;  %v255_v52 = vld [vmem:[#allocation8 + $0x5e8] sm:$0xff] }
 0x14c   :  { %9395 = vst [vmem:[#allocation277_spill] sm:$0xff] %v6946_v34  ;;  %9396 = vst [vmem:[#allocation278_spill] sm:$0xff] %v6949_v36  ;;  %v6968_v11 = vpack.c.bf16 %v2928_v46, %v2924_v58  ;;  %v6970_v8 = vsub.f32 %v243_v9, %v2924_v58  ;;  %v6973_v19 = vsub.f32 %v245_v51, %v2928_v46  ;;  %v2940_v62 = vand.u32 4294901760, %v251_v5  ;;  %v257_v58 = vld [vmem:[#allocation8 + $0x5f8] sm:$0xff] }
 0x14d   :  { %9397 = vst [vmem:[#allocation279_spill] sm:$0xff] %v6951_v40  ;;  %9398 = vst [vmem:[#allocation280_spill] sm:$0xff] %v6953_v10  ;;  %4465 = vmatpush1.bf16.msra.mxu1 %v9400_v28  ;;  %v250_v40 = vld [vmem:[#allocation8 + $0x5c0] sm:$0xff]  ;;  %v252_v28 = vld [vmem:[#allocation8 + $0x5d0] sm:$0xff]  ;;  %v6975_v30 = vpack.c.bf16 %v2930_v61, %v2926_v7  ;;  %v2944_v37 = vand.u32 4294901760, %v253_v47  ;;  %v6977_v3 = vsub.f32 %v242_v35, %v2926_v7 }
 0x14e   :  { %9399 = vst [vmem:[#allocation281_spill] sm:$0xff] %v6955_v12  ;;  %9401 = vst [vmem:[#allocation282_spill] sm:$0xff] %v6958_v31  ;;  %4467 = vmatprep.subr.bf16.mxu1 %v9405_v59  ;;  %5045 = vmatpush1.bf16.msra.mxu0 %v6920_v23  ;;  %v2938_v12 = vand.u32 4294901760, %v248_v54  ;;  %v6979_v23 = vsub.f32 %v244_v53, %v2930_v61  ;;  %v6981_v59 = vpack.c.bf16 %v2936_v29, %v2932_v38  ;;  %v256_v31 = vld [vmem:[#allocation8 + $0x5f0] sm:$0xff]  ;;  %v9416_v35 = vld [vmem:[#allocation124_spill] sm:$0xff] }
 0x14f   :  { %9402 = vst [vmem:[#allocation283_spill] sm:$0xff] %v6960_v27  ;;  %9403 = vst [vmem:[#allocation284_spill] sm:$0xff] %v6962_v4  ;;  %5047 = vmatprep.subr.bf16.mxu0 %v6925_v39  ;;  %v6983_v9 = vsub.f32 %v247_v60, %v2932_v38  ;;  %v6986_v39 = vsub.f32 %v249_v18, %v2936_v29  ;;  %v6988_v51 = vsub.f32 %v246_v56, %v2934_v25  ;;  %v254_v4 = vld [vmem:[#allocation8 + $0x5e0] sm:$0xff] }
 0x150   :  { %9404 = vst [vmem:[#allocation285_spill] sm:$0xff] %v6964_v44  ;;  %9406 = vst [vmem:[#allocation286_spill] sm:$0xff] %v6968_v11  ;;  %v9413_v44 = vld [vmem:[#allocation118_spill] sm:$0xff]  ;;  %v2942_v46 = vand.u32 4294901760, %v250_v40  ;;  %v6992_v53 = vpack.c.bf16 %v2938_v12, %v2934_v25  ;;  %v2948_v61 = vand.u32 4294901760, %v255_v52  ;;  %v6997_v18 = vsub.f32 %v248_v54, %v2938_v12  ;;  %v9426_v54 = vld [vmem:[#allocation136_spill] sm:$0xff] }
 0x151   :  { %9407 = vst [vmem:[#allocation287_spill] sm:$0xff] %v6970_v8  ;;  %9408 = vst [vmem:[#allocation288_spill] sm:$0xff] %v6973_v19  ;;  %v64_v8 = vld [vmem:[#allocation3 + $0x20] sm:$0xff]  ;;  %4469 = vmatpush1.bf16.msra.mxu1 %v9413_v44  ;;  %v2946_v19 = vand.u32 4294901760, %v252_v28  ;;  %v6999_v56 = vpack.c.bf16 %v2944_v37, %v2940_v62  ;;  %v2952_v38 = vand.u32 4294901760, %v257_v58  ;;  %v7003_v44 = vsub.f32 %v251_v5, %v2940_v62 }
 0x152   :  { %9409 = vst [vmem:[#allocation289_spill] sm:$0xff] %v6975_v30  ;;  %9410 = vst [vmem:[#allocation290_spill] sm:$0xff] %v6979_v23  ;;  %4471 = vmatprep.subr.bf16.mxu1 %v9416_v35  ;;  %5049 = vmatpush1.bf16.msra.mxu0 %v6933_v41  ;;  %v7001_v29 = vand.u32 4294901760, %v64_v8  ;;  %v2950_v35 = vand.u32 4294901760, %v254_v4  ;;  %v2954_v41 = vand.u32 4294901760, %v256_v31  ;;  %v7007_v60 = vsub.f32 %v253_v47, %v2944_v37 }
 0x153   :  { %9411 = vst [vmem:[#allocation291_spill] sm:$0xff] %v6981_v59  ;;  %9412 = vst [vmem:[#allocation292_spill] sm:$0xff] %v6983_v9  ;;  %5051 = vmatprep.subr.bf16.mxu0 %v6938_v14  ;;  %v7009_v7 = vpack.c.bf16 %v2946_v19, %v2942_v46  ;;  %v7011_v14 = vsub.f32 %v250_v40, %v2942_v46  ;;  %v7016_v5 = vsub.f32 %v252_v28, %v2946_v19 }
 0x154   :  { %9414 = vst [vmem:[#allocation293_spill] sm:$0xff] %v6986_v39  ;;  %9415 = vst [vmem:[#allocation294_spill] sm:$0xff] %v6988_v51  ;;  %v9422_v51 = vld [vmem:[#allocation130_spill] sm:$0xff]  ;;  %v9428_v62 = vand.u32 4294901760, %v6799_v43  ;;  %v9429_v47 = vand.u32 4294901760, %v6804_v15  ;;  %v7029_v40 = vpack.c.bf16 %v2952_v38, %v2948_v61  ;;  %v7031_v46 = vsub.f32 %v255_v52, %v2948_v61 }
 0x155   :  { %9417 = vst [vmem:[#allocation295_spill] sm:$0xff] %v6992_v53  ;;  %9418 = vst [vmem:[#allocation296_spill] sm:$0xff] %v6997_v18  ;;  %4473 = vmatpush1.bf16.msra.mxu1 %v9422_v51  ;;  %v7034_v12 = vsub.f32 %v64_v8, %v7001_v29  ;;  %v8798_v28 = vand.u32 4294901760, %v6813_v45  ;;  %v7037_v19 = vsub.f32 %v257_v58, %v2952_v38  ;;  %v9438_v61 = vld [vmem:[#allocation142_spill] sm:$0xff]  ;;  %v9440_v58 = vand.u32 4294901760, %v6810_v24  ;;  %v9480_v51 = vld [vmem:[#allocation28_spill] sm:$0xff] }
 0x156   :  { %9419 = vst [vmem:[#allocation297_spill] sm:$0xff] %v6999_v56  ;;  %9420 = vst [vmem:[#allocation298_spill] sm:$0xff] %v7001_v29  ;;  %4475 = vmatprep.subr.bf16.mxu1 %v9426_v54  ;;  %5053 = vmatpush1.bf16.msra.mxu0 %v6946_v34  ;;  %v7021_v25 = vsub.f32 %v6799_v43, %v9428_v62  ;;  %v7026_v37 = vsub.f32 %v6804_v15, %v9429_v47  ;;  %v9435_v34 = vand.u32 4294901760, %v5673_v16  ;;  %v9443_v16 = vld [vmem:[#allocation154_spill] sm:$0xff]  ;;  %v9459_v15 = vld [vmem:[#allocation267_spill] sm:$0xff] }
 0x157   :  { %9421 = vst [vmem:[#allocation299_spill] sm:$0xff] %v7003_v44  ;;  %9423 = vst [vmem:[#allocation300_spill] sm:$0xff] %v7007_v60  ;;  %5055 = vmatprep.subr.bf16.mxu0 %v6953_v10  ;;  %v7039_v62 = vpack.c.bf16 %v2954_v41, %v2950_v35  ;;  %v9436_v47 = vand.u32 4294901760, %v9243_v1  ;;  %v9437_v10 = vand.u32 4294901760, %v6807_v6  ;;  %v7053_v8 = vsub.f32 %v254_v4, %v2950_v35  ;;  %v9456_v35 = vld [vmem:[#allocation263_spill] sm:$0xff]  ;;  %v9470_v29 = vld [vmem:[#allocation172_spill] sm:$0xff] }
 0x158   :  { %9424 = vst [vmem:[#allocation301_spill] sm:$0xff] %v7009_v7  ;;  %9425 = vst [vmem:[#allocation302_spill] sm:$0xff] %v7011_v14  ;;  %v7058_v38 = vsub.f32 %v6810_v24, %v9440_v58  ;;  %v2989_v4 = vand.u32 4294901760, %v7026_v37  ;;  %v7076_v1 = vsub.f32 %v6813_v45, %v8798_v28  ;;  %v9448_v37 = vld [vmem:[#allocation251_spill] sm:$0xff]  ;;  %v9452_v58 = vld [vmem:[#allocation257_spill] sm:$0xff] }
 0x159   :  { %9427 = vst [vmem:[#allocation303_spill] sm:$0xff] %v7016_v5  ;;  %9430 = vst [vmem:[#allocation304_spill] sm:$0xff] %v7029_v40  ;;  %v7045_v54 = vpack.c.bf16 %v9436_v47, %v9435_v34  ;;  %v7050_v52 = vsub.f32 %v6807_v6, %v9437_v10  ;;  %4477 = vmatpush1.bf16.msra.mxu1 %v9438_v61  ;;  %v9441_v34 = vld [vmem:[#allocation148_spill] sm:$0xff]  ;;  %v7065_v10 = vsub.f32 %v256_v31, %v2954_v41  ;;  %v9468_v6 = vld [vmem:[#allocation281_spill] sm:$0xff] }
 0x15a   :  { %9431 = vst [vmem:[#allocation305_spill] sm:$0xff] %v7031_v46  ;;  %9432 = vst [vmem:[#allocation306_spill] sm:$0xff] %v7034_v12  ;;  %4479 = vmatprep.subr.bf16.mxu1 %v9441_v34  ;;  %5057 = vmatpush1.bf16.msra.mxu0 %v6960_v27  ;;  %v2977_v47 = vand.u32 4294901760, %v7021_v25  ;;  %v2995_v28 = vand.u32 4294901760, %v7058_v38  ;;  %v9444_v31 = vand.u32 4294901760, %v6817_v42  ;;  %v9445_v41 = vld [vmem:[#allocation160_spill] sm:$0xff] }
 0x15b   :  { %9433 = vst [vmem:[#allocation307_spill] sm:$0xff] %v7037_v19  ;;  %9434 = vst [vmem:[#allocation308_spill] sm:$0xff] %v7039_v62  ;;  %5059 = vmatprep.subr.bf16.mxu0 %v6968_v11  ;;  %v2983_v25 = vand.u32 4294901760, %v7050_v52  ;;  %v9466_v61 = vld [vmem:[#allocation276_spill] sm:$0xff]  ;;  %v9475_v24 = vld [vmem:[#allocation23_spill] sm:$0xff]  ;;  %v9481_v27 = vand.u32 4294901760, %v9480_v51 }
 0x15c   :  { %9439 = vst [vmem:[#allocation309_spill] sm:$0xff] %v7053_v8  ;;  %9442 = vst [vmem:[#allocation310_spill] sm:$0xff] %v7065_v10  ;;  %v7094_v11 = vsub.f32 %v6817_v42, %v9444_v31  ;;  %v9476_v45 = vand.u32 4294901760, %v9475_v24  ;;  %v9477_v43 = vld [vmem:[#allocation24_spill] sm:$0xff]  ;;  %v9479_v52 = vld [vmem:[#allocation294_spill] sm:$0xff]  ;;  %v5074_v34 = vpack.c.bf16 %v2989_v4, %v2977_v47  ;;  %v9486_v47 = vand.u32 4294901760, %v6824_v63 }
 0x15d   :  { %4481 = vmatpush1.bf16.msra.mxu1 %v9443_v16  ;;  %v9458_v16 = vld [vmem:[#allocation265_spill] sm:$0xff]  ;;  %v9478_v38 = vand.u32 4294901760, %v9477_v43  ;;  %v9482_v42 = vld [vmem:[#allocation30_spill] sm:$0xff]  ;;  %v5076_v4 = vpack.c.bf16 %v2995_v28, %v2983_v25  ;;  %v9491_v28 = vand.u32 4294901760, %v6838_v13 }
 0x15e   :  { %4483 = vmatprep.subr.bf16.mxu1 %v9445_v41  ;;  %5061 = vmatpush1.bf16.msra.mxu0 %v6975_v30  ;;  %v9463_v41 = vld [vmem:[#allocation271_spill] sm:$0xff]  ;;  %v9483_v23 = vand.u32 4294901760, %v9482_v42  ;;  %v9484_v43 = vld [vmem:[#allocation178_spill] sm:$0xff]  ;;  %v3006_v51 = vsub.f32 %v6824_v63, %v9486_v47  ;;  %v9487_v42 = vand.u32 4294901760, %v6830_v20  ;;  %v9490_v47 = vand.u32 4294901760, %v6836_v26 }
 0x15f   :  { %5063 = vmatprep.subr.bf16.mxu0 %v6981_v59  ;;  %v9465_v30 = vld [vmem:[#allocation275_spill] sm:$0xff]  ;;  %v9471_v59 = vld [vmem:[#allocation284_spill] sm:$0xff]  ;;  %v3030_v25 = vsub.f32 %v6838_v13, %v9491_v28 }
 0x161   :  { %4485 = vmatpush1.bf16.msra.mxu1 %v9462_v2  ;;  %v3013_v2 = vand.u32 4294901760, %v7094_v11  ;;  %v9494_v11 = vld [vmem:[#allocation196_spill] sm:$0xff] }
 0x162   :  { %4487 = vmatprep.subr.bf16.mxu1 %v9470_v29  ;;  %5065 = vmatpush1.bf16.msra.mxu0 %v6992_v53  ;;  %v7148_v29 = vpack.c.bf16 %v9478_v38, %v9476_v45  ;;  %v9485_v38 = vand.u32 4294901760, %v7034_v12  ;;  %v3001_v53 = vand.u32 4294901760, %v7076_v1  ;;  %v9489_v45 = vand.u32 4294901760, %v6833_v57 }
 0x163   :  { %5067 = vmatprep.subr.bf16.mxu0 %v6999_v56  ;;  %v7159_v56 = vpack.c.bf16 %v9483_v23, %v9481_v27  ;;  %v3018_v23 = vsub.f32 %v6830_v20, %v9487_v42  ;;  %v9488_v27 = vld [vmem:[#allocation184_spill] sm:$0xff]  ;;  %v3036_v42 = vsub.f32 %v6836_v26, %v9490_v47  ;;  %v9493_v47 = vld [vmem:[#allocation190_spill] sm:$0xff]  ;;  %v9539_v26 = vld [vmem:[#allocation255_spill] sm:$0xff] }
 0x164   :  { %v2965_v31 = vsub.f32 %v7034_v12, %v9485_v38  ;;  %v3024_v38 = vsub.f32 %v6833_v57, %v9489_v45  ;;  %v9492_v45 = vand.u32 4294901760, %v6841_v17  ;;  %v5078_v28 = vpack.c.bf16 %v3013_v2, %v3001_v53 }
 0x165   :  { %4489 = vmatpush1.bf16.msra.mxu1 %v9484_v43  ;;  %v3037_v12 = vand.u32 4294901760, %v3036_v42  ;;  %v3031_v2 = vand.u32 4294901760, %v3030_v25  ;;  %v9504_v25 = vand.u32 4294901760, %v6856_v33 }
 0x166   :  { %4491 = vmatprep.subr.bf16.mxu1 %v9488_v27  ;;  %5069 = vmatpush1.bf16.msra.mxu0 %v7009_v7  ;;  %v3042_v1 = vsub.f32 %v6841_v17, %v9492_v45  ;;  %v2966_v24 = vand.u32 4294901760, %v2965_v31  ;;  %v3007_v27 = vand.u32 4294901760, %v3006_v51  ;;  %v3019_v7 = vand.u32 4294901760, %v3018_v23  ;;  %v9499_v45 = vld [vmem:[#allocation203_spill] sm:$0xff] }
 0x167   :  { %5071 = vmatprep.subr.bf16.mxu0 %v7029_v40  ;;  %v3025_v13 = vand.u32 4294901760, %v3024_v38  ;;  %v9495_v40 = vand.u32 4294901760, %v6843_v32  ;;  %v9496_v51 = vand.u32 4294901760, %v6845_v48  ;;  %v9497_v38 = vand.u32 4294901760, %v6847_v55 }
 0x168   :  { %v3043_v53 = vand.u32 4294901760, %v3042_v1  ;;  %v3072_v1 = vsub.f32 %v6856_v33, %v9504_v25 }
 0x169   :  { %4493 = vmatpush1.bf16.msra.mxu1 %v9493_v47  ;;  %v3048_v31 = vsub.f32 %v6843_v32, %v9495_v40  ;;  %v3060_v23 = vsub.f32 %v6845_v48, %v9496_v51  ;;  %v3054_v57 = vsub.f32 %v6847_v55, %v9497_v38  ;;  %v9500_v40 = vld [vmem:[#allocation34_spill] sm:$0xff]  ;;  %v5080_v32 = vpack.c.bf16 %v3019_v7, %v3007_v27  ;;  %v9507_v7 = vld [vmem:[#allocation41_spill] sm:$0xff] }
 0x16a   :  { %4495 = vmatprep.subr.bf16.mxu1 %v9494_v11  ;;  %5073 = vmatpush1.bf16.msra.mxu0 %v7039_v62  ;;  %v9501_v62 = vand.u32 4294901760, %v9500_v40  ;;  %v9502_v11 = vld [vmem:[#allocation36_spill] sm:$0xff]  ;;  %v9505_v38 = vand.u32 4294901760, %v6861_v21  ;;  %v9508_v27 = vand.u32 4294901760, %v9507_v7  ;;  %v5082_v43 = vpack.c.bf16 %v3037_v12, %v3025_v13  ;;  %v9512_v55 = vld [vmem:[#allocation213_spill] sm:$0xff] }
 0x16b   :  { %5075 = vmatprep.subr.bf16.mxu0 %v5074_v34  ;;  %v9498_v34 = vand.u32 4294901760, %v6851_v50  ;;  %v9503_v51 = vand.u32 4294901760, %v9502_v11  ;;  %v9506_v11 = vld [vmem:[#allocation246_spill] sm:$0xff]  ;;  %v3049_v33 = vand.u32 4294901760, %v3048_v31  ;;  %v3073_v7 = vand.u32 4294901760, %v3072_v1  ;;  %v9519_v31 = vld [vmem:[#allocation248_spill] sm:$0xff] }
 0x16c   :  { %v9518_v13 = vand.u32 4294901760, %v6863_v22 }
 0x16d   :  { %v3066_v42 = vsub.f32 %v6851_v50, %v9498_v34  ;;  %4497 = vmatpush1.bf16.msra.mxu1 %v9499_v45  ;;  %2967 = vmatmul.mubr.f32.vlgmr.msra.gmra.mrb[0].mxu0 %v2966_v24  ;;  %v4504_v47 = vpack.c.bf16 %v9503_v51, %v9501_v62  ;;  %v3084_v34 = vsub.f32 %v6861_v21, %v9505_v38  ;;  %v9509_v51 = vld [vmem:[#allocation42_spill] sm:$0xff]  ;;  %v9513_v50 = vand.u32 4294901760, %v9512_v55  ;;  %v9514_v38 = vld [vmem:[#allocation47_spill] sm:$0xff]  ;;  %v9516_v21 = vld [vmem:[#allocation48_spill] sm:$0xff] }
 0x16e   :  { %4499 = vmatprep.subr.bf16.mxu1 %v7045_v54  ;;  %5077 = vmatpush1.bf16.msra.mxu0 %v5076_v4  ;;  %v9510_v25 = vand.u32 4294901760, %v9509_v51  ;;  %v3061_v54 = vand.u32 4294901760, %v3060_v23  ;;  %v9511_v4 = vld [vmem:[#allocation18_spill] sm:$0xff]  ;;  %v9515_v24 = vand.u32 4294901760, %v9514_v38  ;;  %v9517_v40 = vand.u32 4294901760, %v9516_v21  ;;  %v9529_v38 = vld [vmem:[#allocation252_spill] sm:$0xff] }
 0x16f   :  { %5079 = vmatprep.subr.bf16.mxu0 %v5078_v28  ;;  %3358 = vmatprep.mubr.f32.mxu0 %v9511_v4  ;;  %v5084_v62 = vpack.c.bf16 %v3043_v53, %v3031_v2  ;;  %v3055_v28 = vand.u32 4294901760, %v3054_v57  ;;  %v3067_v17 = vand.u32 4294901760, %v3066_v42  ;;  %v3078_v12 = vsub.f32 %v6863_v22, %v9518_v13  ;;  %v9527_v51 = vld [vmem:[#allocation54_spill] sm:$0xff]  ;;  %v9532_v23 = vld [vmem:[#allocation60_spill] sm:$0xff] }
 0x170   :  { %v4506_v45 = vpack.c.bf16 %v9510_v25, %v9508_v27  ;;  %1136 = vmatmul.mubr.f32.vlgmr.msra.gmra.mrb[0].mxu1 %v9513_v50  ;;  %v4508_v48 = vpack.c.bf16 %v9517_v40, %v9515_v24  ;;  %v9520_v27 = vld [vmem:[#allocation249_spill] sm:$0xff]  ;;  %v9521_v50 = vld [vmem:[#allocation200_spill] sm:$0xff]  ;;  %v3085_v21 = vand.u32 4294901760, %v3084_v34  ;;  %v9522_v57 = vand.u32 4294901760, %v6866_v0 }
 0x171   :  { %4501 = vmatpush1.bf16.msra.mxu1 %v7148_v29  ;;  %1399 = vmatprep.mubr.f32.mxu1 %v9521_v50  ;;  %v9523_v29 = vand.u32 4294901760, %v6868_v49  ;;  %v9524_v42 = vand.u32 4294901760, %v9506_v11  ;;  %v9525_v24 = vld [vmem:[#allocation53_spill] sm:$0xff]  ;;  %v9528_v25 = vand.u32 4294901760, %v9527_v51  ;;  %v8865_v34 = vand.u32 4294901760, %v9448_v37 }
 0x172   :  { %4503 = vmatprep.subr.bf16.mxu1 %v7159_v56  ;;  %5081 = vmatpush1.bf16.msra.mxu0 %v5080_v32  ;;  %v3090_v2 = vsub.f32 %v6866_v0, %v9522_v57  ;;  %v9526_v40 = vand.u32 4294901760, %v9525_v24  ;;  %v5086_v32 = vpack.c.bf16 %v3061_v54, %v3049_v33  ;;  %v8864_v13 = vand.u32 4294901760, %v9529_v38  ;;  %v9530_v57 = vld [vmem:[#allocation58_spill] sm:$0xff] }
 0x173   :  { %v3096_v53 = vsub.f32 %v6868_v49, %v9523_v29  ;;  %v3108_v1 = vsub.f32 %v9506_v11, %v9524_v42  ;;  %5083 = vmatprep.subr.bf16.mxu0 %v5082_v43  ;;  %v9531_v55 = vand.u32 4294901760, %v9530_v57  ;;  %v9533_v4 = vand.u32 4294901760, %v9532_v23  ;;  %v9534_v49 = vld [vmem:[#allocation65_spill] sm:$0xff]  ;;  %v9536_v0 = vld [vmem:[#allocation66_spill] sm:$0xff] }
 0x174   :  { %v4510_v56 = vpack.c.bf16 %v9528_v25, %v9526_v40  ;;  %v9535_v22 = vand.u32 4294901760, %v9534_v49  ;;  %v9537_v42 = vand.u32 4294901760, %v9536_v0  ;;  %v9538_v11 = vld [vmem:[#allocation254_spill] sm:$0xff]  ;;  %v8869_v51 = vand.u32 4294901760, %v9539_v26 }
 0x175   :  { %v4512_v29 = vpack.c.bf16 %v9533_v4, %v9531_v55  ;;  %v8867_v24 = vand.u32 4294901760, %v9538_v11  ;;  %4505 = vmatpush1.bf16.msra.mxu1 %v4504_v47  ;;  %v5088_v33 = vpack.c.bf16 %v3067_v17, %v3055_v28  ;;  %v3079_v54 = vand.u32 4294901760, %v3078_v12  ;;  %v9542_v12 = vld [vmem:[#allocation258_spill] sm:$0xff] }
 0x176   :  { %v4514_v43 = vpack.c.bf16 %v9537_v42, %v9535_v22  ;;  %v9540_v40 = vand.u32 4294901760, %v9519_v31  ;;  %v9541_v57 = vand.u32 4294901760, %v9520_v27  ;;  %4507 = vmatprep.subr.bf16.mxu1 %v4506_v45  ;;  %5085 = vmatpush1.bf16.msra.mxu0 %v5084_v62  ;;  %v5090_v49 = vpack.c.bf16 %v3085_v21, %v3073_v7  ;;  %v9543_v7 = vld [vmem:[#allocation260_spill] sm:$0xff]  ;;  %v9551_v55 = vld [vmem:[#allocation78_spill] sm:$0xff] }
 0x177   :  { %v3091_v0 = vand.u32 4294901760, %v3090_v2  ;;  %v3097_v22 = vand.u32 4294901760, %v3096_v53  ;;  %v3109_v23 = vand.u32 4294901760, %v3108_v1  ;;  %5087 = vmatprep.subr.bf16.mxu0 %v5086_v32  ;;  %v3120_v17 = vsub.f32 %v9448_v37, %v8865_v34  ;;  %v9544_v2 = vld [vmem:[#allocation261_spill] sm:$0xff]  ;;  %v9545_v1 = vld [vmem:[#allocation71_spill] sm:$0xff]  ;;  %v9547_v42 = vld [vmem:[#allocation72_spill] sm:$0xff] }
 0x178   :  { %v3102_v25 = vsub.f32 %v9519_v31, %v9540_v40  ;;  %v3114_v4 = vsub.f32 %v9520_v27, %v9541_v57  ;;  %v3132_v47 = vsub.f32 %v9529_v38, %v8864_v13  ;;  %v3126_v45 = vsub.f32 %v9538_v11, %v8867_v24  ;;  %v9549_v13 = vld [vmem:[#allocation77_spill] sm:$0xff]  ;;  %v9553_v53 = vld [vmem:[#allocation264_spill] sm:$0xff] }
 0x179   :  { %v3138_v62 = vsub.f32 %v9539_v26, %v8869_v51  ;;  %4509 = vmatpush1.bf16.msra.mxu1 %v4508_v48  ;;  %v9546_v32 = vand.u32 4294901760, %v9545_v1  ;;  %v9548_v40 = vand.u32 4294901760, %v9547_v42  ;;  %v9550_v34 = vand.u32 4294901760, %v9549_v13 }
 0x17a   :  { %v9552_v28 = vand.u32 4294901760, %v9551_v55  ;;  %v3103_v24 = vand.u32 4294901760, %v3102_v25  ;;  %v3115_v11 = vand.u32 4294901760, %v3114_v4  ;;  %4511 = vmatprep.subr.bf16.mxu1 %v4510_v56  ;;  %5089 = vmatpush1.bf16.msra.mxu0 %v5088_v33  ;;  %v5092_v51 = vpack.c.bf16 %v3091_v0, %v3079_v54  ;;  %v9558_v0 = vld [vmem:[#allocation83_spill] sm:$0xff] }
 0x17b   :  { %v4516_v57 = vpack.c.bf16 %v9548_v40, %v9546_v32  ;;  %v5094_v26 = vpack.c.bf16 %v3109_v23, %v3097_v22  ;;  %v8872_v21 = vand.u32 4294901760, %v9456_v35  ;;  %v8875_v48 = vand.u32 4294901760, %v9553_v53  ;;  %5091 = vmatprep.subr.bf16.mxu0 %v5090_v49  ;;  %v9560_v23 = vld [vmem:[#allocation84_spill] sm:$0xff]  ;;  %v9562_v40 = vld [vmem:[#allocation269_spill] sm:$0xff] }
 0x17c   :  { %v4518_v37 = vpack.c.bf16 %v9552_v28, %v9550_v34  ;;  %v3121_v1 = vand.u32 4294901760, %v3120_v17  ;;  %v3133_v38 = vand.u32 4294901760, %v3132_v47  ;;  %v9554_v32 = vand.u32 4294901760, %v9452_v58 }
 0x17d   :  { %v9555_v55 = vand.u32 4294901760, %v9542_v12  ;;  %v3127_v25 = vand.u32 4294901760, %v3126_v45  ;;  %v3139_v56 = vand.u32 4294901760, %v3138_v62  ;;  %v9556_v33 = vand.u32 4294901760, %v9543_v7  ;;  %4513 = vmatpush1.bf16.msra.mxu1 %v4512_v29 }
 0x17e   :  { %v3144_v13 = vsub.f32 %v9452_v58, %v9554_v32  ;;  %v9557_v4 = vand.u32 4294901760, %v9544_v2  ;;  %v9559_v22 = vand.u32 4294901760, %v9558_v0  ;;  %v9561_v17 = vand.u32 4294901760, %v9560_v23  ;;  %4515 = vmatprep.subr.bf16.mxu1 %v4514_v43  ;;  %5093 = vmatpush1.bf16.msra.mxu0 %v5092_v51 }
 0x17f   :  { %v3156_v34 = vsub.f32 %v9542_v12, %v9555_v55  ;;  %v3150_v54 = vsub.f32 %v9543_v7, %v9556_v33  ;;  %v5096_v28 = vpack.c.bf16 %v3115_v11, %v3103_v24  ;;  %v3168_v62 = vsub.f32 %v9456_v35, %v8872_v21  ;;  %v9563_v55 = vld [vmem:[#allocation270_spill] sm:$0xff]  ;;  %5095 = vmatprep.subr.bf16.mxu0 %v5094_v26  ;;  %v9564_v11 = vld [vmem:[#allocation89_spill] sm:$0xff]  ;;  %v9570_v21 = vld [vmem:[#allocation96_spill] sm:$0xff] }
 0x180   :  { %v3162_v49 = vsub.f32 %v9544_v2, %v9557_v4  ;;  %v4520_v47 = vpack.c.bf16 %v9561_v17, %v9559_v22  ;;  %v3180_v29 = vsub.f32 %v9553_v53, %v8875_v48  ;;  %v8877_v32 = vand.u32 4294901760, %v9562_v40  ;;  %v9566_v4 = vld [vmem:[#allocation90_spill] sm:$0xff]  ;;  %v9568_v17 = vld [vmem:[#allocation95_spill] sm:$0xff] }
 0x181   :  { %v9565_v24 = vand.u32 4294901760, %v9564_v11  ;;  %v9567_v0 = vand.u32 4294901760, %v9566_v4  ;;  %v5098_v43 = vpack.c.bf16 %v3133_v38, %v3121_v1  ;;  %v3145_v51 = vand.u32 4294901760, %v3144_v13  ;;  %4517 = vmatpush1.bf16.msra.mxu1 %v4516_v57  ;;  %v9574_v1 = vld [vmem:[#allocation273_spill] sm:$0xff]  ;;  %v9586_v38 = vld [vmem:[#allocation114_spill] sm:$0xff] }
 0x182   :  { %v3157_v23 = vand.u32 4294901760, %v3156_v34  ;;  %v9569_v45 = vand.u32 4294901760, %v9568_v17  ;;  %v9571_v42 = vand.u32 4294901760, %v9570_v21  ;;  %v5100_v7 = vpack.c.bf16 %v3139_v56, %v3127_v25  ;;  %4519 = vmatprep.subr.bf16.mxu1 %v4518_v37  ;;  %5097 = vmatpush1.bf16.msra.mxu0 %v5096_v28 }
 0x183   :  { %v4522_v22 = vpack.c.bf16 %v9567_v0, %v9565_v24  ;;  %v3151_v48 = vand.u32 4294901760, %v3150_v54  ;;  %v3163_v53 = vand.u32 4294901760, %v3162_v49  ;;  %v9572_v33 = vand.u32 4294901760, %v9458_v16  ;;  %5099 = vmatprep.subr.bf16.mxu0 %v5098_v43  ;;  %v9576_v54 = vld [vmem:[#allocation101_spill] sm:$0xff]  ;;  %v9582_v0 = vld [vmem:[#allocation108_spill] sm:$0xff] }
 0x184   :  { %v4524_v35 = vpack.c.bf16 %v9571_v42, %v9569_v45  ;;  %v9573_v11 = vand.u32 4294901760, %v9459_v15  ;;  %v3169_v21 = vand.u32 4294901760, %v3168_v62  ;;  %v3181_v34 = vand.u32 4294901760, %v3180_v29  ;;  %v9578_v42 = vld [vmem:[#allocation102_spill] sm:$0xff]  ;;  %v9580_v62 = vld [vmem:[#allocation107_spill] sm:$0xff] }
 0x185   :  { %v3174_v26 = vsub.f32 %v9458_v16, %v9572_v33  ;;  %v3192_v57 = vsub.f32 %v9562_v40, %v8877_v32  ;;  %v9575_v25 = vand.u32 4294901760, %v9563_v55  ;;  %v9577_v49 = vand.u32 4294901760, %v9576_v54  ;;  %v9584_v32 = vld [vmem:[#allocation113_spill] sm:$0xff]  ;;  %v9588_v40 = vld [vmem:[#allocation279_spill] sm:$0xff]  ;;  %4521 = vmatpush1.bf16.msra.mxu1 %v4520_v47 }
 0x186   :  { %v3186_v24 = vsub.f32 %v9459_v15, %v9573_v11  ;;  %v9579_v45 = vand.u32 4294901760, %v9578_v42  ;;  %v5102_v4 = vpack.c.bf16 %v3157_v23, %v3145_v51  ;;  %v8880_v37 = vand.u32 4294901760, %v9465_v30  ;;  %4523 = vmatprep.subr.bf16.mxu1 %v4522_v22  ;;  %5101 = vmatpush1.bf16.msra.mxu0 %v5100_v7  ;;  %v9594_v7 = vld [vmem:[#allocation120_spill] sm:$0xff] }
 0x187   :  { %v3204_v56 = vsub.f32 %v9563_v55, %v9575_v25  ;;  %v8879_v28 = vand.u32 4294901760, %v9466_v61  ;;  %v9581_v29 = vand.u32 4294901760, %v9580_v62  ;;  %v9583_v17 = vand.u32 4294901760, %v9582_v0 }
 0x188   :  { %v4526_v33 = vpack.c.bf16 %v9579_v45, %v9577_v49  ;;  %v9585_v13 = vand.u32 4294901760, %v9584_v32  ;;  %v9587_v25 = vand.u32 4294901760, %v9586_v38  ;;  %v8881_v54 = vand.u32 4294901760, %v6949_v36  ;;  %5103 = vmatprep.subr.bf16.mxu0 %v5102_v4 }
 0x189   :  { %v4528_v11 = vpack.c.bf16 %v9583_v17, %v9581_v29  ;;  %v8884_v42 = vand.u32 4294901760, %v9588_v40  ;;  %v3175_v51 = vand.u32 4294901760, %v3174_v26  ;;  %v3187_v23 = vand.u32 4294901760, %v3186_v24  ;;  %v9591_v17 = vld [vmem:[#allocation282_spill] sm:$0xff]  ;;  %4525 = vmatpush1.bf16.msra.mxu1 %v4524_v35 }
 0x18a   :  { %v4530_v43 = vpack.c.bf16 %v9587_v25, %v9585_v13  ;;  %v9589_v49 = vand.u32 4294901760, %v9463_v41  ;;  %v9590_v62 = vand.u32 4294901760, %v9574_v1  ;;  %v5104_v32 = vpack.c.bf16 %v3163_v53, %v3151_v48  ;;  %4527 = vmatprep.subr.bf16.mxu1 %v4526_v33 }
 0x18b   :  { %v5106_v38 = vpack.c.bf16 %v3181_v34, %v3169_v21  ;;  %v3193_v13 = vand.u32 4294901760, %v3192_v57  ;;  %v3205_v0 = vand.u32 4294901760, %v3204_v56  ;;  %v3216_v47 = vsub.f32 %v9465_v30, %v8880_v37  ;;  %v9596_v21 = vld [vmem:[#allocation125_spill] sm:$0xff]  ;;  %v9598_v57 = vld [vmem:[#allocation126_spill] sm:$0xff] }
 0x18c   :  { %v3198_v45 = vsub.f32 %v9463_v41, %v9589_v49  ;;  %v3210_v29 = vsub.f32 %v9574_v1, %v9590_v62  ;;  %v3228_v26 = vsub.f32 %v9466_v61, %v8879_v28  ;;  %v9592_v49 = vld [vmem:[#allocation119_spill] sm:$0xff]  ;;  %v9595_v53 = vand.u32 4294901760, %v9594_v7  ;;  %5105 = vmatpush1.bf16.msra.mxu0 %v5104_v32  ;;  %v9605_v32 = vld [vmem:[#allocation290_spill] sm:$0xff] }
 0x18d   :  { %v9593_v22 = vand.u32 4294901760, %v9592_v49  ;;  %v9597_v34 = vand.u32 4294901760, %v9596_v21  ;;  %v9599_v56 = vand.u32 4294901760, %v9598_v57  ;;  %v3222_v62 = vsub.f32 %v6949_v36, %v8881_v54  ;;  %5107 = vmatprep.subr.bf16.mxu0 %v5106_v38  ;;  %4529 = vmatpush1.bf16.msra.mxu1 %v4528_v11 }
 0x18e   :  { %v3234_v28 = vsub.f32 %v9588_v40, %v8884_v42  ;;  %v5108_v37 = vpack.c.bf16 %v3187_v23, %v3175_v51  ;;  %v3199_v25 = vand.u32 4294901760, %v3198_v45  ;;  %v3211_v49 = vand.u32 4294901760, %v3210_v29  ;;  %4531 = vmatprep.subr.bf16.mxu1 %v4530_v43 }
 0x18f   :  { %v4532_v48 = vpack.c.bf16 %v9595_v53, %v9593_v22  ;;  %v4534_v4 = vpack.c.bf16 %v9599_v56, %v9597_v34  ;;  %v8885_v7 = vand.u32 4294901760, %v9471_v59  ;;  %v5110_v22 = vpack.c.bf16 %v3205_v0, %v3193_v13  ;;  %v9600_v53 = vld [vmem:[#allocation285_spill] sm:$0xff]  ;;  %v9601_v34 = vld [vmem:[#allocation287_spill] sm:$0xff]  ;;  %v9602_v56 = vld [vmem:[#allocation288_spill] sm:$0xff] }
 0x190   :  { %v8886_v21 = vand.u32 4294901760, %v9600_v53  ;;  %v8889_v57 = vand.u32 4294901760, %v9601_v34  ;;  %v8891_v24 = vand.u32 4294901760, %v9602_v56  ;;  %v3217_v54 = vand.u32 4294901760, %v3216_v47  ;;  %5109 = vmatpush1.bf16.msra.mxu0 %v5108_v37  ;;  %v9610_v47 = vld [vmem:[#allocation137_spill] sm:$0xff] }
 0x191   :  { %v3229_v36 = vand.u32 4294901760, %v3228_v26  ;;  %v9603_v42 = vand.u32 4294901760, %v9468_v6  ;;  %v9604_v51 = vand.u32 4294901760, %v9591_v17  ;;  %v3223_v33 = vand.u32 4294901760, %v3222_v62  ;;  %5111 = vmatprep.subr.bf16.mxu0 %v5110_v22  ;;  %4533 = vmatpush1.bf16.msra.mxu1 %v4532_v48 }
 0x192   :  { %v3235_v45 = vand.u32 4294901760, %v3234_v28  ;;  %v5112_v0 = vpack.c.bf16 %v3211_v49, %v3199_v25  ;;  %v3246_v38 = vsub.f32 %v9471_v59, %v8885_v7  ;;  %v3258_v28 = vsub.f32 %v9600_v53, %v8886_v21  ;;  %v9606_v25 = vld [vmem:[#allocation131_spill] sm:$0xff]  ;;  %v9608_v49 = vld [vmem:[#allocation132_spill] sm:$0xff]  ;;  %v9612_v21 = vld [vmem:[#allocation138_spill] sm:$0xff]  ;;  %4535 = vmatprep.subr.bf16.mxu1 %v4534_v4 }
 0x193   :  { %v3240_v35 = vsub.f32 %v9468_v6, %v9603_v42  ;;  %v3252_v23 = vsub.f32 %v9591_v17, %v9604_v51  ;;  %v3264_v26 = vsub.f32 %v9601_v34, %v8889_v57  ;;  %v3276_v11 = vsub.f32 %v9602_v56, %v8891_v24  ;;  %v9622_v24 = vld [vmem:[#allocation149_spill] sm:$0xff] }
 0x194   :  { %v9607_v62 = vand.u32 4294901760, %v9606_v25  ;;  %v9609_v51 = vand.u32 4294901760, %v9608_v49  ;;  %v5114_v43 = vpack.c.bf16 %v3229_v36, %v3217_v54  ;;  %v9611_v13 = vand.u32 4294901760, %v9610_v47  ;;  %5113 = vmatpush1.bf16.msra.mxu0 %v5112_v0  ;;  %v9618_v49 = vld [vmem:[#allocation143_spill] sm:$0xff] }
 0x195   :  { %v3241_v37 = vand.u32 4294901760, %v3240_v35  ;;  %v3253_v42 = vand.u32 4294901760, %v3252_v23  ;;  %v9613_v29 = vand.u32 4294901760, %v9612_v21  ;;  %v5116_v53 = vpack.c.bf16 %v3235_v45, %v3223_v33  ;;  %v9624_v23 = vld [vmem:[#allocation150_spill] sm:$0xff] }
 0x196   :  { %v4536_v7 = vpack.c.bf16 %v9609_v51, %v9607_v62  ;;  %v9614_v57 = vand.u32 4294901760, %v6977_v3  ;;  %v9615_v22 = vand.u32 4294901760, %v9605_v32  ;;  %v9616_v62 = vand.u32 4294901760, %v6983_v9  ;;  %5115 = vmatprep.subr.bf16.mxu0 %v5114_v43 }
 0x197   :  { %v4538_v59 = vpack.c.bf16 %v9613_v29, %v9611_v13  ;;  %v9617_v54 = vand.u32 4294901760, %v6986_v39  ;;  %v3259_v33 = vand.u32 4294901760, %v3258_v28  ;;  %v3265_v45 = vand.u32 4294901760, %v3264_v26 }
 0x198   :  { %v3270_v34 = vsub.f32 %v6977_v3, %v9614_v57  ;;  %v3282_v25 = vsub.f32 %v9605_v32, %v9615_v22  ;;  %v3288_v36 = vsub.f32 %v6983_v9, %v9616_v62  ;;  %v3247_v57 = vand.u32 4294901760, %v3246_v38  ;;  %v9620_v22 = vld [vmem:[#allocation144_spill] sm:$0xff]  ;;  %4537 = vmatpush1.bf16.msra.mxu1 %v4536_v7  ;;  %5117 = vmatpush1.bf16.msra.mxu0 %v5116_v53  ;;  %v9628_v53 = vld [vmem:[#allocation155_spill] sm:$0xff] }
 0x199   :  { %v3300_v35 = vsub.f32 %v6986_v39, %v9617_v54  ;;  %v3277_v29 = vand.u32 4294901760, %v3276_v11  ;;  %v5118_v48 = vpack.c.bf16 %v3253_v42, %v3241_v37  ;;  %v8892_v13 = vand.u32 4294901760, %v7003_v44  ;;  %4539 = vmatprep.subr.bf16.mxu1 %v4538_v59 }
 0x19a   :  { %v8893_v47 = vand.u32 4294901760, %v7007_v60  ;;  %v9619_v51 = vand.u32 4294901760, %v9618_v49  ;;  %v9621_v62 = vand.u32 4294901760, %v9620_v22  ;;  %v9623_v21 = vand.u32 4294901760, %v9622_v24 }
 0x19b   :  { %v9625_v4 = vand.u32 4294901760, %v9624_v23  ;;  %v3271_v38 = vand.u32 4294901760, %v3270_v34  ;;  %v3283_v28 = vand.u32 4294901760, %v3282_v25  ;;  %v3289_v26 = vand.u32 4294901760, %v3288_v36  ;;  %5119 = vmatprep.subr.bf16.mxu0 %v5118_v48  ;;  %v9634_v48 = vld [vmem:[#allocation162_spill] sm:$0xff] }
 0x19c   :  { %v4540_v54 = vpack.c.bf16 %v9621_v62, %v9619_v51  ;;  %v3301_v11 = vand.u32 4294901760, %v3300_v35  ;;  %v9626_v42 = vand.u32 4294901760, %v9479_v52  ;;  %v9627_v37 = vand.u32 4294901760, %v6997_v18 }
 0x19d   :  { %v4542_v0 = vpack.c.bf16 %v9625_v4, %v9623_v21  ;;  %v5120_v51 = vpack.c.bf16 %v3259_v33, %v3247_v57  ;;  %v5122_v24 = vpack.c.bf16 %v3277_v29, %v3265_v45  ;;  %v8899_v23 = vand.u32 4294901760, %v7011_v14  ;;  %v9630_v21 = vld [vmem:[#allocation156_spill] sm:$0xff]  ;;  %v9632_v45 = vld [vmem:[#allocation161_spill] sm:$0xff] }
 0x19e   :  { %v3294_v43 = vsub.f32 %v9479_v52, %v9626_v42  ;;  %v3306_v49 = vsub.f32 %v6997_v18, %v9627_v37  ;;  %v8898_v34 = vand.u32 4294901760, %v7016_v5  ;;  %v3312_v7 = vsub.f32 %v7003_v44, %v8892_v13  ;;  %4541 = vmatpush1.bf16.msra.mxu1 %v4540_v54 }
 0x19f   :  { %v3324_v25 = vsub.f32 %v7007_v60, %v8893_v47  ;;  %v8897_v36 = vand.u32 4294901760, %v7031_v46  ;;  %v8894_v59 = vand.u32 4294901760, %v7037_v19  ;;  %v9629_v35 = vand.u32 4294901760, %v9628_v53  ;;  %4543 = vmatprep.subr.bf16.mxu1 %v4542_v0  ;;  %5121 = vmatpush1.bf16.msra.mxu0 %v5120_v51 }
 0x1a0   :  { %v9631_v57 = vand.u32 4294901760, %v9630_v21  ;;  %v9633_v29 = vand.u32 4294901760, %v9632_v45  ;;  %v9635_v22 = vand.u32 4294901760, %v9634_v48  ;;  %v5124_v4 = vpack.c.bf16 %v3283_v28, %v3271_v38  ;;  %5123 = vmatprep.subr.bf16.mxu0 %v5122_v24 }
 0x1a1   :  { %v5126_v42 = vpack.c.bf16 %v3301_v11, %v3289_v26  ;;  %v3295_v37 = vand.u32 4294901760, %v3294_v43  ;;  %v3307_v13 = vand.u32 4294901760, %v3306_v49  ;;  %v3318_v47 = vsub.f32 %v7011_v14, %v8899_v23  ;;  %v9636_v26 = vld [vmem:[#allocation167_spill] sm:$0xff]  ;;  %v9638_v43 = vld [vmem:[#allocation168_spill] sm:$0xff] }
 0x1a2   :  { %v4544_v33 = vpack.c.bf16 %v9631_v57, %v9629_v35  ;;  %v4546_v62 = vpack.c.bf16 %v9635_v22, %v9633_v29  ;;  %v3330_v53 = vsub.f32 %v7016_v5, %v8898_v34  ;;  %v8895_v35 = vand.u32 4294901760, %v7053_v8  ;;  %v9640_v57 = vld [vmem:[#allocation173_spill] sm:$0xff]  ;;  %v9642_v29 = vld [vmem:[#allocation174_spill] sm:$0xff]  ;;  %v9708_v34 = vld [vmem:[#allocation76_spill] sm:$0xff] }
 0x1a3   :  { %v8896_v21 = vand.u32 4294901760, %v7065_v10  ;;  %v3313_v54 = vand.u32 4294901760, %v3312_v7  ;;  %v3325_v38 = vand.u32 4294901760, %v3324_v25  ;;  %v3336_v0 = vsub.f32 %v7031_v46, %v8897_v36  ;;  %5125 = vmatpush1.bf16.msra.mxu0 %v5124_v4 }
 0x1a4   :  { %v3348_v28 = vsub.f32 %v7037_v19, %v8894_v59  ;;  %4545 = vmatpush1.bf16.msra.mxu1 %v4544_v33  ;;  %v9637_v11 = vand.u32 4294901760, %v9636_v26  ;;  %v9639_v49 = vand.u32 4294901760, %v9638_v43  ;;  %v9641_v45 = vand.u32 4294901760, %v9640_v57  ;;  %5127 = vmatprep.subr.bf16.mxu0 %v5126_v42 }
 0x1a5   :  { %v9643_v24 = vand.u32 4294901760, %v9642_v29  ;;  %v5128_v25 = vpack.c.bf16 %v3307_v13, %v3295_v37  ;;  %4547 = vmatprep.subr.bf16.mxu1 %v4546_v62  ;;  %v3319_v48 = vand.u32 4294901760, %v3318_v47  ;;  %v3331_v22 = vand.u32 4294901760, %v3330_v53  ;;  %v9646_v13 = vld [vmem:[#allocation180_spill] sm:$0xff]  ;;  %v9648_v47 = vld [vmem:[#allocation185_spill] sm:$0xff]  ;;  %v9650_v53 = vld [vmem:[#allocation186_spill] sm:$0xff] }
 0x1a6   :  { %v4548_v51 = vpack.c.bf16 %v9639_v49, %v9637_v11  ;;  %v3342_v59 = vsub.f32 %v7053_v8, %v8895_v35  ;;  %v3354_v33 = vsub.f32 %v7065_v10, %v8896_v21  ;;  %v5130_v26 = vpack.c.bf16 %v3325_v38, %v3313_v54  ;;  %v9644_v49 = vld [vmem:[#allocation179_spill] sm:$0xff] }
 0x1a7   :  { %v4550_v7 = vpack.c.bf16 %v9643_v24, %v9641_v45  ;;  %v3337_v11 = vand.u32 4294901760, %v3336_v0  ;;  %v3349_v43 = vand.u32 4294901760, %v3348_v28  ;;  %v9645_v57 = vand.u32 4294901760, %v9644_v49  ;;  %5129 = vmatpush1.bf16.msra.mxu0 %v5128_v25  ;;  %v9652_v54 = vld [vmem:[#allocation191_spill] sm:$0xff]  ;;  %v9654_v0 = vld [vmem:[#allocation192_spill] sm:$0xff]  ;;  %v9658_v49 = vld [vmem:[#allocation198_spill] sm:$0xff] }
 0x1a8   :  { %4549 = vmatpush1.bf16.msra.mxu1 %v4548_v51  ;;  %v9647_v62 = vand.u32 4294901760, %v9646_v13  ;;  %v9649_v37 = vand.u32 4294901760, %v9648_v47  ;;  %v9651_v45 = vand.u32 4294901760, %v9650_v53  ;;  %v5132_v24 = vpack.c.bf16 %v3331_v22, %v3319_v48  ;;  %5131 = vmatprep.subr.bf16.mxu0 %v5130_v26  ;;  %v9662_v22 = vld [vmem:[#allocation205_spill] sm:$0xff]  ;;  %v9667_v47 = vld [vmem:[#allocation298_spill] sm:$0xff] }
 0x1a9   :  { %4551 = vmatprep.subr.bf16.mxu1 %v4550_v7  ;;  %v3343_v35 = vand.u32 4294901760, %v3342_v59  ;;  %v3355_v21 = vand.u32 4294901760, %v3354_v33  ;;  %v5134_v42 = vpack.c.bf16 %v3349_v43, %v3337_v11  ;;  %v9653_v38 = vand.u32 4294901760, %v9652_v54  ;;  %v9656_v7 = vld [vmem:[#allocation197_spill] sm:$0xff]  ;;  %v9660_v59 = vld [vmem:[#allocation204_spill] sm:$0xff]  ;;  %v9665_v43 = vld [vmem:[#allocation223_spill] sm:$0xff] }
 0x1aa   :  { %v4552_v4 = vpack.c.bf16 %v9647_v62, %v9645_v57  ;;  %v4554_v29 = vpack.c.bf16 %v9651_v45, %v9649_v37  ;;  %v9655_v28 = vand.u32 4294901760, %v9654_v0  ;;  %v9657_v25 = vand.u32 4294901760, %v9656_v7  ;;  %v9664_v11 = vld [vmem:[#allocation224_spill] sm:$0xff]  ;;  %v9668_v37 = vld [vmem:[#allocation17_spill] sm:$0xff]  ;;  %v9669_v53 = vld [vmem:[#allocation226_spill] sm:$0xff] }
 0x1ab   :  { %5133 = vmatpush1.bf16.msra.mxu0 %v5132_v24  ;;  %v9659_v57 = vand.u32 4294901760, %v9658_v49  ;;  %v5136_v62 = vpack.c.bf16 %v3355_v21, %v3343_v35  ;;  %v9661_v48 = vand.u32 4294901760, %v9660_v59  ;;  %v9663_v33 = vand.u32 4294901760, %v9662_v22  ;;  %v9670_v35 = vld [vmem:[#allocation225_spill] sm:$0xff]  ;;  %v9672_v45 = vld [vmem:[#allocation228_spill] sm:$0xff]  ;;  %v9676_v54 = vld [vmem:[#allocation211_spill] sm:$0xff] }
 0x1ac   :  { %4553 = vmatpush1.bf16.msra.mxu1 %v4552_v4  ;;  %v4556_v51 = vpack.c.bf16 %v9655_v28, %v9653_v38  ;;  %5135 = vmatprep.subr.bf16.mxu0 %v5134_v42  ;;  %v9666_v4 = vpack.c.bf16 %v9664_v11, %v9665_v43  ;;  %v9671_v21 = vpack.c.bf16 %v9669_v53, %v9670_v35  ;;  %v9675_v42 = vld [vmem:[#allocation209_spill] sm:$0xff]  ;;  %v9677_v38 = vld [vmem:[#allocation22_spill] sm:$0xff]  ;;  %v9681_v7 = vld [vmem:[#allocation231_spill] sm:$0xff] }
 0x1ad   :  { %4555 = vmatprep.subr.bf16.mxu1 %v4554_v29  ;;  %v4558_v13 = vpack.c.bf16 %v9659_v57, %v9657_v25  ;;  %v4560_v26 = vpack.c.bf16 %v9663_v33, %v9661_v48  ;;  %v9673_v29 = vld [vmem:[#allocation227_spill] sm:$0xff]  ;;  %v9678_v0 = vld [vmem:[#allocation29_spill] sm:$0xff]  ;;  %v9679_v28 = vpack.c.bf16 %v6830_v20, %v6824_v63  ;;  %v9684_v57 = vld [vmem:[#allocation40_spill] sm:$0xff] }
 0x1ae   :  { %v9674_v24 = vpack.c.bf16 %v9672_v45, %v9673_v29  ;;  %v9683_v49 = vld [vmem:[#allocation35_spill] sm:$0xff]  ;;  %v9688_v48 = vld [vmem:[#allocation236_spill] sm:$0xff]  ;;  %v9691_v33 = vld [vmem:[#allocation46_spill] sm:$0xff] }
 0x1af   :  { %5137 = vmatpush1.bf16.msra.mxu0 %v5136_v62  ;;  %v9686_v62 = vld [vmem:[#allocation233_spill] sm:$0xff] }
 0x1b0   :  { %4557 = vmatpush1.bf16.msra.mxu1 %v4556_v51  ;;  %5139 = vmatprep.subr.bf16.mxu0 %v9666_v4  ;;  %v9680_v51 = vld [vmem:[#allocation232_spill] sm:$0xff]  ;;  %v9693_v4 = vld [vmem:[#allocation238_spill] sm:$0xff] }
 0x1b1   :  { %4559 = vmatprep.subr.bf16.mxu1 %v4558_v13  ;;  %v9682_v25 = vpack.c.bf16 %v9680_v51, %v9681_v7  ;;  %v9685_v13 = vld [vmem:[#allocation234_spill] sm:$0xff] }
 0x1b2   :  { %3360 = vmatmul.mubr.f32.vlgmr.msra.gmra.mrb[0].mxu0 %v9667_v47  ;;  %v9687_v59 = vpack.c.bf16 %v9685_v13, %v9686_v62  ;;  %v9714_v47 = vld [vmem:[#allocation88_spill] sm:$0xff] }
 0x1b3   :  { %5141 = vmatpush1.bf16.msra.mxu0 %v9671_v21  ;;  %3560 = vmatprep.mubr.f32.mxu0 %v9675_v42 }
 0x1b4   :  { %4561 = vmatpush1.bf16.msra.mxu1 %v4560_v26  ;;  %5143 = vmatprep.subr.bf16.mxu0 %v9674_v24  ;;  %v9692_v26 = vld [vmem:[#allocation52_spill] sm:$0xff]  ;;  %v9696_v24 = vld [vmem:[#allocation242_spill] sm:$0xff] }
 0x1b5   :  { %4563 = vmatprep.subr.bf16.mxu1 %v9668_v37  ;;  %v9694_v37 = vld [vmem:[#allocation237_spill] sm:$0xff] }
 0x1b6   :  { %v9695_v21 = vpack.c.bf16 %v9693_v4, %v9694_v37 }
 0x1b7   :  { %1401 = vmatmul.mubr.f32.vlgmr.msra.gmra.mrb[0].mxu1 %v9676_v54  ;;  %5145 = vmatpush1.bf16.msra.mxu0 %v9679_v28  ;;  %v9699_v28 = vld [vmem:[#allocation59_spill] sm:$0xff] }
 0x1b8   :  { %4565 = vmatpush1.bf16.msra.mxu1 %v9677_v38  ;;  %1536 = vmatprep.mubr.f32.mxu1 %v9521_v50  ;;  %v9689_v50 = vld [vmem:[#allocation235_spill] sm:$0xff]  ;;  %v9697_v38 = vld [vmem:[#allocation240_spill] sm:$0xff] }
 0x1b9   :  { %4567 = vmatprep.subr.bf16.mxu1 %v9678_v0  ;;  %5147 = vmatprep.subr.bf16.mxu0 %v9682_v25  ;;  %v9690_v22 = vpack.c.bf16 %v9688_v48, %v9689_v50  ;;  %v9698_v0 = vpack.c.bf16 %v9696_v24, %v9697_v38  ;;  %v9700_v25 = vld [vmem:[#allocation64_spill] sm:$0xff] }
 0x1bb   :  { %5149 = vmatpush1.bf16.msra.mxu0 %v9687_v59 }
 0x1bc   :  { %4569 = vmatpush1.bf16.msra.mxu1 %v9683_v49  ;;  %5151 = vmatprep.subr.bf16.mxu0 %v9690_v22  ;;  %v9701_v49 = vld [vmem:[#allocation244_spill] sm:$0xff]  ;;  %v9704_v22 = vld [vmem:[#allocation246_spill] sm:$0xff] }
 0x1bd   :  { %4571 = vmatprep.subr.bf16.mxu1 %v9684_v57  ;;  %v9702_v57 = vld [vmem:[#allocation243_spill] sm:$0xff] }
 0x1be   :  { %v9703_v59 = vpack.c.bf16 %v9701_v49, %v9702_v57  ;;  %v9716_v49 = vld [vmem:[#allocation254_spill] sm:$0xff] }
 0x1bf   :  { %5153 = vmatpush1.bf16.msra.mxu0 %v9695_v21  ;;  %v9709_v21 = vpack.c.bf16 %v9520_v27, %v9519_v31 }
 0x1c0   :  { %4573 = vmatpush1.bf16.msra.mxu1 %v9691_v33  ;;  %5155 = vmatprep.subr.bf16.mxu0 %v9698_v0  ;;  %v9705_v33 = vld [vmem:[#allocation245_spill] sm:$0xff]  ;;  %v9710_v0 = vld [vmem:[#allocation252_spill] sm:$0xff] }
 0x1c1   :  { %4575 = vmatprep.subr.bf16.mxu1 %v9692_v26  ;;  %v9706_v36 = vpack.c.bf16 %v9704_v22, %v9705_v33  ;;  %v9707_v26 = vld [vmem:[#allocation70_spill] sm:$0xff] }
 0x1c3   :  { %5157 = vmatpush1.bf16.msra.mxu0 %v9703_v59  ;;  %v9715_v59 = vld [vmem:[#allocation255_spill] sm:$0xff] }
 0x1c4   :  { %4577 = vmatpush1.bf16.msra.mxu1 %v9699_v28  ;;  %5159 = vmatprep.subr.bf16.mxu0 %v9706_v36  ;;  %v9711_v28 = vld [vmem:[#allocation251_spill] sm:$0xff]  ;;  %v9717_v22 = vpack.c.bf16 %v9715_v59, %v9716_v49  ;;  %v9718_v36 = vpack.c.bf16 %v9542_v12, %v9452_v58  ;;  %v9727_v59 = vld [vmem:[#allocation112_spill] sm:$0xff] }
 0x1c5   :  { %4579 = vmatprep.subr.bf16.mxu1 %v9700_v25  ;;  %v9712_v23 = vpack.c.bf16 %v9710_v0, %v9711_v28  ;;  %v9713_v25 = vld [vmem:[#allocation82_spill] sm:$0xff] }
 0x1c7   :  { %5161 = vmatpush1.bf16.msra.mxu0 %v9709_v21  ;;  %v9721_v21 = vld [vmem:[#allocation260_spill] sm:$0xff] }
 0x1c8   :  { %4581 = vmatpush1.bf16.msra.mxu1 %v9707_v26  ;;  %5163 = vmatprep.subr.bf16.mxu0 %v9712_v23  ;;  %v9720_v26 = vld [vmem:[#allocation100_spill] sm:$0xff]  ;;  %v9722_v0 = vpack.c.bf16 %v9544_v2, %v9721_v21 }
 0x1c9   :  { %4583 = vmatprep.subr.bf16.mxu1 %v9708_v34  ;;  %v9719_v34 = vld [vmem:[#allocation94_spill] sm:$0xff]  ;;  %v9723_v23 = vld [vmem:[#allocation264_spill] sm:$0xff] }
 0x1ca   :  { %v9732_v2 = vld [vmem:[#allocation124_spill] sm:$0xff] }
 0x1cb   :  { %5165 = vmatpush1.bf16.msra.mxu0 %v9717_v22  ;;  %v9728_v22 = vpack.c.bf16 %v9459_v15, %v9458_v16 }
 0x1cc   :  { %4585 = vmatpush1.bf16.msra.mxu1 %v9713_v25  ;;  %5167 = vmatprep.subr.bf16.mxu0 %v9718_v36  ;;  %v9724_v25 = vld [vmem:[#allocation263_spill] sm:$0xff]  ;;  %v9729_v36 = vld [vmem:[#allocation269_spill] sm:$0xff] }
 0x1cd   :  { %4587 = vmatprep.subr.bf16.mxu1 %v9714_v47  ;;  %v9725_v28 = vpack.c.bf16 %v9723_v23, %v9724_v25  ;;  %v9726_v47 = vld [vmem:[#allocation106_spill] sm:$0xff] }
 0x1cf   :  { %5169 = vmatpush1.bf16.msra.mxu0 %v9722_v0  ;;  %v9733_v0 = vpack.c.bf16 %v9574_v1, %v9463_v41  ;;  %v9743_v1 = vld [vmem:[#allocation284_spill] sm:$0xff] }
 0x1d0   :  { %4589 = vmatpush1.bf16.msra.mxu1 %v9719_v34  ;;  %5171 = vmatprep.subr.bf16.mxu0 %v9725_v28  ;;  %v9730_v34 = vpack.c.bf16 %v9563_v55, %v9729_v36  ;;  %v9734_v28 = vpack.c.bf16 %v9466_v61, %v9465_v30 }
 0x1d1   :  { %4591 = vmatprep.subr.bf16.mxu1 %v9720_v26  ;;  %v9731_v26 = vld [vmem:[#allocation118_spill] sm:$0xff] }
 0x1d3   :  { %5173 = vmatpush1.bf16.msra.mxu0 %v9728_v22  ;;  %v9737_v22 = vld [vmem:[#allocation278_spill] sm:$0xff] }
 0x1d4   :  { %4593 = vmatpush1.bf16.msra.mxu1 %v9726_v47  ;;  %5175 = vmatprep.subr.bf16.mxu0 %v9730_v34  ;;  %v9736_v47 = vld [vmem:[#allocation136_spill] sm:$0xff]  ;;  %v9738_v55 = vpack.c.bf16 %v9588_v40, %v9737_v22  ;;  %v9739_v34 = vpack.c.bf16 %v9591_v17, %v9468_v6 }
 0x1d5   :  { %4595 = vmatprep.subr.bf16.mxu1 %v9727_v59  ;;  %v9735_v59 = vld [vmem:[#allocation130_spill] sm:$0xff]  ;;  %v9748_v40 = vld [vmem:[#allocation160_spill] sm:$0xff] }
 0x1d7   :  { %5177 = vmatpush1.bf16.msra.mxu0 %v9733_v0  ;;  %v9742_v0 = vld [vmem:[#allocation285_spill] sm:$0xff] }
 0x1d8   :  { %4597 = vmatpush1.bf16.msra.mxu1 %v9731_v26  ;;  %5179 = vmatprep.subr.bf16.mxu0 %v9734_v28  ;;  %v9741_v26 = vld [vmem:[#allocation148_spill] sm:$0xff]  ;;  %v9744_v61 = vpack.c.bf16 %v9742_v0, %v9743_v1  ;;  %v9745_v28 = vld [vmem:[#allocation287_spill] sm:$0xff] }
 0x1d9   :  { %4599 = vmatprep.subr.bf16.mxu1 %v9732_v2  ;;  %v9740_v2 = vld [vmem:[#allocation142_spill] sm:$0xff] }
 0x1db   :  { %5181 = vmatpush1.bf16.msra.mxu0 %v9738_v55  ;;  %v9749_v55 = vpack.c.bf16 %v9605_v32, %v6977_v3  ;;  %v9846_v32 = vld [vmem:[#allocation39_spill] sm:$0xff] }
 0x1dc   :  { %4601 = vmatpush1.bf16.msra.mxu1 %v9735_v59  ;;  %5183 = vmatprep.subr.bf16.mxu0 %v9739_v34  ;;  %v9746_v59 = vpack.c.bf16 %v9602_v56, %v9745_v28  ;;  %v9750_v34 = vpack.c.bf16 %v6986_v39, %v6983_v9  ;;  %v9843_v9 = vld [vmem:[#allocation193_spill] sm:$0xff] }
 0x1dd   :  { %4603 = vmatprep.subr.bf16.mxu1 %v9736_v47  ;;  %v9747_v47 = vld [vmem:[#allocation154_spill] sm:$0xff] }
 0x1df   :  { %5185 = vmatpush1.bf16.msra.mxu0 %v9744_v61  ;;  %v9753_v61 = vpack.c.bf16 %v6997_v18, %v9479_v52  ;;  %v9761_v18 = vld [vmem:[#allocation190_spill] sm:$0xff] }
 0x1e0   :  { %4605 = vmatpush1.bf16.msra.mxu1 %v9740_v2  ;;  %5187 = vmatprep.subr.bf16.mxu0 %v9746_v59  ;;  %v9751_v2 = vld [vmem:[#allocation166_spill] sm:$0xff]  ;;  %v9754_v59 = vpack.c.bf16 %v7007_v60, %v7003_v44  ;;  %v9762_v60 = vld [vmem:[#allocation196_spill] sm:$0xff] }
 0x1e1   :  { %4607 = vmatprep.subr.bf16.mxu1 %v9741_v26  ;;  %v9752_v26 = vld [vmem:[#allocation172_spill] sm:$0xff] }
 0x1e2   :  { %v9838_v44 = vld [vmem:[#allocation304_spill] sm:$0xff] }
 0x1e3   :  { %5189 = vmatpush1.bf16.msra.mxu0 %v9749_v55  ;;  %v9757_v55 = vpack.c.bf16 %v7016_v5, %v7011_v14  ;;  %v9829_v5 = vld [vmem:[#allocation27_spill] sm:$0xff]  ;;  %v9831_v14 = vld [vmem:[#allocation181_spill] sm:$0xff] }
 0x1e4   :  { %4609 = vmatpush1.bf16.msra.mxu1 %v9747_v47  ;;  %5191 = vmatprep.subr.bf16.mxu0 %v9750_v34  ;;  %v9756_v47 = vld [vmem:[#allocation184_spill] sm:$0xff]  ;;  %v9758_v34 = vpack.c.bf16 %v7037_v19, %v7031_v46  ;;  %v9768_v46 = vld [vmem:[#allocation217_spill] sm:$0xff] }
 0x1e5   :  { %4611 = vmatprep.subr.bf16.mxu1 %v9748_v40  ;;  %v9755_v40 = vld [vmem:[#allocation178_spill] sm:$0xff] }
 0x1e7   :  { %5193 = vmatpush1.bf16.msra.mxu0 %v9753_v61 }
 0x1e8   :  { %4613 = vmatpush1.bf16.msra.mxu1 %v9751_v2  ;;  %5195 = vmatprep.subr.bf16.mxu0 %v9754_v59  ;;  %v9759_v2 = vld [vmem:[#allocation212_spill] sm:$0xff]  ;;  %v9763_v59 = vpack.c.bf16 %v7065_v10, %v7053_v8  ;;  %v9827_v10 = vld [vmem:[#allocation26_spill] sm:$0xff] }
 0x1e9   :  { %4615 = vmatprep.subr.bf16.mxu1 %v9752_v26  ;;  %v9760_v26 = vand.u32 4294901760, %v9759_v2 }
 0x1eb   :  { %5197 = vmatpush1.bf16.msra.mxu0 %v9757_v55  ;;  %v1675_v61 = vsub.f32 %v9759_v2, %v9760_v26  ;;  %v9766_v55 = vld [vmem:[#allocation306_spill] sm:$0xff]  ;;  %v9774_v2 = vld [vmem:[#allocation220_spill] sm:$0xff] }
 0x1ec   :  { %4617 = vmatpush1.bf16.msra.mxu1 %v9755_v40  ;;  %5199 = vmatprep.subr.bf16.mxu0 %v9758_v34  ;;  %v9764_v40 = vld [vmem:[#allocation216_spill] sm:$0xff]  ;;  %v9769_v26 = vld [vmem:[#allocation218_spill] sm:$0xff] }
 0x1ed   :  { %4619 = vmatprep.subr.bf16.mxu1 %v9756_v47  ;;  %v9765_v47 = vld [vmem:[#allocation203_spill] sm:$0xff]  ;;  %v1676_v19 = vand.u32 4294901760, %v1675_v61  ;;  %v9767_v34 = vld [vmem:[#allocation20_spill] sm:$0xff]  ;;  %v9775_v61 = vld [vmem:[#allocation38_spill] sm:$0xff] }
 0x1ef   :  { %5201 = vmatpush1.bf16.msra.mxu0 %v9763_v59  ;;  %v9772_v59 = vld [vmem:[#allocation31_spill] sm:$0xff] }
 0x1f0   :  { %4621 = vmatpush1.bf16.msra.mxu1 %v9761_v18  ;;  %5203 = vmatprep.subr.bf16.mxu0 %v9764_v40  ;;  %v9770_v18 = vand.u32 4294901760, %v9675_v42  ;;  %v9779_v42 = vld [vmem:[#allocation49_spill] sm:$0xff] }
 0x1f1   :  { %4623 = vmatprep.subr.bf16.mxu1 %v9762_v60  ;;  %v9771_v60 = vld [vmem:[#allocation25_spill] sm:$0xff] }
 0x1f2   :  { %3563 = vmatmul.mubr.f32.vlgmr.msra.gmra.mrb[0].mxu0 %v9766_v55  ;;  %v9823_v40 = vld [vmem:[#allocation169_spill] sm:$0xff] }
 0x1f3   :  { %5205 = vmatpush1.bf16.msra.mxu0 %v9768_v46  ;;  %3700 = vmatprep.mubr.f32.mxu0 %v9770_v18  ;;  %v9777_v46 = vld [vmem:[#allocation221_spill] sm:$0xff] }
 0x1f4   :  { %4625 = vmatpush1.bf16.msra.mxu1 %v9765_v47  ;;  %5207 = vmatprep.subr.bf16.mxu0 %v9769_v26  ;;  %v9773_v47 = vld [vmem:[#allocation219_spill] sm:$0xff]  ;;  %v9778_v26 = vld [vmem:[#allocation222_spill] sm:$0xff]  ;;  %v9781_v18 = vld [vmem:[#allocation229_spill] sm:$0xff] }
 0x1f5   :  { %4627 = vmatprep.subr.bf16.mxu1 %v9767_v34  ;;  %v9776_v34 = vld [vmem:[#allocation43_spill] sm:$0xff] }
 0x1f7   :  { %1538 = vmatmul.mubr.f32.vlgmr.msra.gmra.mrb[0].mxu1 %v9676_v54  ;;  %5209 = vmatpush1.bf16.msra.mxu0 %v9773_v47  ;;  %v9780_v54 = vld [vmem:[#allocation55_spill] sm:$0xff]  ;;  %v9821_v47 = vld [vmem:[#allocation21_spill] sm:$0xff] }
 0x1f8   :  { %4629 = vmatpush1.bf16.msra.mxu1 %v9771_v60  ;;  %1677 = vmatprep.mubr.f32.mxu1 %v1676_v19  ;;  %v9782_v19 = vld [vmem:[#allocation230_spill] sm:$0xff]  ;;  %v9783_v60 = vld [vmem:[#allocation61_spill] sm:$0xff] }
 0x1f9   :  { %4631 = vmatprep.subr.bf16.mxu1 %v9772_v59  ;;  %5211 = vmatprep.subr.bf16.mxu0 %v9774_v2  ;;  %v9784_v59 = vld [vmem:[#allocation68_spill] sm:$0xff]  ;;  %v9785_v2 = vld [vmem:[#allocation239_spill] sm:$0xff] }
 0x1fb   :  { %5213 = vmatpush1.bf16.msra.mxu0 %v9777_v46  ;;  %v9788_v46 = vld [vmem:[#allocation80_spill] sm:$0xff] }
 0x1fc   :  { %4633 = vmatpush1.bf16.msra.mxu1 %v9775_v61  ;;  %5215 = vmatprep.subr.bf16.mxu0 %v9778_v26  ;;  %v9786_v61 = vld [vmem:[#allocation241_spill] sm:$0xff]  ;;  %v9789_v26 = vld [vmem:[#allocation247_spill] sm:$0xff] }
 0x1fd   :  { %4635 = vmatprep.subr.bf16.mxu1 %v9776_v34  ;;  %v9787_v34 = vld [vmem:[#allocation73_spill] sm:$0xff] }
 0x1ff   :  { %5217 = vmatpush1.bf16.msra.mxu0 %v9781_v18  ;;  %v9792_v18 = vld [vmem:[#allocation92_spill] sm:$0xff] }
 0x200   :  { %4637 = vmatpush1.bf16.msra.mxu1 %v9779_v42  ;;  %5219 = vmatprep.subr.bf16.mxu0 %v9782_v19  ;;  %v9790_v42 = vld [vmem:[#allocation250_spill] sm:$0xff]  ;;  %v9793_v19 = vld [vmem:[#allocation253_spill] sm:$0xff] }
 0x201   :  { %4639 = vmatprep.subr.bf16.mxu1 %v9780_v54  ;;  %v9791_v54 = vld [vmem:[#allocation85_spill] sm:$0xff] }
 0x203   :  { %5221 = vmatpush1.bf16.msra.mxu0 %v9785_v2  ;;  %v9796_v2 = vld [vmem:[#allocation104_spill] sm:$0xff] }
 0x204   :  { %4641 = vmatpush1.bf16.msra.mxu1 %v9783_v60  ;;  %5223 = vmatprep.subr.bf16.mxu0 %v9786_v61  ;;  %v9794_v60 = vld [vmem:[#allocation256_spill] sm:$0xff]  ;;  %v9797_v61 = vld [vmem:[#allocation259_spill] sm:$0xff] }
 0x205   :  { %4643 = vmatprep.subr.bf16.mxu1 %v9784_v59  ;;  %v9795_v59 = vld [vmem:[#allocation97_spill] sm:$0xff] }
 0x207   :  { %5225 = vmatpush1.bf16.msra.mxu0 %v9789_v26  ;;  %v9800_v26 = vld [vmem:[#allocation116_spill] sm:$0xff] }
 0x208   :  { %4645 = vmatpush1.bf16.msra.mxu1 %v9787_v34  ;;  %5227 = vmatprep.subr.bf16.mxu0 %v9790_v42  ;;  %v9798_v34 = vld [vmem:[#allocation262_spill] sm:$0xff] }
 0x209   :  { %4647 = vmatprep.subr.bf16.mxu1 %v9788_v46  ;;  %v9799_v46 = vld [vmem:[#allocation109_spill] sm:$0xff]  ;;  %v9801_v42 = vld [vmem:[#allocation266_spill] sm:$0xff] }
 0x20b   :  { %5229 = vmatpush1.bf16.msra.mxu0 %v9793_v19  ;;  %v9804_v19 = vld [vmem:[#allocation128_spill] sm:$0xff] }
 0x20c   :  { %4649 = vmatpush1.bf16.msra.mxu1 %v9791_v54  ;;  %5231 = vmatprep.subr.bf16.mxu0 %v9794_v60  ;;  %v9802_v54 = vld [vmem:[#allocation268_spill] sm:$0xff] }
 0x20d   :  { %4651 = vmatprep.subr.bf16.mxu1 %v9792_v18  ;;  %v9803_v18 = vld [vmem:[#allocation121_spill] sm:$0xff]  ;;  %v9805_v60 = vld [vmem:[#allocation272_spill] sm:$0xff] }
 0x20f   :  { %5233 = vmatpush1.bf16.msra.mxu0 %v9797_v61  ;;  %v9808_v61 = vld [vmem:[#allocation140_spill] sm:$0xff] }
 0x210   :  { %4653 = vmatpush1.bf16.msra.mxu1 %v9795_v59  ;;  %5235 = vmatprep.subr.bf16.mxu0 %v9798_v34  ;;  %v9806_v59 = vld [vmem:[#allocation274_spill] sm:$0xff]  ;;  %v9809_v34 = vld [vmem:[#allocation277_spill] sm:$0xff] }
 0x211   :  { %4655 = vmatprep.subr.bf16.mxu1 %v9796_v2  ;;  %v9807_v2 = vld [vmem:[#allocation133_spill] sm:$0xff] }
 0x213   :  { %5237 = vmatpush1.bf16.msra.mxu0 %v9801_v42  ;;  %v9812_v42 = vld [vmem:[#allocation152_spill] sm:$0xff] }
 0x214   :  { %4657 = vmatpush1.bf16.msra.mxu1 %v9799_v46  ;;  %5239 = vmatprep.subr.bf16.mxu0 %v9802_v54  ;;  %v9810_v46 = vld [vmem:[#allocation280_spill] sm:$0xff]  ;;  %v9813_v54 = vld [vmem:[#allocation283_spill] sm:$0xff] }
 0x215   :  { %4659 = vmatprep.subr.bf16.mxu1 %v9800_v26  ;;  %v9811_v26 = vld [vmem:[#allocation145_spill] sm:$0xff] }
 0x217   :  { %5241 = vmatpush1.bf16.msra.mxu0 %v9805_v60  ;;  %v9816_v60 = vld [vmem:[#allocation164_spill] sm:$0xff] }
 0x218   :  { %4661 = vmatpush1.bf16.msra.mxu1 %v9803_v18  ;;  %5243 = vmatprep.subr.bf16.mxu0 %v9806_v59  ;;  %v9814_v18 = vld [vmem:[#allocation286_spill] sm:$0xff]  ;;  %v9817_v59 = vld [vmem:[#allocation289_spill] sm:$0xff] }
 0x219   :  { %4663 = vmatprep.subr.bf16.mxu1 %v9804_v19  ;;  %v9815_v19 = vld [vmem:[#allocation157_spill] sm:$0xff] }
 0x21b   :  { %5245 = vmatpush1.bf16.msra.mxu0 %v9809_v34 }
 0x21c   :  { %4665 = vmatpush1.bf16.msra.mxu1 %v9807_v2  ;;  %5247 = vmatprep.subr.bf16.mxu0 %v9810_v46  ;;  %v9818_v2 = vld [vmem:[#allocation291_spill] sm:$0xff] }
 0x21d   :  { %4667 = vmatprep.subr.bf16.mxu1 %v9808_v61  ;;  %v9819_v61 = vld [vmem:[#allocation19_spill] sm:$0xff] }
 0x21e   :  { %v9820_v34 = vand.u32 4294901760, %v9819_v61 }
 0x21f   :  { %5249 = vmatpush1.bf16.msra.mxu0 %v9813_v54  ;;  %v9824_v54 = vld [vmem:[#allocation176_spill] sm:$0xff] }
 0x220   :  { %4669 = vmatpush1.bf16.msra.mxu1 %v9811_v26  ;;  %5251 = vmatprep.subr.bf16.mxu0 %v9814_v18  ;;  %v1692_v46 = vsub.f32 %v9819_v61, %v9820_v34  ;;  %v9822_v26 = vand.u32 4294901760, %v9821_v47  ;;  %v9825_v18 = vld [vmem:[#allocation295_spill] sm:$0xff]  ;;  %v9830_v34 = vand.u32 4294901760, %v9829_v5 }
 0x221   :  { %4671 = vmatprep.subr.bf16.mxu1 %v9812_v42 }
 0x222   :  { %v1704_v42 = vsub.f32 %v9821_v47, %v9822_v26  ;;  %v1710_v61 = vsub.f32 %v9829_v5, %v9830_v34  ;;  %v9832_v26 = vld [vmem:[#allocation32_spill] sm:$0xff]  ;;  %v9834_v47 = vld [vmem:[#allocation33_spill] sm:$0xff]  ;;  %v9840_v34 = vand.u32 4294901760, %v9664_v11 }
 0x223   :  { %5253 = vmatpush1.bf16.msra.mxu0 %v9817_v59 }
 0x224   :  { %4673 = vmatpush1.bf16.msra.mxu1 %v9815_v19  ;;  %5255 = vmatprep.subr.bf16.mxu0 %v9818_v2  ;;  %v9826_v19 = vld [vmem:[#allocation297_spill] sm:$0xff]  ;;  %v1705_v59 = vand.u32 4294901760, %v1704_v42  ;;  %v9828_v2 = vand.u32 4294901760, %v9827_v10  ;;  %v1711_v39 = vand.u32 4294901760, %v1710_v61 }
 0x225   :  { %4675 = vmatprep.subr.bf16.mxu1 %v9816_v60  ;;  %v1693_v60 = vand.u32 4294901760, %v1692_v46  ;;  %v9836_v46 = vld [vmem:[#allocation188_spill] sm:$0xff]  ;;  %v9837_v42 = vld [vmem:[#allocation301_spill] sm:$0xff] }
 0x226   :  { %v1698_v8 = vsub.f32 %v9827_v10, %v9828_v2  ;;  %v9839_v2 = vand.u32 4294901760, %v9665_v43  ;;  %v9847_v43 = vand.u32 4294901760, %v9846_v32 }
 0x227   :  { %5257 = vmatpush1.bf16.msra.mxu0 %v9825_v18  ;;  %v9835_v18 = vand.u32 4294901760, %v9834_v47 }
 0x228   :  { %4677 = vmatpush1.bf16.msra.mxu1 %v9823_v40  ;;  %5259 = vmatprep.subr.bf16.mxu0 %v9826_v19  ;;  %v9833_v40 = vand.u32 4294901760, %v9832_v26  ;;  %v5266_v5 = vpack.c.bf16 %v9840_v34, %v9839_v2  ;;  %v1734_v11 = vsub.f32 %v9846_v32, %v9847_v43  ;;  %v9848_v2 = vld [vmem:[#allocation201_spill] sm:$0xff]  ;;  %v9849_v34 = vld [vmem:[#allocation308_spill] sm:$0xff]  ;;  %v9856_v43 = vand.u32 4294901760, %v9673_v29 }
 0x229   :  { %4679 = vmatprep.subr.bf16.mxu1 %v9824_v54  ;;  %v1728_v19 = vsub.f32 %v9834_v47, %v9835_v18  ;;  %v9844_v47 = vld [vmem:[#allocation37_spill] sm:$0xff] }
 0x22a   :  { %v1716_v54 = vsub.f32 %v9832_v26, %v9833_v40  ;;  %v4690_v40 = vpack.c.bf16 %v1705_v59, %v1693_v60  ;;  %v1699_v26 = vand.u32 4294901760, %v1698_v8  ;;  %v9851_v8 = vand.u32 4294901760, %v9669_v53  ;;  %v9854_v60 = vld [vmem:[#allocation45_spill] sm:$0xff]  ;;  %v9860_v53 = vld [vmem:[#allocation51_spill] sm:$0xff] }
 0x22b   :  { %5261 = vmatpush1.bf16.msra.mxu0 %v9837_v42  ;;  %v9845_v42 = vand.u32 4294901760, %v9844_v47 }
 0x22c   :  { %4681 = vmatpush1.bf16.msra.mxu1 %v9831_v14  ;;  %5263 = vmatprep.subr.bf16.mxu0 %v9838_v44  ;;  %v9841_v14 = vld [vmem:[#allocation215_spill] sm:$0xff]  ;;  %v1717_v18 = vand.u32 4294901760, %v1716_v54  ;;  %v9855_v54 = vand.u32 4294901760, %v9854_v60 }
 0x22d   :  { %4683 = vmatprep.subr.bf16.mxu1 %v9836_v46  ;;  %v9842_v10 = vand.u32 4294901760, %v9841_v14  ;;  %v1729_v46 = vand.u32 4294901760, %v1728_v19  ;;  %v1722_v44 = vsub.f32 %v9844_v47, %v9845_v42 }
 0x22e   :  { %v1752_v42 = vsub.f32 %v9854_v60, %v9855_v54  ;;  %v9863_v54 = vand.u32 4294901760, %v9766_v55  ;;  %v1735_v60 = vand.u32 4294901760, %v1734_v11  ;;  %v9873_v11 = vld [vmem:[#allocation62_spill] sm:$0xff] }
 0x22f   :  { %v1681_v52 = vsub.f32 %v9841_v14, %v9842_v10  ;;  %5265 = vmatpush1.bf16.msra.mxu0 %v9849_v34  ;;  %v9850_v10 = vand.u32 4294901760, %v9670_v35  ;;  %v9858_v34 = vld [vmem:[#allocation50_spill] sm:$0xff]  ;;  %v1723_v29 = vand.u32 4294901760, %v1722_v44  ;;  %v9870_v44 = vand.u32 4294901760, %v9681_v7 }
 0x230   :  { %4685 = vmatpush1.bf16.msra.mxu1 %v9843_v9  ;;  %v9852_v9 = vld [vmem:[#allocation44_spill] sm:$0xff]  ;;  %5267 = vmatprep.subr.bf16.mxu0 %v5266_v5  ;;  %v9859_v32 = vand.u32 4294901760, %v9858_v34  ;;  %v4694_v5 = vpack.c.bf16 %v1729_v46, %v1717_v18 }
 0x231   :  { %4687 = vmatprep.subr.bf16.mxu1 %v9848_v2  ;;  %v5268_v59 = vpack.c.bf16 %v9851_v8, %v9850_v10  ;;  %v9853_v61 = vand.u32 4294901760, %v9852_v9  ;;  %v9857_v2 = vand.u32 4294901760, %v9672_v45  ;;  %v9861_v10 = vand.u32 4294901760, %v9860_v53 }
 0x232   :  { %v1746_v35 = vsub.f32 %v9858_v34, %v9859_v32  ;;  %v1682_v47 = vand.u32 4294901760, %v1681_v52  ;;  %3704 = vmatmul.mubr.f32.vlgmr.msra.gmra.mrb[0].mxu0 %v9863_v54  ;;  %v9864_v45 = vand.u32 4294901760, %v6824_v63  ;;  %v1753_v34 = vand.u32 4294901760, %v1752_v42  ;;  %v9875_v42 = vld [vmem:[#allocation63_spill] sm:$0xff] }
 0x233   :  { %v1740_v19 = vsub.f32 %v9852_v9, %v9853_v61  ;;  %v5270_v14 = vpack.c.bf16 %v9857_v2, %v9856_v43  ;;  %v1758_v8 = vsub.f32 %v9860_v53, %v9861_v10  ;;  %v4692_v61 = vpack.c.bf16 %v1711_v39, %v1699_v26  ;;  %v9862_v9 = vld [vmem:[#allocation206_spill] sm:$0xff]  ;;  %5269 = vmatpush1.bf16.msra.mxu0 %v5268_v59  ;;  %v9866_v10 = vld [vmem:[#allocation56_spill] sm:$0xff]  ;;  %v9868_v26 = vld [vmem:[#allocation57_spill] sm:$0xff] }
 0x234   :  { %4689 = vmatpush1.bf16.msra.mxu1 %v9862_v9  ;;  %v9865_v43 = vand.u32 4294901760, %v6830_v20  ;;  %v9867_v52 = vand.u32 4294901760, %v9866_v10  ;;  %v9869_v9 = vand.u32 4294901760, %v9868_v26  ;;  %v9871_v63 = vand.u32 4294901760, %v9680_v51 }
 0x235   :  { %4691 = vmatprep.subr.bf16.mxu1 %v4690_v40  ;;  %v1741_v32 = vand.u32 4294901760, %v1740_v19  ;;  %5271 = vmatprep.subr.bf16.mxu0 %v5270_v14  ;;  %v1747_v20 = vand.u32 4294901760, %v1746_v35  ;;  %v1759_v46 = vand.u32 4294901760, %v1758_v8  ;;  %v9872_v40 = vld [vmem:[#allocation18_spill] sm:$0xff]  ;;  %v9874_v59 = vand.u32 4294901760, %v9873_v11 }
 0x236   :  { %v5272_v2 = vpack.c.bf16 %v9865_v43, %v9864_v45  ;;  %v1764_v39 = vsub.f32 %v9866_v10, %v9867_v52  ;;  %v1776_v55 = vsub.f32 %v9868_v26, %v9869_v9  ;;  %v5274_v18 = vpack.c.bf16 %v9871_v63, %v9870_v44  ;;  %3967 = vmatprep.mubr.f32.mxu0 %v9872_v40  ;;  %v9877_v43 = vld [vmem:[#allocation67_spill] sm:$0xff]  ;;  %v9879_v52 = vld [vmem:[#allocation69_spill] sm:$0xff]  ;;  %v9881_v9 = vld [vmem:[#allocation210_spill] sm:$0xff] }
 0x237   :  { %1683 = vmatmul.mubr.f32.vlgmr.msra.gmra.mrb[0].mxu1 %v1682_v47  ;;  %v1770_v19 = vsub.f32 %v9873_v11, %v9874_v59  ;;  %v9876_v54 = vand.u32 4294901760, %v9875_v42  ;;  %v4696_v14 = vpack.c.bf16 %v1735_v60, %v1723_v29  ;;  %v9878_v7 = vand.u32 4294901760, %v9877_v43 }
 0x238   :  { %4693 = vmatpush1.bf16.msra.mxu1 %v4692_v61  ;;  %v9880_v35 = vand.u32 4294901760, %v9879_v52  ;;  %2074 = vmatprep.mubr.f32.mxu1 %v9881_v9  ;;  %v4698_v47 = vpack.c.bf16 %v1753_v34, %v1741_v32  ;;  %v9882_v44 = vand.u32 4294901760, %v9686_v62  ;;  %v9883_v63 = vand.u32 4294901760, %v9685_v13  ;;  %v9886_v9 = vld [vmem:[#allocation74_spill] sm:$0xff] }
 0x239   :  { %v1782_v45 = vsub.f32 %v9875_v42, %v9876_v54  ;;  %v1788_v51 = vsub.f32 %v9877_v43, %v9878_v7  ;;  %4695 = vmatprep.subr.bf16.mxu1 %v4694_v5  ;;  %5273 = vmatpush1.bf16.msra.mxu0 %v5272_v2  ;;  %v1765_v61 = vand.u32 4294901760, %v1764_v39  ;;  %v1777_v60 = vand.u32 4294901760, %v1776_v55  ;;  %v9888_v2 = vld [vmem:[#allocation75_spill] sm:$0xff] }
 0x23a   :  { %v1800_v8 = vsub.f32 %v9879_v52, %v9880_v35  ;;  %v5276_v59 = vpack.c.bf16 %v9883_v63, %v9882_v44  ;;  %5275 = vmatprep.subr.bf16.mxu0 %v5274_v18  ;;  %v4700_v29 = vpack.c.bf16 %v1759_v46, %v1747_v20  ;;  %v9884_v54 = vand.u32 4294901760, %v9689_v50  ;;  %v9890_v55 = vld [vmem:[#allocation79_spill] sm:$0xff]  ;;  %v9892_v20 = vld [vmem:[#allocation81_spill] sm:$0xff] }
 0x23b   :  { %v9885_v7 = vand.u32 4294901760, %v9688_v48  ;;  %v1771_v35 = vand.u32 4294901760, %v1770_v19  ;;  %v1783_v52 = vand.u32 4294901760, %v1782_v45  ;;  %v9887_v5 = vand.u32 4294901760, %v9886_v9 }
 0x23c   :  { %v9889_v62 = vand.u32 4294901760, %v9888_v2  ;;  %4697 = vmatpush1.bf16.msra.mxu1 %v4696_v14  ;;  %v1789_v32 = vand.u32 4294901760, %v1788_v51  ;;  %v1801_v39 = vand.u32 4294901760, %v1800_v8  ;;  %v9891_v18 = vand.u32 4294901760, %v9890_v55 }
 0x23d   :  { %v5278_v43 = vpack.c.bf16 %v9885_v7, %v9884_v54  ;;  %v1794_v34 = vsub.f32 %v9886_v9, %v9887_v5  ;;  %v9893_v48 = vand.u32 4294901760, %v9892_v20  ;;  %4699 = vmatprep.subr.bf16.mxu1 %v4698_v47  ;;  %5277 = vmatpush1.bf16.msra.mxu0 %v5276_v59  ;;  %v4702_v19 = vpack.c.bf16 %v1777_v60, %v1765_v61  ;;  %v9898_v5 = vld [vmem:[#allocation86_spill] sm:$0xff]  ;;  %v9900_v47 = vld [vmem:[#allocation87_spill] sm:$0xff] }
 0x23e   :  { %v1806_v13 = vsub.f32 %v9888_v2, %v9889_v62  ;;  %v1812_v50 = vsub.f32 %v9890_v55, %v9891_v18  ;;  %v9894_v45 = vand.u32 4294901760, %v9694_v37  ;;  %v9895_v44 = vand.u32 4294901760, %v9693_v4 }
 0x23f   :  { %v1824_v46 = vsub.f32 %v9892_v20, %v9893_v48  ;;  %5279 = vmatprep.subr.bf16.mxu0 %v5278_v43  ;;  %v9896_v14 = vand.u32 4294901760, %v9697_v38  ;;  %v9897_v51 = vand.u32 4294901760, %v9696_v24  ;;  %v1795_v54 = vand.u32 4294901760, %v1794_v34  ;;  %v9903_v38 = vld [vmem:[#allocation244_spill] sm:$0xff]  ;;  %v9905_v48 = vld [vmem:[#allocation91_spill] sm:$0xff] }
 0x240   :  { %v5280_v63 = vpack.c.bf16 %v9895_v44, %v9894_v45  ;;  %v1807_v7 = vand.u32 4294901760, %v1806_v13  ;;  %v9899_v62 = vand.u32 4294901760, %v9898_v5  ;;  %v9901_v59 = vand.u32 4294901760, %v9900_v47  ;;  %4701 = vmatpush1.bf16.msra.mxu1 %v4700_v29  ;;  %v9910_v29 = vld [vmem:[#allocation246_spill] sm:$0xff] }
 0x241   :  { %v5282_v8 = vpack.c.bf16 %v9897_v51, %v9896_v14  ;;  %v4704_v37 = vpack.c.bf16 %v1783_v52, %v1771_v35  ;;  %v4706_v4 = vpack.c.bf16 %v1801_v39, %v1789_v32  ;;  %v1813_v60 = vand.u32 4294901760, %v1812_v50  ;;  %4703 = vmatprep.subr.bf16.mxu1 %v4702_v19  ;;  %v9907_v14 = vld [vmem:[#allocation93_spill] sm:$0xff] }
 0x242   :  { %v1818_v18 = vsub.f32 %v9898_v5, %v9899_v62  ;;  %v1830_v61 = vsub.f32 %v9900_v47, %v9901_v59  ;;  %v1825_v43 = vand.u32 4294901760, %v1824_v46  ;;  %5281 = vmatpush1.bf16.msra.mxu0 %v5280_v63  ;;  %v9902_v24 = vand.u32 4294901760, %v9702_v57 }
 0x243   :  { %v9904_v34 = vand.u32 4294901760, %v9903_v38  ;;  %v9906_v45 = vand.u32 4294901760, %v9905_v48  ;;  %v9908_v51 = vand.u32 4294901760, %v9907_v14  ;;  %5283 = vmatprep.subr.bf16.mxu0 %v5282_v8  ;;  %v9909_v52 = vand.u32 4294901760, %v9705_v33  ;;  %v9916_v8 = vld [vmem:[#allocation99_spill] sm:$0xff] }
 0x244   :  { %v9911_v35 = vand.u32 4294901760, %v9910_v29  ;;  %v4708_v39 = vpack.c.bf16 %v1807_v7, %v1795_v54  ;;  %v1819_v50 = vand.u32 4294901760, %v1818_v18  ;;  %v1831_v57 = vand.u32 4294901760, %v1830_v61  ;;  %4705 = vmatpush1.bf16.msra.mxu1 %v4704_v37  ;;  %v9918_v18 = vld [vmem:[#allocation103_spill] sm:$0xff] }
 0x245   :  { %v5284_v13 = vpack.c.bf16 %v9904_v34, %v9902_v24  ;;  %v1836_v44 = vsub.f32 %v9905_v48, %v9906_v45  ;;  %v1848_v62 = vsub.f32 %v9907_v14, %v9908_v51  ;;  %v4710_v46 = vpack.c.bf16 %v1825_v43, %v1813_v60  ;;  %v9914_v24 = vld [vmem:[#allocation98_spill] sm:$0xff]  ;;  %4707 = vmatprep.subr.bf16.mxu1 %v4706_v4  ;;  %v9922_v43 = vld [vmem:[#allocation251_spill] sm:$0xff] }
 0x246   :  { %v5286_v32 = vpack.c.bf16 %v9911_v35, %v9909_v52  ;;  %v9912_v19 = vand.u32 4294901760, %v9519_v31  ;;  %v9913_v63 = vand.u32 4294901760, %v9520_v27  ;;  %v9915_v38 = vand.u32 4294901760, %v9914_v24  ;;  %v9920_v31 = vld [vmem:[#allocation105_spill] sm:$0xff]  ;;  %v9924_v52 = vld [vmem:[#allocation252_spill] sm:$0xff] }
 0x247   :  { %v9917_v45 = vand.u32 4294901760, %v9916_v8  ;;  %5285 = vmatpush1.bf16.msra.mxu0 %v5284_v13  ;;  %v1837_v54 = vand.u32 4294901760, %v1836_v44  ;;  %v1849_v7 = vand.u32 4294901760, %v1848_v62  ;;  %v9919_v61 = vand.u32 4294901760, %v9918_v18  ;;  %v9928_v13 = vld [vmem:[#allocation111_spill] sm:$0xff] }
 0x248   :  { %v5288_v59 = vpack.c.bf16 %v9913_v63, %v9912_v19  ;;  %v1842_v34 = vsub.f32 %v9914_v24, %v9915_v38  ;;  %v9921_v60 = vand.u32 4294901760, %v9920_v31  ;;  %5287 = vmatprep.subr.bf16.mxu0 %v5286_v32  ;;  %v9923_v51 = vand.u32 4294901760, %v9922_v43  ;;  %v9926_v19 = vld [vmem:[#allocation110_spill] sm:$0xff]  ;;  %v9930_v38 = vld [vmem:[#allocation115_spill] sm:$0xff]  ;;  %4709 = vmatpush1.bf16.msra.mxu1 %v4708_v39 }
 0x249   :  { %v1854_v33 = vsub.f32 %v9916_v8, %v9917_v45  ;;  %v1860_v37 = vsub.f32 %v9918_v18, %v9919_v61  ;;  %v9925_v29 = vand.u32 4294901760, %v9924_v52  ;;  %v9927_v63 = vand.u32 4294901760, %v9926_v19  ;;  %v9932_v18 = vld [vmem:[#allocation117_spill] sm:$0xff]  ;;  %4711 = vmatprep.subr.bf16.mxu1 %v4710_v46  ;;  %v9939_v46 = vld [vmem:[#allocation122_spill] sm:$0xff] }
 0x24a   :  { %v1872_v27 = vsub.f32 %v9920_v31, %v9921_v60  ;;  %v9929_v44 = vand.u32 4294901760, %v9928_v13  ;;  %v9931_v45 = vand.u32 4294901760, %v9930_v38  ;;  %v9933_v60 = vand.u32 4294901760, %v9932_v18 }
 0x24b   :  { %v5290_v35 = vpack.c.bf16 %v9925_v29, %v9923_v51  ;;  %v1866_v4 = vsub.f32 %v9926_v19, %v9927_v63  ;;  %v4712_v43 = vpack.c.bf16 %v1831_v57, %v1819_v50  ;;  %v1843_v52 = vand.u32 4294901760, %v1842_v34  ;;  %5289 = vmatpush1.bf16.msra.mxu0 %v5288_v59  ;;  %v9935_v19 = vld [vmem:[#allocation255_spill] sm:$0xff] }
 0x24c   :  { %v1878_v62 = vsub.f32 %v9928_v13, %v9929_v44  ;;  %v1884_v61 = vsub.f32 %v9930_v38, %v9931_v45  ;;  %v1896_v32 = vsub.f32 %v9932_v18, %v9933_v60  ;;  %v1855_v51 = vand.u32 4294901760, %v1854_v33 }
 0x24d   :  { %v4714_v29 = vpack.c.bf16 %v1849_v7, %v1837_v54  ;;  %v9934_v63 = vand.u32 4294901760, %v9716_v49  ;;  %v9936_v31 = vand.u32 4294901760, %v9935_v19  ;;  %v1861_v13 = vand.u32 4294901760, %v1860_v37  ;;  %5291 = vmatprep.subr.bf16.mxu0 %v5290_v35  ;;  %v9941_v49 = vld [vmem:[#allocation123_spill] sm:$0xff]  ;;  %4713 = vmatpush1.bf16.msra.mxu1 %v4712_v43 }
 0x24e   :  { %v1873_v8 = vand.u32 4294901760, %v1872_v27  ;;  %v9937_v45 = vand.u32 4294901760, %v9452_v58  ;;  %v9938_v38 = vand.u32 4294901760, %v9542_v12  ;;  %v1867_v39 = vand.u32 4294901760, %v1866_v4  ;;  %v9945_v12 = vld [vmem:[#allocation129_spill] sm:$0xff] }
 0x24f   :  { %v5292_v44 = vpack.c.bf16 %v9936_v31, %v9934_v63  ;;  %v1879_v50 = vand.u32 4294901760, %v1878_v62  ;;  %v1885_v57 = vand.u32 4294901760, %v1884_v61  ;;  %v1897_v34 = vand.u32 4294901760, %v1896_v32  ;;  %v9943_v31 = vld [vmem:[#allocation127_spill] sm:$0xff]  ;;  %4715 = vmatprep.subr.bf16.mxu1 %v4714_v29 }
 0x250   :  { %v5294_v60 = vpack.c.bf16 %v9938_v38, %v9937_v45  ;;  %v9940_v59 = vand.u32 4294901760, %v9939_v46  ;;  %v9942_v54 = vand.u32 4294901760, %v9941_v49  ;;  %v4716_v37 = vpack.c.bf16 %v1855_v51, %v1843_v52  ;;  %v9948_v38 = vld [vmem:[#allocation261_spill] sm:$0xff] }
 0x251   :  { %v9944_v27 = vand.u32 4294901760, %v9943_v31  ;;  %v9946_v35 = vand.u32 4294901760, %v9945_v12  ;;  %5293 = vmatpush1.bf16.msra.mxu0 %v5292_v44  ;;  %v4718_v4 = vpack.c.bf16 %v1873_v8, %v1861_v13  ;;  %v9947_v62 = vand.u32 4294901760, %v9721_v21  ;;  %v9952_v44 = vld [vmem:[#allocation134_spill] sm:$0xff]  ;;  %v9954_v13 = vld [vmem:[#allocation135_spill] sm:$0xff] }
 0x252   :  { %v1890_v33 = vsub.f32 %v9939_v46, %v9940_v59  ;;  %v1902_v7 = vsub.f32 %v9941_v49, %v9942_v54  ;;  %v9949_v61 = vand.u32 4294901760, %v9948_v38  ;;  %5295 = vmatprep.subr.bf16.mxu0 %v5294_v60  ;;  %v9950_v43 = vand.u32 4294901760, %v9724_v25  ;;  %4717 = vmatpush1.bf16.msra.mxu1 %v4716_v37  ;;  %v9965_v38 = vld [vmem:[#allocation146_spill] sm:$0xff] }
 0x253   :  { %v1908_v58 = vsub.f32 %v9943_v31, %v9944_v27  ;;  %v1920_v19 = vsub.f32 %v9945_v12, %v9946_v35  ;;  %v9951_v52 = vand.u32 4294901760, %v9723_v23  ;;  %v4720_v63 = vpack.c.bf16 %v1879_v50, %v1867_v39  ;;  %4719 = vmatprep.subr.bf16.mxu1 %v4718_v4  ;;  %v9958_v50 = vld [vmem:[#allocation139_spill] sm:$0xff] }
 0x254   :  { %v5296_v32 = vpack.c.bf16 %v9949_v61, %v9947_v62  ;;  %v4722_v45 = vpack.c.bf16 %v1897_v34, %v1885_v57  ;;  %v1891_v59 = vand.u32 4294901760, %v1890_v33  ;;  %v1903_v54 = vand.u32 4294901760, %v1902_v7  ;;  %v9960_v33 = vld [vmem:[#allocation141_spill] sm:$0xff] }
 0x255   :  { %v5298_v51 = vpack.c.bf16 %v9951_v52, %v9950_v43  ;;  %v1909_v27 = vand.u32 4294901760, %v1908_v58  ;;  %v1921_v29 = vand.u32 4294901760, %v1920_v19  ;;  %v9953_v8 = vand.u32 4294901760, %v9952_v44  ;;  %v9963_v19 = vld [vmem:[#allocation270_spill] sm:$0xff] }
 0x256   :  { %v9955_v35 = vand.u32 4294901760, %v9954_v13  ;;  %5297 = vmatpush1.bf16.msra.mxu0 %v5296_v32  ;;  %v9956_v23 = vand.u32 4294901760, %v9458_v16  ;;  %v9957_v25 = vand.u32 4294901760, %v9459_v15  ;;  %v9959_v57 = vand.u32 4294901760, %v9958_v50  ;;  %v9967_v15 = vld [vmem:[#allocation147_spill] sm:$0xff]  ;;  %4721 = vmatpush1.bf16.msra.mxu1 %v4720_v63 }
 0x257   :  { %v1914_v21 = vsub.f32 %v9952_v44, %v9953_v8  ;;  %v9961_v7 = vand.u32 4294901760, %v9960_v33  ;;  %5299 = vmatprep.subr.bf16.mxu0 %v5298_v51  ;;  %v9962_v58 = vand.u32 4294901760, %v9729_v36  ;;  %v9964_v62 = vand.u32 4294901760, %v9963_v19  ;;  %4723 = vmatprep.subr.bf16.mxu1 %v4722_v45  ;;  %v9972_v19 = vld [vmem:[#allocation151_spill] sm:$0xff]  ;;  %v9979_v45 = vld [vmem:[#allocation158_spill] sm:$0xff] }
 0x258   :  { %v1926_v60 = vsub.f32 %v9954_v13, %v9955_v35  ;;  %v5300_v39 = vpack.c.bf16 %v9957_v25, %v9956_v23  ;;  %v1932_v34 = vsub.f32 %v9958_v50, %v9959_v57  ;;  %v9966_v61 = vand.u32 4294901760, %v9965_v38  ;;  %v9970_v25 = vld [vmem:[#allocation273_spill] sm:$0xff] }
 0x259   :  { %v1944_v37 = vsub.f32 %v9960_v33, %v9961_v7  ;;  %v5302_v4 = vpack.c.bf16 %v9964_v62, %v9962_v58  ;;  %v9968_v32 = vand.u32 4294901760, %v9967_v15  ;;  %v4724_v52 = vpack.c.bf16 %v1903_v54, %v1891_v59  ;;  %v9977_v54 = vld [vmem:[#allocation276_spill] sm:$0xff] }
 0x25a   :  { %v1938_v16 = vsub.f32 %v9965_v38, %v9966_v61  ;;  %v4726_v8 = vpack.c.bf16 %v1921_v29, %v1909_v27  ;;  %v1915_v35 = vand.u32 4294901760, %v1914_v21  ;;  %v1927_v23 = vand.u32 4294901760, %v1926_v60  ;;  %5301 = vmatpush1.bf16.msra.mxu0 %v5300_v39  ;;  %v9974_v38 = vld [vmem:[#allocation153_spill] sm:$0xff] }
 0x25b   :  { %v1950_v43 = vsub.f32 %v9967_v15, %v9968_v32  ;;  %v9969_v51 = vand.u32 4294901760, %v9463_v41  ;;  %v9971_v36 = vand.u32 4294901760, %v9970_v25  ;;  %v1933_v7 = vand.u32 4294901760, %v1932_v34  ;;  %5303 = vmatprep.subr.bf16.mxu0 %v5302_v4  ;;  %v9981_v34 = vld [vmem:[#allocation159_spill] sm:$0xff]  ;;  %4725 = vmatpush1.bf16.msra.mxu1 %v4724_v52 }
 0x25c   :  { %v1945_v58 = vand.u32 4294901760, %v1944_v37  ;;  %v9973_v62 = vand.u32 4294901760, %v9972_v19  ;;  %v9975_v32 = vand.u32 4294901760, %v9974_v38  ;;  %v9976_v59 = vand.u32 4294901760, %v9465_v30  ;;  %v9985_v30 = vld [vmem:[#allocation165_spill] sm:$0xff]  ;;  %4727 = vmatprep.subr.bf16.mxu1 %v4726_v8 }
 0x25d   :  { %v5304_v57 = vpack.c.bf16 %v9971_v36, %v9969_v51  ;;  %v9978_v41 = vand.u32 4294901760, %v9977_v54  ;;  %v1939_v29 = vand.u32 4294901760, %v1938_v16  ;;  %v1951_v21 = vand.u32 4294901760, %v1950_v43  ;;  %v9983_v36 = vld [vmem:[#allocation163_spill] sm:$0xff] }
 0x25e   :  { %v1956_v61 = vsub.f32 %v9972_v19, %v9973_v62  ;;  %v1968_v63 = vsub.f32 %v9974_v38, %v9975_v32  ;;  %v9980_v60 = vand.u32 4294901760, %v9979_v45  ;;  %v9982_v37 = vand.u32 4294901760, %v9981_v34  ;;  %v9988_v54 = vld [vmem:[#allocation279_spill] sm:$0xff] }
 0x25f   :  { %v5306_v27 = vpack.c.bf16 %v9978_v41, %v9976_v59  ;;  %v4728_v25 = vpack.c.bf16 %v1927_v23, %v1915_v35  ;;  %v9984_v62 = vand.u32 4294901760, %v9983_v36  ;;  %v9986_v32 = vand.u32 4294901760, %v9985_v30  ;;  %5305 = vmatpush1.bf16.msra.mxu0 %v5304_v57 }
 0x260   :  { %v1962_v39 = vsub.f32 %v9979_v45, %v9980_v60  ;;  %v1974_v51 = vsub.f32 %v9981_v34, %v9982_v37  ;;  %v4730_v16 = vpack.c.bf16 %v1945_v58, %v1933_v7  ;;  %v9987_v43 = vand.u32 4294901760, %v9737_v22  ;;  %v9994_v7 = vld [vmem:[#allocation171_spill] sm:$0xff] }
 0x261   :  { %v1980_v4 = vsub.f32 %v9983_v36, %v9984_v62  ;;  %v1992_v59 = vsub.f32 %v9985_v30, %v9986_v32  ;;  %v9989_v41 = vand.u32 4294901760, %v9988_v54  ;;  %v1957_v45 = vand.u32 4294901760, %v1956_v61  ;;  %5307 = vmatprep.subr.bf16.mxu0 %v5306_v27  ;;  %v9992_v32 = vld [vmem:[#allocation170_spill] sm:$0xff]  ;;  %4729 = vmatpush1.bf16.msra.mxu1 %v4728_v25  ;;  %v9996_v27 = vld [vmem:[#allocation175_spill] sm:$0xff] }
 0x262   :  { %v1969_v37 = vand.u32 4294901760, %v1968_v63  ;;  %v4732_v52 = vpack.c.bf16 %v1951_v21, %v1939_v29  ;;  %v9990_v35 = vand.u32 4294901760, %v9468_v6  ;;  %v9991_v23 = vand.u32 4294901760, %v9591_v17  ;;  %v9998_v21 = vld [vmem:[#allocation177_spill] sm:$0xff]  ;;  %4731 = vmatprep.subr.bf16.mxu1 %v4730_v16  ;;  %v10006_v16 = vld [vmem:[#allocation183_spill] sm:$0xff] }
 0x263   :  { %v5308_v60 = vpack.c.bf16 %v9989_v41, %v9987_v43  ;;  %v1963_v36 = vand.u32 4294901760, %v1962_v39  ;;  %v1975_v34 = vand.u32 4294901760, %v1974_v51  ;;  %v9993_v8 = vand.u32 4294901760, %v9992_v32 }
 0x264   :  { %v5310_v62 = vpack.c.bf16 %v9991_v23, %v9990_v35  ;;  %v9995_v22 = vand.u32 4294901760, %v9994_v7  ;;  %v1981_v61 = vand.u32 4294901760, %v1980_v4  ;;  %v1993_v63 = vand.u32 4294901760, %v1992_v59 }
 0x265   :  { %v1986_v57 = vsub.f32 %v9992_v32, %v9993_v8  ;;  %v9997_v29 = vand.u32 4294901760, %v9996_v27  ;;  %v9999_v17 = vand.u32 4294901760, %v9998_v21  ;;  %5309 = vmatpush1.bf16.msra.mxu0 %v5308_v60  ;;  %v4734_v51 = vpack.c.bf16 %v1969_v37, %v1957_v45  ;;  %v10004_v8 = vld [vmem:[#allocation182_spill] sm:$0xff]  ;;  %4733 = vmatpush1.bf16.msra.mxu1 %v4732_v52  ;;  %v10017_v52 = vld [vmem:[#allocation293_spill] sm:$0xff] }
 0x266   :  { %v1998_v58 = vsub.f32 %v9994_v7, %v9995_v22  ;;  %v10000_v43 = vand.u32 4294901760, %v9743_v1  ;;  %v10001_v54 = vand.u32 4294901760, %v9742_v0  ;;  %5311 = vmatprep.subr.bf16.mxu0 %v5310_v62  ;;  %v10002_v25 = vand.u32 4294901760, %v9745_v28  ;;  %v10009_v28 = vld [vmem:[#allocation290_spill] sm:$0xff] }
 0x267   :  { %v2004_v6 = vsub.f32 %v9996_v27, %v9997_v29  ;;  %v2016_v39 = vsub.f32 %v9998_v21, %v9999_v17  ;;  %v10003_v4 = vand.u32 4294901760, %v9602_v56  ;;  %v1987_v35 = vand.u32 4294901760, %v1986_v57  ;;  %4735 = vmatprep.subr.bf16.mxu1 %v4734_v51  ;;  %v10011_v17 = vld [vmem:[#allocation187_spill] sm:$0xff] }
 0x268   :  { %v5312_v41 = vpack.c.bf16 %v10001_v54, %v10000_v43  ;;  %v1999_v23 = vand.u32 4294901760, %v1998_v58  ;;  %v10005_v22 = vand.u32 4294901760, %v10004_v8  ;;  %v10007_v60 = vand.u32 4294901760, %v10006_v16 }
 0x269   :  { %v5314_v59 = vpack.c.bf16 %v10003_v4, %v10002_v25  ;;  %v4736_v1 = vpack.c.bf16 %v1975_v34, %v1963_v36  ;;  %v4738_v0 = vpack.c.bf16 %v1993_v63, %v1981_v61  ;;  %v2005_v37 = vand.u32 4294901760, %v2004_v6  ;;  %v10013_v25 = vld [vmem:[#allocation189_spill] sm:$0xff]  ;;  %v10015_v34 = vld [vmem:[#allocation292_spill] sm:$0xff] }
 0x26a   :  { %v2010_v29 = vsub.f32 %v10004_v8, %v10005_v22  ;;  %v2022_v45 = vsub.f32 %v10006_v16, %v10007_v60  ;;  %v2017_v62 = vand.u32 4294901760, %v2016_v39  ;;  %5313 = vmatpush1.bf16.msra.mxu0 %v5312_v41  ;;  %v10008_v56 = vand.u32 4294901760, %v6977_v3  ;;  %v10019_v41 = vld [vmem:[#allocation294_spill] sm:$0xff] }
 0x26b   :  { %v10010_v57 = vand.u32 4294901760, %v10009_v28  ;;  %v10012_v43 = vand.u32 4294901760, %v10011_v17  ;;  %v10014_v4 = vand.u32 4294901760, %v10013_v25  ;;  %5315 = vmatprep.subr.bf16.mxu0 %v5314_v59  ;;  %v10016_v36 = vand.u32 4294901760, %v10015_v34  ;;  %4737 = vmatpush1.bf16.msra.mxu1 %v4736_v1  ;;  %v10025_v59 = vld [vmem:[#allocation195_spill] sm:$0xff] }
 0x26c   :  { %v10018_v61 = vand.u32 4294901760, %v10017_v52  ;;  %v4740_v6 = vpack.c.bf16 %v1999_v23, %v1987_v35  ;;  %v2011_v39 = vand.u32 4294901760, %v2010_v29  ;;  %v2023_v3 = vand.u32 4294901760, %v2022_v45  ;;  %4739 = vmatprep.subr.bf16.mxu1 %v4738_v0  ;;  %v10027_v29 = vld [vmem:[#allocation199_spill] sm:$0xff] }
 0x26d   :  { %v5316_v58 = vpack.c.bf16 %v10010_v57, %v10008_v56  ;;  %v2028_v54 = vsub.f32 %v10011_v17, %v10012_v43  ;;  %v2040_v22 = vsub.f32 %v10013_v25, %v10014_v4  ;;  %v4742_v51 = vpack.c.bf16 %v2017_v62, %v2005_v37  ;;  %v10021_v56 = vld [vmem:[#allocation296_spill] sm:$0xff]  ;;  %v10023_v43 = vld [vmem:[#allocation194_spill] sm:$0xff]  ;;  %v10031_v52 = vld [vmem:[#allocation299_spill] sm:$0xff] }
 0x26e   :  { %v5318_v63 = vpack.c.bf16 %v10018_v61, %v10016_v36  ;;  %v10020_v60 = vand.u32 4294901760, %v10019_v41  ;;  %v10022_v28 = vand.u32 4294901760, %v10021_v56  ;;  %v10024_v17 = vand.u32 4294901760, %v10023_v43  ;;  %v10029_v37 = vld [vmem:[#allocation202_spill] sm:$0xff] }
 0x26f   :  { %v10026_v25 = vand.u32 4294901760, %v10025_v59  ;;  %5317 = vmatpush1.bf16.msra.mxu0 %v5316_v58  ;;  %v2029_v35 = vand.u32 4294901760, %v2028_v54  ;;  %v2041_v23 = vand.u32 4294901760, %v2040_v22  ;;  %v10028_v45 = vand.u32 4294901760, %v10027_v29  ;;  %4741 = vmatpush1.bf16.msra.mxu1 %v4740_v6  ;;  %v10035_v54 = vld [vmem:[#allocation207_spill] sm:$0xff] }
 0x270   :  { %v5320_v57 = vpack.c.bf16 %v10022_v28, %v10020_v60  ;;  %v2034_v4 = vsub.f32 %v10023_v43, %v10024_v17  ;;  %v10030_v62 = vand.u32 4294901760, %v10029_v37  ;;  %5319 = vmatprep.subr.bf16.mxu0 %v5318_v63  ;;  %v10032_v61 = vand.u32 4294901760, %v10031_v52  ;;  %v10033_v17 = vld [vmem:[#allocation300_spill] sm:$0xff]  ;;  %4743 = vmatprep.subr.bf16.mxu1 %v4742_v51 }
 0x271   :  { %v2046_v34 = vsub.f32 %v10025_v59, %v10026_v25  ;;  %v2052_v1 = vsub.f32 %v10027_v29, %v10028_v45  ;;  %v10034_v41 = vand.u32 4294901760, %v10033_v17  ;;  %v4744_v56 = vpack.c.bf16 %v2023_v3, %v2011_v39  ;;  %v10037_v28 = vld [vmem:[#allocation208_spill] sm:$0xff]  ;;  %v10043_v3 = vld [vmem:[#allocation305_spill] sm:$0xff] }
 0x272   :  { %v2064_v36 = vsub.f32 %v10029_v37, %v10030_v62  ;;  %v2035_v0 = vand.u32 4294901760, %v2034_v4  ;;  %v10036_v25 = vand.u32 4294901760, %v10035_v54  ;;  %v10038_v45 = vand.u32 4294901760, %v10037_v28  ;;  %v10039_v62 = vld [vmem:[#allocation302_spill] sm:$0xff]  ;;  %v10041_v37 = vld [vmem:[#allocation303_spill] sm:$0xff] }
 0x273   :  { %v5322_v60 = vpack.c.bf16 %v10034_v41, %v10032_v61  ;;  %v2047_v58 = vand.u32 4294901760, %v2046_v34  ;;  %5321 = vmatpush1.bf16.msra.mxu0 %v5320_v57  ;;  %v4746_v63 = vpack.c.bf16 %v2041_v23, %v2029_v35  ;;  %v10040_v52 = vand.u32 4294901760, %v10039_v62  ;;  %v10045_v34 = vld [vmem:[#allocation307_spill] sm:$0xff]  ;;  %4745 = vmatpush1.bf16.msra.mxu1 %v4744_v56  ;;  %v10047_v57 = vld [vmem:[#allocation309_spill] sm:$0xff]  ;;  %v10049_v23 = vld [vmem:[#allocation310_spill] sm:$0xff] }
 0x274   :  { %v2058_v22 = vsub.f32 %v10035_v54, %v10036_v25  ;;  %v2070_v29 = vsub.f32 %v10037_v28, %v10038_v45  ;;  %v10042_v17 = vand.u32 4294901760, %v10041_v37  ;;  %v2053_v39 = vand.u32 4294901760, %v2052_v1  ;;  %v10053_v56 = vld [vmem:[#allocation216_spill] sm:$0xff] }
 0x275   :  { %v2065_v6 = vand.u32 4294901760, %v2064_v36  ;;  %5323 = vmatprep.subr.bf16.mxu0 %v5322_v60  ;;  %v10044_v4 = vand.u32 4294901760, %v10043_v3  ;;  %v10046_v41 = vand.u32 4294901760, %v10045_v34  ;;  %v4748_v54 = vpack.c.bf16 %v2047_v58, %v2035_v0  ;;  %4747 = vmatprep.subr.bf16.mxu1 %v4746_v63  ;;  %v10051_v36 = vld [vmem:[#allocation19_spill] sm:$0xff]  ;;  %v10052_v60 = vld [vmem:[#allocation21_spill] sm:$0xff]  ;;  %v10064_v34 = vld [vmem:[#allocation212_spill] sm:$0xff] }
 0x276   :  { %v5324_v61 = vpack.c.bf16 %v10042_v17, %v10040_v52  ;;  %v2059_v59 = vand.u32 4294901760, %v2058_v22  ;;  %v2071_v45 = vand.u32 4294901760, %v2070_v29  ;;  %v10048_v35 = vand.u32 4294901760, %v10047_v57  ;;  %v10054_v29 = vld [vmem:[#allocation26_spill] sm:$0xff]  ;;  %v10055_v0 = vld [vmem:[#allocation27_spill] sm:$0xff]  ;;  %v10057_v63 = vld [vmem:[#allocation217_spill] sm:$0xff] }
 0x277   :  { %v5326_v25 = vpack.c.bf16 %v10046_v41, %v10044_v4  ;;  %v4750_v51 = vpack.c.bf16 %v2065_v6, %v2053_v39  ;;  %v10050_v37 = vand.u32 4294901760, %v10049_v23  ;;  %4749 = vmatpush1.bf16.msra.mxu1 %v4748_v54  ;;  %v4754_v52 = vpack.c.bf16 %v10052_v60, %v10051_v36  ;;  %v10056_v22 = vld [vmem:[#allocation298_spill] sm:$0xff]  ;;  %v10058_v17 = vld [vmem:[#allocation32_spill] sm:$0xff]  ;;  %v10062_v6 = vld [vmem:[#allocation37_spill] sm:$0xff] }
 0x278   :  { %5325 = vmatpush1.bf16.msra.mxu0 %v5324_v61  ;;  %v4752_v1 = vpack.c.bf16 %v2071_v45, %v2059_v59  ;;  %v4756_v58 = vpack.c.bf16 %v10055_v0, %v10054_v29  ;;  %v10059_v61 = vld [vmem:[#allocation33_spill] sm:$0xff]  ;;  %v10060_v59 = vld [vmem:[#allocation218_spill] sm:$0xff]  ;;  %v10063_v3 = vld [vmem:[#allocation39_spill] sm:$0xff] }
 0x279   :  { %v5328_v62 = vpack.c.bf16 %v10050_v37, %v10048_v35  ;;  %5327 = vmatprep.subr.bf16.mxu0 %v5326_v25  ;;  %4751 = vmatprep.subr.bf16.mxu1 %v4750_v51  ;;  %v4758_v54 = vpack.c.bf16 %v10059_v61, %v10058_v17  ;;  %v10061_v39 = vld [vmem:[#allocation214_spill] sm:$0xff]  ;;  %v4760_v4 = vpack.c.bf16 %v10063_v3, %v10062_v6  ;;  %v10065_v41 = vld [vmem:[#allocation219_spill] sm:$0xff]  ;;  %v10066_v25 = vld [vmem:[#allocation44_spill] sm:$0xff] }
 0x27a   :  { %v10067_v45 = vld [vmem:[#allocation45_spill] sm:$0xff]  ;;  %v10068_v57 = vld [vmem:[#allocation220_spill] sm:$0xff]  ;;  %v10069_v35 = vld [vmem:[#allocation50_spill] sm:$0xff]  ;;  %v4766_v37 = vpack.c.bf16 %v9868_v26, %v9866_v10  ;;  %v4774_v26 = vpack.c.bf16 %v9892_v20, %v9890_v55 }
 0x27b   :  { %4753 = vmatpush1.bf16.msra.mxu1 %v4752_v1  ;;  %v4762_v51 = vpack.c.bf16 %v10067_v45, %v10066_v25  ;;  %v10070_v23 = vld [vmem:[#allocation221_spill] sm:$0xff]  ;;  %v4768_v1 = vpack.c.bf16 %v9875_v42, %v9873_v11  ;;  %v10073_v60 = vld [vmem:[#allocation67_spill] sm:$0xff]  ;;  %v10075_v29 = vld [vmem:[#allocation230_spill] sm:$0xff]  ;;  %v4776_v11 = vpack.c.bf16 %v9900_v47, %v9898_v5  ;;  %v4794_v25 = vpack.c.bf16 %v9960_v33, %v9958_v50 }
 0x27c   :  { %5329 = vmatpush1.bf16.msra.mxu0 %v5328_v62  ;;  %4755 = vmatprep.subr.bf16.mxu1 %v4754_v52  ;;  %v10071_v62 = vld [vmem:[#allocation222_spill] sm:$0xff]  ;;  %v10072_v36 = vld [vmem:[#allocation229_spill] sm:$0xff]  ;;  %v10076_v10 = vld [vmem:[#allocation239_spill] sm:$0xff] }
 0x27d   :  { %5331 = vmatprep.subr.bf16.mxu0 %v10053_v56  ;;  %v10074_v52 = vld [vmem:[#allocation69_spill] sm:$0xff]  ;;  %v10078_v42 = vld [vmem:[#allocation247_spill] sm:$0xff]  ;;  %v10085_v5 = vld [vmem:[#allocation110_spill] sm:$0xff] }
 0x27e   :  { %2076 = vmatmul.mubr.f32.vlgmr.msra.gmra.mrb[0].mxu1 %v10061_v39  ;;  %v4770_v56 = vpack.c.bf16 %v10074_v52, %v10073_v60  ;;  %v10077_v0 = vld [vmem:[#allocation241_spill] sm:$0xff]  ;;  %v10082_v20 = vld [vmem:[#allocation103_spill] sm:$0xff]  ;;  %v10089_v6 = vld [vmem:[#allocation262_spill] sm:$0xff] }
 0x27f   :  { %3969 = vmatmul.mubr.f32.vlgmr.msra.gmra.mrb[0].mxu0 %v10056_v22  ;;  %4757 = vmatpush1.bf16.msra.mxu1 %v4756_v58  ;;  %v4778_v58 = vpack.c.bf16 %v9907_v14, %v9905_v48  ;;  %v10081_v55 = vld [vmem:[#allocation253_spill] sm:$0xff]  ;;  %v10086_v47 = vld [vmem:[#allocation111_spill] sm:$0xff]  ;;  %v10090_v3 = vld [vmem:[#allocation266_spill] sm:$0xff] }
 0x280   :  { %5333 = vmatpush1.bf16.msra.mxu0 %v10057_v63  ;;  %4104 = vmatprep.mubr.f32.mxu0 %v9872_v40  ;;  %v4764_v40 = vpack.c.bf16 %v9860_v53, %v10069_v35  ;;  %v4772_v53 = vpack.c.bf16 %v9888_v2, %v9886_v9  ;;  %v10079_v63 = vld [vmem:[#allocation250_spill] sm:$0xff]  ;;  %v10080_v9 = vld [vmem:[#allocation99_spill] sm:$0xff]  ;;  %v10083_v17 = vld [vmem:[#allocation105_spill] sm:$0xff] }
 0x281   :  { %5335 = vmatprep.subr.bf16.mxu0 %v10060_v59  ;;  %2276 = vmatprep.mubr.f32.mxu1 %v10064_v34  ;;  %v4780_v2 = vpack.c.bf16 %v10080_v9, %v9914_v24  ;;  %v4782_v61 = vpack.c.bf16 %v10083_v17, %v10082_v20  ;;  %v4784_v59 = vpack.c.bf16 %v10086_v47, %v10085_v5  ;;  %v10087_v48 = vld [vmem:[#allocation259_spill] sm:$0xff]  ;;  %v10091_v34 = vld [vmem:[#allocation268_spill] sm:$0xff]  ;;  %v10093_v45 = vld [vmem:[#allocation274_spill] sm:$0xff] }
 0x282   :  { %4759 = vmatprep.subr.bf16.mxu1 %v4758_v54  ;;  %v10084_v54 = vld [vmem:[#allocation256_spill] sm:$0xff]  ;;  %v10088_v14 = vld [vmem:[#allocation115_spill] sm:$0xff]  ;;  %v4788_v24 = vpack.c.bf16 %v9941_v49, %v9939_v46  ;;  %v10094_v46 = vld [vmem:[#allocation146_spill] sm:$0xff] }
 0x283   :  { %4761 = vmatpush1.bf16.msra.mxu1 %v4760_v4  ;;  %v4786_v39 = vpack.c.bf16 %v9932_v18, %v10088_v14  ;;  %v4790_v4 = vpack.c.bf16 %v9945_v12, %v9943_v31  ;;  %v10092_v18 = vld [vmem:[#allocation272_spill] sm:$0xff]  ;;  %v4796_v49 = vpack.c.bf16 %v9967_v15, %v10094_v46  ;;  %v10095_v31 = vld [vmem:[#allocation277_spill] sm:$0xff]  ;;  %v4798_v12 = vpack.c.bf16 %v9974_v38, %v9972_v19  ;;  %v10099_v50 = vld [vmem:[#allocation283_spill] sm:$0xff] }
 0x284   :  { %5337 = vmatpush1.bf16.msra.mxu0 %v10065_v41  ;;  %4763 = vmatprep.subr.bf16.mxu1 %v4762_v51  ;;  %v4792_v41 = vpack.c.bf16 %v9954_v13, %v9952_v44  ;;  %v10096_v51 = vld [vmem:[#allocation280_spill] sm:$0xff]  ;;  %v10097_v44 = vld [vmem:[#allocation158_spill] sm:$0xff]  ;;  %v10098_v13 = vld [vmem:[#allocation159_spill] sm:$0xff]  ;;  %v4804_v15 = vpack.c.bf16 %v9994_v7, %v9992_v32  ;;  %v4806_v19 = vpack.c.bf16 %v9998_v21, %v9996_v27 }
 0x285   :  { %5339 = vmatprep.subr.bf16.mxu0 %v10068_v57  ;;  %v4800_v57 = vpack.c.bf16 %v10098_v13, %v10097_v44  ;;  %v10100_v33 = vld [vmem:[#allocation163_spill] sm:$0xff]  ;;  %v10102_v38 = vld [vmem:[#allocation289_spill] sm:$0xff]  ;;  %v10111_v52 = vld [vmem:[#allocation202_spill] sm:$0xff] }
 0x286   :  { %v4802_v35 = vpack.c.bf16 %v9985_v30, %v10100_v33  ;;  %v10104_v30 = vld [vmem:[#allocation295_spill] sm:$0xff]  ;;  %v10107_v60 = vld [vmem:[#allocation297_spill] sm:$0xff] }
 0x287   :  { %4765 = vmatpush1.bf16.msra.mxu1 %v4764_v40  ;;  %v10101_v40 = vld [vmem:[#allocation286_spill] sm:$0xff]  ;;  %v10108_v32 = vld [vmem:[#allocation195_spill] sm:$0xff]  ;;  %v10109_v27 = vld [vmem:[#allocation301_spill] sm:$0xff] }
 0x288   :  { %5341 = vmatpush1.bf16.msra.mxu0 %v10070_v23  ;;  %4767 = vmatprep.subr.bf16.mxu1 %v4766_v37  ;;  %v10103_v23 = vld [vmem:[#allocation291_spill] sm:$0xff]  ;;  %v4808_v37 = vpack.c.bf16 %v10006_v16, %v10004_v8  ;;  %v4812_v7 = vpack.c.bf16 %v10108_v32, %v10023_v43 }
 0x289   :  { %5343 = vmatprep.subr.bf16.mxu0 %v10071_v62  ;;  %v10105_v62 = vld [vmem:[#allocation187_spill] sm:$0xff] }
 0x28a   :  { %v10110_v21 = vld [vmem:[#allocation199_spill] sm:$0xff] }
 0x28b   :  { %4769 = vmatpush1.bf16.msra.mxu1 %v4768_v1  ;;  %v10106_v1 = vld [vmem:[#allocation189_spill] sm:$0xff]  ;;  %v10113_v8 = vld [vmem:[#allocation207_spill] sm:$0xff] }
 0x28c   :  { %5345 = vmatpush1.bf16.msra.mxu0 %v10072_v36  ;;  %4771 = vmatprep.subr.bf16.mxu1 %v4770_v56  ;;  %v4810_v36 = vpack.c.bf16 %v10106_v1, %v10105_v62  ;;  %v4814_v56 = vpack.c.bf16 %v10111_v52, %v10110_v21  ;;  %v4816_v16 = vpack.c.bf16 %v10037_v28, %v10113_v8  ;;  %v4114_v43 = vld [vmem:[#allocation6] sm:$0xff]  ;;  %v259_v28 = vstv %s8207_s3  ;;  %s5597_s3 = smov [#allocation10]  }
 0x28d   :  { %5347 = vmatprep.subr.bf16.mxu0 %v10075_v29  ;;  %v10112_v29 = vld [vmem:[#allocation304_spill] sm:$0xff]  ;;  %s4215_s10 = sshll.u32 %s5597_s3, 4  ;;  %s4216_s10 = int_to_ptr.vmem [resolvable:$true] %s4215_s10 }
 0x28e   :  { %s5518_s13 = scalar_lea.vmem %s4216_s10, 256  ;;  %p5523_p11 = scmp.lt.s32.totalorder %s4216_s10, %s4216_s10 }
 0x28f   :  { %4773 = vmatpush1.bf16.msra.mxu1 %v4772_v53  ;;  %v10114_v53 = vld [vmem:[#allocation308_spill] sm:$0xff]  ;;  %p5519_p10 = scmp.ne.s32.totalorder %s4216_s10, %s5518_s13  ;;  %p5524_p12 = scmp.lt.s32.totalorder %s5518_s13, %s5518_s13 }
 0x290   :  { %5349 = vmatpush1.bf16.msra.mxu0 %v10076_v10  ;;  %4775 = vmatprep.subr.bf16.mxu1 %v4774_v26  ;;  %v10115_v10 = vld [vmem:[#allocation215_spill] sm:$0xff] }
 0x291   :  { %5351 = vmatprep.subr.bf16.mxu0 %v10077_v0  ;;  %v4115_v26 = vld [vmem:[#allocation6 + $0x8] sm:$0xff]  ;;  %p5525_p13 = por %p5524_p12, %p5523_p11 }
 0x292   :  { %v4117_v0 = vsub.f32 1.0, %v4115_v26 }
 0x293   :  { %4777 = vmatpush1.bf16.msra.mxu1 %v4776_v11  ;;  %v4174_v11 = vadd.f32 %v4115_v26, %v4114_v43  ;;  %p5526_p0 = pnand %p5525_p13, %p5519_p10 }
 0x294   :  { %5353 = vmatpush1.bf16.msra.mxu0 %v10078_v42  ;;  %4779 = vmatprep.subr.bf16.mxu1 %v4778_v58  ;;  %v4116_v42 = vsub.f32 1.0, %v4114_v43  ;;  %4119 = vst [vmem:[#allocation10 + $0x8] sm:$0xff] %v4117_v0 }
 0x295   :  { %5355 = vmatprep.subr.bf16.mxu0 %v10079_v63  ;;  %4175 = vadd.xlane.f32.xlu1 %v4174_v11 }
 0x296   :  { %4118 = vst [vmem:[#allocation10] sm:$0xff] %v4116_v42 }
 0x297   :  { %4781 = vmatpush1.bf16.msra.mxu1 %v4780_v2 }
 0x298   :  { %5357 = vmatpush1.bf16.msra.mxu0 %v10081_v55  ;;  %4783 = vmatprep.subr.bf16.mxu1 %v4782_v61 }
 0x299   :  { %5359 = vmatprep.subr.bf16.mxu0 %v10084_v54 }
 0x29b   :  { %4785 = vmatpush1.bf16.msra.mxu1 %v4784_v59 }
 0x29c   :  { %5361 = vmatpush1.bf16.msra.mxu0 %v10087_v48  ;;  %4787 = vmatprep.subr.bf16.mxu1 %v4786_v39 }
 0x29d   :  { %5363 = vmatprep.subr.bf16.mxu0 %v10089_v6 }
 0x29f   :  { %4789 = vmatpush1.bf16.msra.mxu1 %v4788_v24 }
 0x2a0   :  { %5365 = vmatpush1.bf16.msra.mxu0 %v10090_v3  ;;  %4791 = vmatprep.subr.bf16.mxu1 %v4790_v4 }
 0x2a1   :  { %5367 = vmatprep.subr.bf16.mxu0 %v10091_v34 }
 0x2a3   :  { %4793 = vmatpush1.bf16.msra.mxu1 %v4792_v41 }
 0x2a4   :  { %5369 = vmatpush1.bf16.msra.mxu0 %v10092_v18  ;;  %4795 = vmatprep.subr.bf16.mxu1 %v4794_v25 }
 0x2a5   :  { %5371 = vmatprep.subr.bf16.mxu0 %v10093_v45 }
 0x2a7   :  { %4797 = vmatpush1.bf16.msra.mxu1 %v4796_v49 }
 0x2a8   :  { %5373 = vmatpush1.bf16.msra.mxu0 %v10095_v31  ;;  %4799 = vmatprep.subr.bf16.mxu1 %v4798_v12 }
 0x2a9   :  { %5375 = vmatprep.subr.bf16.mxu0 %v10096_v51 }
 0x2ab   :  { %4801 = vmatpush1.bf16.msra.mxu1 %v4800_v57 }
 0x2ac   :  { %5377 = vmatpush1.bf16.msra.mxu0 %v10099_v50  ;;  %4803 = vmatprep.subr.bf16.mxu1 %v4802_v35 }
 0x2ad   :  { %5379 = vmatprep.subr.bf16.mxu0 %v10101_v40 }
 0x2af   :  { %4805 = vmatpush1.bf16.msra.mxu1 %v4804_v15 }
 0x2b0   :  { %5381 = vmatpush1.bf16.msra.mxu0 %v10102_v38  ;;  %4807 = vmatprep.subr.bf16.mxu1 %v4806_v19 }
 0x2b1   :  { %5383 = vmatprep.subr.bf16.mxu0 %v10103_v23 }
 0x2b3   :  { %4809 = vmatpush1.bf16.msra.mxu1 %v4808_v37 }
 0x2b4   :  { %5385 = vmatpush1.bf16.msra.mxu0 %v10104_v30  ;;  %4811 = vmatprep.subr.bf16.mxu1 %v4810_v36 }
 0x2b5   :  { %5387 = vmatprep.subr.bf16.mxu0 %v10107_v60 }
 0x2b7   :  { %4813 = vmatpush1.bf16.msra.mxu1 %v4812_v7 }
 0x2b8   :  { %5389 = vmatpush1.bf16.msra.mxu0 %v10109_v27  ;;  %4815 = vmatprep.subr.bf16.mxu1 %v4814_v56 }
 0x2b9   :  { %5391 = vmatprep.subr.bf16.mxu0 %v10112_v29 }
 0x2bb   :  { %4817 = vmatpush1.bf16.msra.mxu1 %v4816_v16 }
 0x2bc   :  { %5393 = vmatpush1.bf16.msra.mxu0 %v10114_v53 }
 0x2be   :  { %2279 = vmatmul.mubr.f32.vlgmr.msra.gmra.mrb[0].mxu1 %v10115_v10 }
 0x2bf   :  { %4106 = vmatmul.mubr.f32.vlgmr.msra.gmra.mrb[0].mxu0 %v10056_v22 }
 0x391   :  { %v2280_v9 = vpop.f32.mrb[0].mxu1 }
 0x392   :  { %v4107_v58 = vpop.f32.mrb[0].mxu0  ;;  %v5394_v2 = vadd.f32 %v2280_v9, %v259_v28  ;;  %v2282_v55 = vpop.f32.mrb[1].mxu1 }
 0x393   :  { %v4109_v63 = vpop.f32.mrb[1].mxu0  ;;  %v5396_v22 = vadd.f32 %v2282_v55, %v259_v28 }
 0x394   :  { %v5395_v20 = vadd.f32 %v5394_v2, %v4107_v58 }
 0x395   :  { %v5397_v17 = vadd.f32 %v5396_v22, %v4109_v63 }
 0x396   :  { %v4126_v61 = vand.u32 2147483647, %v5395_v20  ;;  %4112 = vst [vmem:[#allocation9] sm:$0xff] %v5395_v20  ;;  %v4122_v18 = vmul.f32 %v5395_v20, %v4114_v43  ;;  %v4120_v25 = vmax.f32 %v5395_v20, 0.0 }
 0x397   :  { %v4127_v54 = vand.u32 2147483647, %v5397_v17  ;;  %4113 = vst [vmem:[#allocation9 + $0x8] sm:$0xff] %v5397_v17  ;;  %v4164_v5 = vadd.f32 %v5397_v17, %v5395_v20  ;;  %v4123_v49 = vmul.f32 %v5397_v17, %v4115_v26  ;;  %v4121_v31 = vmax.f32 %v5397_v17, 0.0 }
 0x398   :  { %v4128_v47 = vsub.f32 0.0, %v4126_v61  ;;  %v4124_v50 = vsub.f32 %v4120_v25, %v4122_v18 }
 0x399   :  { %v4129_v59 = vsub.f32 0.0, %v4127_v54  ;;  %v4125_v40 = vsub.f32 %v4121_v31, %v4123_v49 }
 0x39a   :  { %v4130_v48 = vmul.f32 1.442695, %v4128_v47 }
 0x39b   :  { %v4132_v14 = vmul.f32 1.442695, %v4129_v59 }
 0x39c   :  { %5444 = vpow2.f32 %v4130_v48 }
 0x39d   :  { %5446 = vpow2.f32 %v4132_v14 }
 0x3a6   :  { %v5445_v39 = vpop.eup %5444 }
 0x3a7   :  { %v5447_v6 = vpop.eup %5446  ;;  %v4134_v24 = vadd.f32 1.0, %v5445_v39  ;;  %v4137_v4 = vmul.f32 -0.5, %v5445_v39  ;;  %v4140_v45 = vand.u32 2147483647, %v5445_v39 }
 0x3a8   :  { %v4143_v3 = vadd.f32 1.0, %v5447_v6  ;;  %v4146_v34 = vmul.f32 -0.5, %v5447_v6  ;;  %v4149_v12 = vand.u32 2147483647, %v5447_v6 }
 0x3a9   :  { %5448 = vlog2.f32 %v4134_v24  ;;  %v4138_v41 = vadd.f32 1.0, %v4137_v4  ;;  %vm4141_vm0 = vcmp.lt.f32.partialorder %v4140_v45, 0.0004427343 }
 0x3aa   :  { %5450 = vlog2.f32 %v4143_v3  ;;  %v4147_v46 = vadd.f32 1.0, %v4146_v34  ;;  %vm4150_vm1 = vcmp.lt.f32.partialorder %v4149_v12, 0.0004427343 }
 0x3ab   :  { %v4139_v57 = vmul.f32 %v5445_v39, %v4138_v41 }
 0x3ac   :  { %v4148_v35 = vmul.f32 %v5447_v6, %v4147_v46 }
 0x3b3   :  { %v5449_v51 = vpop.eup %5448 }
 0x3b4   :  { %v5451_v44 = vpop.eup %5450  ;;  %v4136_v13 = vmul.f32 0.6931472, %v5449_v51 }
 0x3b5   :  { %v4145_v33 = vmul.f32 0.6931472, %v5451_v44 }
 0x3b6   :  { %v4142_v15 = vsel %vm4141_vm0, %v4139_v57, %v4136_v13 }
 0x3b7   :  { %v4151_v38 = vsel %vm4150_vm1, %v4148_v35, %v4145_v33  ;;  %v4152_v19 = vadd.f32 %v4142_v15, %v4124_v50 }
 0x3b8   :  { %v4153_v23 = vadd.f32 %v4151_v38, %v4125_v40 }
 0x3ba   :  { %v4154_v37 = vadd.f32 %v4153_v23, %v4152_v19 }
 0x3bc   :  { %4155 = vadd.xlane.f32.xlu0 %v4154_v37 }
 0x3c0   :  { %4165 = vadd.xlane.f32.xlu0 %v4164_v5 }
 0x3c1   :  { %5529 = shalt.err (!%p5526_p0)
}
 0x3c2   :  { %s5530_s16 = scalar_lea.hbm %s8209_s5, 256 }
 0x3c3   :  { %p5531_p1 = scmp.ne.s32.totalorder %s8209_s5, %s5530_s16  ;;  %p5534_p2 = scmp.lt.u32.totalorder %s5530_s16, %s8209_s5 }
 0x3c5   :  { %p5536_p3 = pnand %p5534_p2, %p5531_p1 }
 0x3c7   :  { %5539 = shalt.err (!%p5536_p3)
}
 0x3c8   :  { %4218 = dma.vmem_to_hbm [thread:$0]  %s4216_s10, 256, %s8209_s5, [#allocation11]  }
 0x3c9   :  { %s5540_s22 = scalar_lea.vmem %s4206_s12, 256  ;;  %p5545_p5 = scmp.lt.s32.totalorder %s4206_s12, %s4206_s12 }
 0x3ca   :  { %p5541_p4 = scmp.ne.s32.totalorder %s4206_s12, %s5540_s22  ;;  %p5546_p6 = scmp.lt.s32.totalorder %s5540_s22, %s5540_s22 }
 0x3cc   :  { %p5547_p7 = por %p5546_p6, %p5545_p5 }
 0x3ce   :  { %p5548_p8 = pnand %p5547_p7, %p5541_p4 }
 0x3d0   :  { %5551 = shalt.err (!%p5548_p8)
}
 0x3d1   :  { %s5552_s26 = scalar_lea.hbm %s8208_s4, 256 }
 0x3d2   :  { %p5553_p9 = scmp.ne.s32.totalorder %s8208_s4, %s5552_s26  ;;  %p5556_p10 = scmp.lt.u32.totalorder %s5552_s26, %s8208_s4 }
 0x3d4   :  { %p5558_p11 = pnand %p5556_p10, %p5553_p9 }
 0x3d6   :  { %5561 = shalt.err (!%p5558_p11)
}
 0x3d7   :  { %4208 = dma.vmem_to_hbm [thread:$0]  %s4206_s12, 256, %s8208_s4, [#allocation5]   ;;  %v4176_v30 = vpop.xlane.xlu1 %4175  ;;  %v4184_v58 = vlaneseq }
 0x3d8   :  { %v4177_v62 = vrot.slane %v4176_v30, 4  ;;  %s5599_s2 = smov [#allocation12]  }
 0x3d9   :  { %v4185_v28 = vand.u32 127, %v4184_v58  ;;  %s4225_s9 = sshll.u32 %s5599_s2, 4  ;;  %s4226_s9 = int_to_ptr.vmem [resolvable:$true] %s4225_s9 }
 0x3da   :  { %v4178_v1 = vadd.f32 %v4177_v62, %v4176_v30  ;;  %s5562_s3 = scalar_lea.vmem %s4226_s9, 16  ;;  %s5566_s10 = scalar_lea.vmem %s4226_s9, 32 }
 0x3db   :  { %vm4186_vm2 = vcmp.eq.s32.totalorder %v4185_v28, 0  ;;  %vm4189_vm3 = vcmp.eq.s32.totalorder %v4185_v28, 1  ;;  %vm4194_vm4 = vcmp.eq.s32.totalorder %v4185_v28, 2  ;;  %p5563_p12 = scmp.ne.s32.totalorder %s4226_s9, %s5562_s3  ;;  %p5567_p13 = scmp.lt.s32.totalorder %s4226_s9, %s4226_s9 }
 0x3dc   :  { %v4179_v7 = vrot.slane %v4178_v1, 2  ;;  %p5568_p0 = scmp.lt.s32.totalorder %s5566_s10, %s5562_s3 }
 0x3de   :  { %v4180_v8 = vadd.f32 %v4179_v7, %v4178_v1  ;;  %p5569_p1 = por %p5568_p0, %p5567_p13 }
 0x3e0   :  { %v4181_v26 = vrot.slane %v4180_v8, 1  ;;  %p5570_p2 = pnand %p5569_p1, %p5563_p12 }
 0x3e2   :  { %v4182_v42 = vadd.f32 %v4181_v26, %v4180_v8 }
 0x449   :  { %v4156_v36 = vpop.xlane.xlu0 %4155 }
 0x44a   :  { %v4157_v60 = vrot.slane %v4156_v36, 4 }
 0x44c   :  { %v4158_v32 = vadd.f32 %v4157_v60, %v4156_v36 }
 0x44d   :  { %v4166_v27 = vpop.xlane.xlu0 %4165 }
 0x44e   :  { %v4159_v21 = vrot.slane %v4158_v32, 2  ;;  %v4167_v52 = vrot.slane %v4166_v27, 4 }
 0x450   :  { %v4168_v56 = vadd.f32 %v4167_v52, %v4166_v27  ;;  %v4160_v29 = vadd.f32 %v4159_v21, %v4158_v32 }
 0x452   :  { %v4169_v16 = vrot.slane %v4168_v56, 2  ;;  %v4161_v53 = vrot.slane %v4160_v29, 1 }
 0x454   :  { %v4170_v10 = vadd.f32 %v4169_v16, %v4168_v56  ;;  %v4162_v43 = vadd.f32 %v4161_v53, %v4160_v29 }
 0x456   :  { %5430 = vpush %v4162_v43  ;;  %v4171_v0 = vrot.slane %v4170_v10, 1 }
 0x458   :  { %v4172_v11 = vadd.f32 %v4171_v0, %v4170_v10 }
 0x45a   :  { %5432 = vpush %v4172_v11 }
 0x45b   :  { %5434 = vpush %v4182_v42 }
 0x487   :  { %s5431_s4 = spop %5430 }
 0x488   :  { %v4187_v63 = vstv %s5431_s4 }
 0x489   :  { %v4188_v55 = vsel %vm4186_vm2, %v4187_v63, 0.0 }
 0x48b   :  { %s5433_s24 = spop %5432 }
 0x48c   :  { %s5435_s7 = spop %5434  ;;  %v4195_v9 = vstv %s5433_s24 }
 0x48d   :  { %s4190_s8 = ssub.f32 %s5433_s24, %s5435_s7  ;;  %v4196_v17 = vsel %vm4194_vm4, %v4195_v9, 0.0 }
 0x48f   :  { %v4191_v2 = vstv %s4190_s8 }
 0x490   :  { %v4192_v22 = vsel %vm4189_vm3, %v4191_v2, 0.0 }
 0x491   :  { %v4193_v20 = vadd.f32 %v4192_v22, %v4188_v55 }
 0x493   :  { %v4197_v61 = vadd.f32 %v4196_v17, %v4193_v20 }
 0x495   :  { %4198 = vst [vmem:[#allocation12] sm:$0x1] %v4197_v61 }
 0x496   :  { %5573 = shalt.err (!%p5570_p2)
}
 0x497   :  { %s5574_s13 = scalar_lea.hbm %s8210_s6, 16 }
 0x498   :  { %p5575_p3 = scmp.ne.s32.totalorder %s8210_s6, %s5574_s13  ;;  %p5578_p4 = scmp.lt.u32.totalorder %s5574_s13, %s8210_s6 }
 0x49a   :  { %p5580_p5 = pnand %p5578_p4, %p5575_p3 }
 0x49c   :  { %5583 = shalt.err (!%p5580_p5)
}
 0x49d   :  { %4228 = dma.vmem_to_hbm [thread:$0]  %s4226_s9, 16, %s8210_s6, [#allocation11]  }
 0x49e   :  { %5588 = dma.done.wait [#allocation5], 256  }
 0x49f   :  { %5589 = vsyncadd [#allocation5], 4294967040 }
 0x4a0   :  { %5590 = dma.done.wait [#allocation11], 272  }
 0x4a1   :  { %5591 = vsyncadd [#allocation11], 4294967024 }
 0x4a2   :  { %4238 = vsyncpa [#allocation4], 1 }
 0x4a3   :  { %4239 = vsyncpa [#allocation7], 1 }
 0x4a4   :  { %4240 = vsyncpa [#allocation5], 1 }
 0x4a5   :  { %4241 = vsyncpa [#allocation11], 1 }

</bundles_post_ra>
